<compile_context>
chip_gen: v7x
topology: tpu7x:2x2x1
jax: 0.10.0
libtpu: 0.0.40
codegen_flags: <defaults>
</compile_context>

<pallas_src>
import math
import numpy as np
import jax
import jax.numpy as jnp
from jax.experimental import pallas as pl
from jax.experimental.pallas import tpu as pltpu

N_BATCH = 2
L_SEQ = 16            # NOTE: the module's weight_Attention feeds (N,3,L) into Linear(node_feat_dim,...)
NODE_DIM = 16         #       so L must equal node_feat_dim for the reference code to be well-formed.
PAIR_DIM = 8
NUM_HEADS = 8
QK_DIM = 16
V_DIM = 16            # module requires value_dim == query_key_dim (see _heads() usage)
INF = 100000.0


# ----------------------------------------------------------------------------
# Kernel 1: per-row logit sums (feeds weight_Attention), no (N,H,L,L) HBM tensors
# ----------------------------------------------------------------------------
def _logit_sums_kernel(csum_ref, x_ref, z_ref, d_ref, wqk_ref, wpb_ref, s_ref):
    hc = NUM_HEADS * QK_DIM
    bf16 = jnp.bfloat16
    # fused q|k projection: one (L,16)x(16,256) MXU pass (lane-dense output)
    qk = jnp.dot(x_ref[0].astype(bf16), wqk_ref[...].astype(bf16),
                 preferred_element_type=jnp.float32)                      # (L, 2*H*C)
    ksum = jnp.sum(qk[:, hc:], axis=0, keepdims=True)                     # (1, H*C)
    node_sum = jnp.sum(qk[:, :hc] * ksum, axis=-1, keepdims=True) * (1.0 / math.sqrt(QK_DIM))
    zsum = jnp.sum(z_ref[0], axis=1)                                      # (L, P) sum over keys
    pair_sum = jnp.sum(jnp.dot(zsum.astype(bf16), wpb_ref[...].astype(bf16),
                               preferred_element_type=jnp.float32),
                       axis=-1, keepdims=True)                            # (L, 1)
    d2 = d_ref[0] * d_ref[0]                                              # f32 on the VPU
    dist_sum = jnp.sum(d2, axis=-1, keepdims=True) * csum_ref[0]          # (L, 1)
    s_ref[0] = jnp.concatenate([node_sum, pair_sum, dist_sum], axis=-1)   # (L, 3)


def pallas_logit_sums(csum, x, z, d, w_qk, w_pb):
    n, l, dd = x.shape
    pdim = z.shape[-1]
    two_hc = w_qk.shape[1]
    return pl.pallas_call(
        _logit_sums_kernel,
        out_shape=jax.ShapeDtypeStruct((n, l, 3), jnp.float32),
        grid=(n,),
        in_specs=[pl.BlockSpec(memory_space=pltpu.MemorySpace.SMEM),
                  pl.BlockSpec((1, l, dd), lambda b: (b, 0, 0)),
                  pl.BlockSpec((1, l, l, pdim), lambda b: (b, 0, 0, 0)),
                  pl.BlockSpec((1, l, l), lambda b: (b, 0, 0)),
                  pl.BlockSpec((dd, two_hc), lambda b: (0, 0)),
                  pl.BlockSpec((pdim, NUM_HEADS), lambda b: (0, 0))],
        out_specs=pl.BlockSpec((1, l, 3), lambda b: (b, 0, 0)),
        compiler_params=pltpu.CompilerParams(dimension_semantics=("parallel",)),
    )(csum, x, z, d, w_qk, w_pb)


# ----------------------------------------------------------------------------
# Kernel 2: fully fused attention (qkv proj + logits + masked softmax + both
# aggregations + out_transform + mask_zero + residual + LayerNorm), per batch.
# ----------------------------------------------------------------------------
def _fused_attn_kernel(scal_ref,                 # SMEM prefetch (2,): [sqrt(1/3)*a, sqrt(1/3)*b]
                       x_ref, z_ref, d_ref, mq_ref, mk_ref, ccoef_ref,
                       wqkv_ref, wpb_ref, wout_ref, bout_ref, lnw_ref, lnb_ref,
                       o_ref):
    hc = NUM_HEADS * QK_DIM
    bf16 = jnp.bfloat16
    f32 = jnp.float32

    xb = x_ref[0]                                                     # (L, D) f32
    zb = z_ref[0]                                                     # (L, L, P) f32

    # ---- fused q/k/v projection: one (L,16)x(16,384) MXU pass, 384-lane-dense output ----
    qkv = jnp.dot(xb.astype(bf16), wqkv_ref[...].astype(bf16),
                  preferred_element_type=f32)                          # (L, 3*H*C)
    # head split + head-major transpose done in-kernel (no HBM transposes of q/k/v)
    qh = jnp.transpose(qkv[:, 0 * hc:1 * hc].reshape(L_SEQ, NUM_HEADS, QK_DIM), (1, 0, 2))
    kh = jnp.transpose(qkv[:, 1 * hc:2 * hc].reshape(L_SEQ, NUM_HEADS, QK_DIM), (1, 0, 2))
    vh = jnp.transpose(qkv[:, 2 * hc:3 * hc].reshape(L_SEQ, NUM_HEADS, V_DIM), (1, 0, 2))

    # ---- logits, head-major (H, L, L), all batched contractions ----
    ln = jnp.einsum('hlc,hmc->hlm', qh.astype(bf16), kh.astype(bf16),
                    preferred_element_type=f32) * (1.0 / math.sqrt(QK_DIM))
    lp2 = jnp.dot(zb.reshape(L_SEQ * L_SEQ, PAIR_DIM).astype(bf16),    # pair bias from the
                  wpb_ref[...].astype(bf16),                           # already-resident z block
                  preferred_element_type=f32)                          # (L*L, H)
    lp = jnp.transpose(lp2.reshape(L_SEQ, L_SEQ, NUM_HEADS), (2, 0, 1))  # (H, L, L)
    d2 = d_ref[0] * d_ref[0]                                           # (L, L) f32 on VPU
    sa = scal_ref[0]
    sb = scal_ref[1]
    logits = sa * ln + sb * lp + ccoef_ref[...] * d2[None, :, :]        # (H, L, L)

    # ---- masked softmax over the key dim (torch dim=2) ----
    mq = mq_ref[0]                                                      # (L, 1) query mask
    mk = mk_ref[0]                                                      # (1, L) key mask
    pair_ok = (mq * mk)[None, :, :] > 0.5
    logits = jnp.where(pair_ok, logits, logits - INF)
    mx = jnp.max(logits, axis=-1, keepdims=True)
    e = jnp.exp(logits - mx)
    alpha = e * pl.reciprocal(jnp.sum(e, axis=-1, keepdims=True), approx=True)
    alpha = jnp.where(mq[None, :, :] > 0.5, alpha, 0.0)                 # zero masked query rows
    alpha_b = alpha.astype(bf16)

    # ---- aggregations as batched dot_generals (no per-head / per-row Python loops) ----
    fn = jnp.einsum('hlm,hmv->hlv', alpha_b, vh.astype(bf16),
                    preferred_element_type=f32)                         # (H, L, V)
    fn = jnp.transpose(fn, (1, 0, 2)).reshape(L_SEQ, NUM_HEADS * V_DIM)
    fp = jnp.einsum('lhm,lmp->lhp', jnp.transpose(alpha_b, (1, 0, 2)), zb.astype(bf16),
                    preferred_element_type=f32)                         # (L, H, P)
    fp = fp.reshape(L_SEQ, NUM_HEADS * PAIR_DIM)
    feat = jnp.concatenate([fp, fn], axis=-1)                           # (L, 192) lane-dense, VMEM only

    # ---- out_transform + mask_zero + residual + layer_norm_node ----
    y = jnp.dot(feat.astype(bf16), wout_ref[...].astype(bf16),
                preferred_element_type=f32) + bout_ref[...]
    y = xb + y * mq
    mu = jnp.mean(y, axis=-1, keepdims=True)
    var = jnp.mean((y - mu) ** 2, axis=-1, keepdims=True)
    y = (y - mu) * jax.lax.rsqrt(var + 1e-5)
    o_ref[0] = y * lnw_ref[...] + lnb_ref[...]


def pallas_fused_attention(scal, x, z, d, mq, mk, ccoef, w_qkv, w_pb, w_out, b_out, ln_w, ln_b):
    n, l, dd = x.shape
    pdim = z.shape[-1]
    fdim = w_out.shape[0]
    three_hc = w_qkv.shape[1]
    grid_spec = pltpu.PrefetchScalarGridSpec(
        num_scalar_prefetch=1,                    # (a, b) mixing scalars land in SMEM
        grid=(n,),
        in_specs=[pl.BlockSpec((1, l, dd), lambda b, s: (b, 0, 0)),
                  pl.BlockSpec((1, l, l, pdim), lambda b, s: (b, 0, 0, 0)),
                  pl.BlockSpec((1, l, l), lambda b, s: (b, 0, 0)),
                  pl.BlockSpec((1, l, 1), lambda b, s: (b, 0, 0)),
                  pl.BlockSpec((1, 1, l), lambda b, s: (b, 0, 0)),
                  pl.BlockSpec((NUM_HEADS, 1, 1), lambda b, s: (0, 0, 0)),
                  pl.BlockSpec((dd, three_hc), lambda b, s: (0, 0)),
                  pl.BlockSpec((pdim, NUM_HEADS), lambda b, s: (0, 0)),
                  pl.BlockSpec((fdim, dd), lambda b, s: (0, 0)),
                  pl.BlockSpec((1, dd), lambda b, s: (0, 0)),
                  pl.BlockSpec((1, dd), lambda b, s: (0, 0)),
                  pl.BlockSpec((1, dd), lambda b, s: (0, 0))],
        out_specs=pl.BlockSpec((1, l, dd), lambda b, s: (b, 0, 0)),
    )
    return pl.pallas_call(
        _fused_attn_kernel,
        out_shape=jax.ShapeDtypeStruct((n, l, dd), jnp.float32),
        grid_spec=grid_spec,
        compiler_params=pltpu.CompilerParams(dimension_semantics=("parallel",)),
    )(scal, x, z, d, mq, mk, ccoef, w_qkv, w_pb, w_out, b_out, ln_w, ln_b)


# ----------------------------------------------------------------------------
# weight_Attention: a 3-token attention producing scalars (a, b, c).  Shapes of 3
# are unsuitable for TPU tiling, so this tiny piece stays in plain JAX (glue).
# ----------------------------------------------------------------------------
def _weight_attention(p, node_sum, pair_sum, dist_sum):
    xw = jnp.stack([node_sum, pair_sum, dist_sum], axis=1)            # (N, 3, L); L == node_feat_dim
    n = xw.shape[0]
    q = (xw @ p['w_wq']).reshape(n, 3, NUM_HEADS, V_DIM)
    k = (xw @ p['w_wk']).reshape(n, 3, NUM_HEADS, V_DIM)
    v = (xw @ p['w_wv']).reshape(n, 3, NUM_HEADS, V_DIM)
    att = jnp.einsum('nihc,njhc->nhij', q, k) / math.sqrt(V_DIM)      # (N, H, 3, 3)
    att = jax.nn.softmax(att, axis=2)                                 # torch.softmax(..., dim=2)
    y = jnp.einsum('nhij,njhc->nihc', att, v).reshape(n, 3, NUM_HEADS * V_DIM)
    mu = jnp.mean(y, axis=-1, keepdims=True)
    var = jnp.mean((y - mu) ** 2, axis=-1, keepdims=True)
    y = (y - mu) / jnp.sqrt(var + 1e-5) * p['ln_w_w'] + p['ln_w_b']   # weight_LayerNorm
    h1 = jax.nn.relu(y @ p['abc_w1'] + p['abc_b1'])
    y3 = jax.nn.softplus(h1 @ p['abc_w2'] + p['abc_b2'])[..., 0]      # (N, 3)
    return jnp.mean(y3[:, 0]), jnp.mean(y3[:, 1]), jax.nn.sigmoid(jnp.mean(y3[:, 2]))


# ----------------------------------------------------------------------------
# Full forward (Pallas path)
# ----------------------------------------------------------------------------
def geometric_attention_pallas(p, R, t, p_CB, x, z, d, mask):
    del R, t, p_CB                                    # unused (Side_chain_geometry == False)
    n, l, dd = x.shape
    hc = NUM_HEADS * QK_DIM
    # fused projection weight (q|k|v) -> one lane-dense matmul inside the kernel
    w_qkv = jnp.concatenate([p['w_q'], p['w_k'], p['w_v']], axis=1)   # (D, 3*H*C)
    gamma = jax.nn.softplus(p['spatial_coef']).reshape(NUM_HEADS)
    coef = (-gamma * math.sqrt(2.0 / 9.0) / 2.0).astype(jnp.float32)  # per-head distance coeff
    csum = jnp.sum(coef).reshape(1).astype(jnp.float32)

    # pass 1: per-row logit sums (no (N,H,L,L) tensors ever hit HBM)
    sums = pallas_logit_sums(csum, x, z, d, w_qkv[:, :2 * hc], p['w_pb'])   # (N, L, 3)
    a, b, c = _weight_attention(p, sums[..., 0], sums[..., 1], sums[..., 2])

    s13 = math.sqrt(1.0 / 3.0)
    scal = jnp.stack([s13 * a, s13 * b]).astype(jnp.float32)                # scalar prefetch
    ccoef = (s13 * c * coef).reshape(NUM_HEADS, 1, 1).astype(jnp.float32)   # per-head dist scale

    mf = mask.astype(jnp.float32)
    mq = mf[:, :, None]                                                     # (N, L, 1)
    mk = mf[:, None, :]                                                     # (N, 1, L)

    # pass 2: everything else, fused in one pallas_call per batch element
    return pallas_fused_attention(scal, x, z, d, mq, mk, ccoef, w_qkv, p['w_pb'],
                                  p['w_out'], p['b_out'].reshape(1, dd),
                                  p['ln_node_w'].reshape(1, dd), p['ln_node_b'].reshape(1, dd))


# ----------------------------------------------------------------------------
# Pure-JAX reference (mirrors the PyTorch forward directly) for a sanity check
# ----------------------------------------------------------------------------
def geometric_attention_reference(p, R, t, p_CB, x, z, d, mask):
    del R, t, p_CB
    n, l, dd = x.shape
    q = (x @ p['w_q']).reshape(n, l, NUM_HEADS, QK_DIM)
    k = (x @ p['w_k']).reshape(n, l, NUM_HEADS, QK_DIM)
    v = (x @ p['w_v']).reshape(n, l, NUM_HEADS, V_DIM)
    logits_node = jnp.einsum('nlhc,nmhc->nlmh', q, k) / math.sqrt(QK_DIM)
    logits_pair = z @ p['w_pb']
    gamma = jax.nn.softplus(p['spatial_coef'])
    logits_dist = (d ** 2)[..., None] * (-gamma * math.sqrt(2.0 / 9.0) / 2.0)
    sums = lambda tns: tns.sum(axis=3).sum(axis=2)
    a, b, c = _weight_attention(p, sums(logits_node), sums(logits_pair), sums(logits_dist))
    logits = math.sqrt(1.0 / 3.0) * (a * logits_node + b * logits_pair + c * logits_dist)
    mask_row = jnp.broadcast_to(mask[:, :, None, None], logits.shape)
    mask_pair = mask_row & jnp.transpose(mask_row, (0, 2, 1, 3))
    logits = jnp.where(mask_pair, logits, logits - INF)
    alpha = jax.nn.softmax(logits, axis=2)
    alpha = jnp.where(mask_row, alpha, 0.0)
    feat_p2n = (alpha[..., None] * z[:, :, :, None, :]).sum(axis=2).reshape(n, l, -1)
    feat_node = (alpha[..., None] * v[:, None]).sum(axis=2).reshape(n, l, -1)
    feat_all = jnp.concatenate([feat_p2n, feat_node], axis=-1) @ p['w_out'] + p['b_out']
    feat_all = feat_all * mask[..., None].astype(feat_all.dtype)
    y = x + feat_all
    mu = jnp.mean(y, axis=-1, keepdims=True)
    var = jnp.mean((y - mu) ** 2, axis=-1, keepdims=True)
    return (y - mu) / jnp.sqrt(var + 1e-5) * p['ln_node_w'] + p['ln_node_b']


if __name__ == "__main__":
    key = jax.random.PRNGKey(0)
    keys = jax.random.split(key, 20)

    def rnd(k, shape, scale=0.1):
        return (scale * jax.random.normal(k, shape)).astype(jnp.float32)

    params = {
        'w_q': rnd(keys[0], (NODE_DIM, NUM_HEADS * QK_DIM)),
        'w_k': rnd(keys[1], (NODE_DIM, NUM_HEADS * QK_DIM)),
        'w_v': rnd(keys[2], (NODE_DIM, NUM_HEADS * V_DIM)),
        'w_pb': rnd(keys[3], (PAIR_DIM, NUM_HEADS)),
        'spatial_coef': jnp.full((1, 1, 1, NUM_HEADS), float(np.log(np.e - 1.0)), jnp.float32),
        'w_out': rnd(keys[4], (NUM_HEADS * PAIR_DIM + NUM_HEADS * V_DIM, NODE_DIM)),
        'b_out': rnd(keys[5], (NODE_DIM,)),
        'ln_node_w': jnp.ones((NODE_DIM,), jnp.float32),
        'ln_node_b': jnp.zeros((NODE_DIM,), jnp.float32),
        # weight_Attention parameters
        'w_wq': rnd(keys[6], (NODE_DIM, NUM_HEADS * QK_DIM), 0.02),
        'w_wk': rnd(keys[7], (NODE_DIM, NUM_HEADS * QK_DIM), 0.02),
        'w_wv': rnd(keys[8], (NODE_DIM, NUM_HEADS * QK_DIM), 0.02),
        'ln_w_w': jnp.ones((NUM_HEADS * QK_DIM,), jnp.float32),
        'ln_w_b': jnp.zeros((NUM_HEADS * QK_DIM,), jnp.float32),
        'abc_w1': rnd(keys[9], (NUM_HEADS * QK_DIM, NODE_DIM)),
        'abc_b1': rnd(keys[10], (NODE_DIM,), 0.05),
        'abc_w2': rnd(keys[11], (NODE_DIM, 1)),
        'abc_b2': rnd(keys[12], (1,), 0.05),
    }

    R = rnd(keys[13], (N_BATCH, L_SEQ, 3, 3), 1.0)
    t = rnd(keys[14], (N_BATCH, L_SEQ, 3), 1.0)
    p_CB = rnd(keys[15], (N_BATCH, L_SEQ, 3), 1.0)
    x = rnd(keys[16], (N_BATCH, L_SEQ, NODE_DIM), 1.0)
    z = rnd(keys[17], (N_BATCH, L_SEQ, L_SEQ, PAIR_DIM), 1.0)
    d = jax.random.uniform(keys[18], (N_BATCH, L_SEQ, L_SEQ), jnp.float32, 0.0, 3.0)
    mask = jnp.ones((N_BATCH, L_SEQ), dtype=bool).at[0, L_SEQ - 3:].set(False).at[1, 0].set(False)

    out = jax.jit(geometric_attention_pallas)(params, R, t, p_CB, x, z, d, mask)
    out = jax.block_until_ready(out)

    ref = geometric_attention_reference(params, R, t, p_CB, x, z, d, mask)
    assert out.shape == (N_BATCH, L_SEQ, NODE_DIM)
    assert bool(jnp.all(jnp.isfinite(out)))
    # Tolerance reflects bf16 MXU operands (f32 accumulation) vs the pure-f32 reference.
    np.testing.assert_allclose(np.asarray(out), np.asarray(ref), rtol=2e-2, atol=2e-2)
    print("KERNEL_OK")
</pallas_src>

<mosaic_0001>
module attributes {stable_mosaic.version = 11 : i64} {
  func.func @_logit_sums_kernel(%arg0: i32, %arg1: memref<1xf32, #tpu.memory_space<smem>>, %arg2: memref<1x16x16xf32, #tpu.memory_space<vmem>>, %arg3: memref<1x16x16x8xf32, #tpu.memory_space<vmem>>, %arg4: memref<1x16x16xf32, #tpu.memory_space<vmem>>, %arg5: memref<16x256xf32, #tpu.memory_space<vmem>>, %arg6: memref<8x8xf32, #tpu.memory_space<vmem>>, %arg7: memref<1x16x3xf32, #tpu.memory_space<vmem>>) attributes {dimension_semantics = [#tpu.dimension_semantics<parallel>], iteration_bounds = array<i64: 2>, scalar_prefetch = 0 : i64, scratch_operands = 0 : i64, tpu.core_type = #tpu.core_type<tc>, window_params = [{transform_indices = @transform_0, window_bounds = array<i64: 1>}, {transform_indices = @transform_1, window_bounds = array<i64: 1, 16, 16>}, {transform_indices = @transform_2, window_bounds = array<i64: 1, 16, 16, 8>}, {transform_indices = @transform_3, window_bounds = array<i64: 1, 16, 16>}, {pipeline_mode = #tpu.pipeline_mode<synchronous>, transform_indices = @transform_4, window_bounds = array<i64: 16, 256>}, {pipeline_mode = #tpu.pipeline_mode<synchronous>, transform_indices = @transform_5, window_bounds = array<i64: 8, 8>}, {transform_indices = @transform_6, window_bounds = array<i64: 1, 16, 3>}]} {
    %c0 = arith.constant 0 : index
    %c0_0 = arith.constant 0 : index
    %c0_1 = arith.constant 0 : index
    %0 = vector.load %arg2[%c0, %c0_0, %c0_1] : memref<1x16x16xf32, #tpu.memory_space<vmem>>, vector<1x16x16xf32>
    %1 = vector.shape_cast %0 : vector<1x16x16xf32> to vector<16x16xf32>
    %2 = arith.truncf %1 : vector<16x16xf32> to vector<16x16xbf16>
    %c0_2 = arith.constant 0 : index
    %c0_3 = arith.constant 0 : index
    %3 = vector.load %arg5[%c0_2, %c0_3] : memref<16x256xf32, #tpu.memory_space<vmem>>, vector<16x256xf32>
    %4 = arith.truncf %3 : vector<16x256xf32> to vector<16x256xbf16>
    %cst = arith.constant dense<0.000000e+00> : vector<16x256xf32>
    %5 = tpu.matmul %2, %4, %cst {dimension_numbers = #tpu.dot_dimension_numbers<[1], [0], [0], [1], [0, 0, 1, 1], [], []>} : vector<16x16xbf16>, vector<16x256xbf16>, vector<16x256xf32> -> vector<16x256xf32>
    %6 = vector.extract_strided_slice %5 {offsets = [0, 128], sizes = [16, 128], strides = [1, 1]} : vector<16x256xf32> to vector<16x128xf32>
    %cst_4 = arith.constant dense<0.000000e+00> : vector<128xf32>
    %7 = vector.multi_reduction <add>, %6, %cst_4 [0] : vector<16x128xf32> to vector<128xf32>
    %8 = vector.shape_cast %7 : vector<128xf32> to vector<1x128xf32>
    %9 = vector.extract_strided_slice %5 {offsets = [0, 0], sizes = [16, 128], strides = [1, 1]} : vector<16x256xf32> to vector<16x128xf32>
    %10 = vector.broadcast %8 : vector<1x128xf32> to vector<16x128xf32>
    %11 = arith.mulf %9, %10 : vector<16x128xf32>
    %cst_5 = arith.constant dense<0.000000e+00> : vector<16xf32>
    %12 = vector.multi_reduction <add>, %11, %cst_5 [1] : vector<16x128xf32> to vector<16xf32>
    %13 = vector.shape_cast %12 : vector<16xf32> to vector<16x1xf32>
    %cst_6 = arith.constant 2.500000e-01 : f32
    %14 = vector.broadcast %cst_6 : f32 to vector<16x1xf32>
    %15 = arith.mulf %13, %14 : vector<16x1xf32>
    %c0_7 = arith.constant 0 : index
    %c0_8 = arith.constant 0 : index
    %c0_9 = arith.constant 0 : index
    %c0_10 = arith.constant 0 : index
    %16 = vector.load %arg3[%c0_7, %c0_8, %c0_9, %c0_10] : memref<1x16x16x8xf32, #tpu.memory_space<vmem>>, vector<1x16x16x8xf32>
    %17 = vector.shape_cast %16 : vector<1x16x16x8xf32> to vector<16x16x8xf32>
    %cst_11 = arith.constant dense<0.000000e+00> : vector<16x8xf32>
    %18 = vector.multi_reduction <add>, %17, %cst_11 [1] : vector<16x16x8xf32> to vector<16x8xf32>
    %19 = arith.truncf %18 : vector<16x8xf32> to vector<16x8xbf16>
    %c0_12 = arith.constant 0 : index
    %c0_13 = arith.constant 0 : index
    %20 = vector.load %arg6[%c0_12, %c0_13] : memref<8x8xf32, #tpu.memory_space<vmem>>, vector<8x8xf32>
    %21 = arith.truncf %20 : vector<8x8xf32> to vector<8x8xbf16>
    %cst_14 = arith.constant dense<0.000000e+00> : vector<16x8xf32>
    %22 = tpu.matmul %19, %21, %cst_14 {dimension_numbers = #tpu.dot_dimension_numbers<[1], [0], [0], [1], [0, 0, 1, 1], [], []>} : vector<16x8xbf16>, vector<8x8xbf16>, vector<16x8xf32> -> vector<16x8xf32>
    %cst_15 = arith.constant dense<0.000000e+00> : vector<16xf32>
    %23 = vector.multi_reduction <add>, %22, %cst_15 [1] : vector<16x8xf32> to vector<16xf32>
    %24 = vector.shape_cast %23 : vector<16xf32> to vector<16x1xf32>
    %c0_16 = arith.constant 0 : index
    %c0_17 = arith.constant 0 : index
    %c0_18 = arith.constant 0 : index
    %25 = vector.load %arg4[%c0_16, %c0_17, %c0_18] : memref<1x16x16xf32, #tpu.memory_space<vmem>>, vector<1x16x16xf32>
    %26 = vector.shape_cast %25 : vector<1x16x16xf32> to vector<16x16xf32>
    %c0_19 = arith.constant 0 : index
    %c0_20 = arith.constant 0 : index
    %c0_21 = arith.constant 0 : index
    %27 = vector.load %arg4[%c0_19, %c0_20, %c0_21] : memref<1x16x16xf32, #tpu.memory_space<vmem>>, vector<1x16x16xf32>
    %28 = vector.shape_cast %27 : vector<1x16x16xf32> to vector<16x16xf32>
    %29 = arith.mulf %26, %28 : vector<16x16xf32>
    %cst_22 = arith.constant dense<0.000000e+00> : vector<16xf32>
    %30 = vector.multi_reduction <add>, %29, %cst_22 [1] : vector<16x16xf32> to vector<16xf32>
    %31 = vector.shape_cast %30 : vector<16xf32> to vector<16x1xf32>
    %c0_23 = arith.constant 0 : index
    %32 = memref.load %arg1[%c0_23] : memref<1xf32, #tpu.memory_space<smem>>
    %33 = vector.broadcast %32 : f32 to vector<16x1xf32>
    %34 = arith.mulf %31, %33 : vector<16x1xf32>
    %35 = tpu.concatenate %15, %24, %34 in 1 : vector<16x1xf32>, vector<16x1xf32>, vector<16x1xf32> -> vector<16x3xf32>
    %c0_24 = arith.constant 0 : index
    %c0_25 = arith.constant 0 : index
    %c0_26 = arith.constant 0 : index
    %36 = vector.load %arg7[%c0_24, %c0_25, %c0_26] : memref<1x16x3xf32, #tpu.memory_space<vmem>>, vector<1x16x3xf32>
    %37 = vector.shape_cast %36 : vector<1x16x3xf32> to vector<16x3xf32>
    %38 = vector.shape_cast %35 : vector<16x3xf32> to vector<1x16x3xf32>
    tpu.vector_store %arg7[%c0_24, %c0_25, %c0_26], %38 {strides = array<i32>} : memref<1x16x3xf32, #tpu.memory_space<vmem>>, vector<1x16x3xf32>,
    return
  }
  func.func @transform_0(%arg0: i32) -> i32 {
    %c0_i32 = arith.constant 0 : i32
    %c0_i32_0 = arith.constant 0 : i32
    return %c0_i32 : i32
  }
  func.func @transform_1(%arg0: i32) -> (i32, i32, i32) {
    %c0_i32 = arith.constant 0 : i32
    %c0_i32_0 = arith.constant 0 : i32
    %c0_i32_1 = arith.constant 0 : i32
    return %arg0, %c0_i32, %c0_i32_0 : i32, i32, i32
  }
  func.func @transform_2(%arg0: i32) -> (i32, i32, i32, i32) {
    %c0_i32 = arith.constant 0 : i32
    %c0_i32_0 = arith.constant 0 : i32
    %c0_i32_1 = arith.constant 0 : i32
    %c0_i32_2 = arith.constant 0 : i32
    return %arg0, %c0_i32, %c0_i32_0, %c0_i32_1 : i32, i32, i32, i32
  }
  func.func @transform_3(%arg0: i32) -> (i32, i32, i32) {
    %c0_i32 = arith.constant 0 : i32
    %c0_i32_0 = arith.constant 0 : i32
    %c0_i32_1 = arith.constant 0 : i32
    return %arg0, %c0_i32, %c0_i32_0 : i32, i32, i32
  }
  func.func @transform_4(%arg0: i32) -> (i32, i32) {
    %c0_i32 = arith.constant 0 : i32
    %c0_i32_0 = arith.constant 0 : i32
    %c0_i32_1 = arith.constant 0 : i32
    return %c0_i32, %c0_i32_0 : i32, i32
  }
  func.func @transform_5(%arg0: i32) -> (i32, i32) {
    %c0_i32 = arith.constant 0 : i32
    %c0_i32_0 = arith.constant 0 : i32
    %c0_i32_1 = arith.constant 0 : i32
    return %c0_i32, %c0_i32_0 : i32, i32
  }
  func.func @transform_6(%arg0: i32) -> (i32, i32, i32) {
    %c0_i32 = arith.constant 0 : i32
    %c0_i32_0 = arith.constant 0 : i32
    %c0_i32_1 = arith.constant 0 : i32
    return %arg0, %c0_i32, %c0_i32_0 : i32, i32, i32
  }
}

module attributes {stable_mosaic.version = 11 : i64} {
  func.func @_fused_attn_kernel(%arg0: i32, %arg1: memref<2xf32, #tpu.memory_space<smem>>, %arg2: memref<1x16x16xf32, #tpu.memory_space<vmem>>, %arg3: memref<1x16x16x8xf32, #tpu.memory_space<vmem>>, %arg4: memref<1x16x16xf32, #tpu.memory_space<vmem>>, %arg5: memref<1x16x1xf32, #tpu.memory_space<vmem>>, %arg6: memref<1x1x16xf32, #tpu.memory_space<vmem>>, %arg7: memref<8x1x1xf32, #tpu.memory_space<vmem>>, %arg8: memref<16x384xf32, #tpu.memory_space<vmem>>, %arg9: memref<8x8xf32, #tpu.memory_space<vmem>>, %arg10: memref<192x16xf32, #tpu.memory_space<vmem>>, %arg11: memref<1x16xf32, #tpu.memory_space<vmem>>, %arg12: memref<1x16xf32, #tpu.memory_space<vmem>>, %arg13: memref<1x16xf32, #tpu.memory_space<vmem>>, %arg14: memref<1x16x16xf32, #tpu.memory_space<vmem>>) attributes {dimension_semantics = [#tpu.dimension_semantics<parallel>], iteration_bounds = array<i64: 2>, scalar_prefetch = 1 : i64, scratch_operands = 0 : i64, tpu.core_type = #tpu.core_type<tc>, window_params = [{transform_indices = @transform_0, window_bounds = array<i64: 1, 16, 16>}, {transform_indices = @transform_1, window_bounds = array<i64: 1, 16, 16, 8>}, {transform_indices = @transform_2, window_bounds = array<i64: 1, 16, 16>}, {transform_indices = @transform_3, window_bounds = array<i64: 1, 16, 1>}, {transform_indices = @transform_4, window_bounds = array<i64: 1, 1, 16>}, {pipeline_mode = #tpu.pipeline_mode<synchronous>, transform_indices = @transform_5, window_bounds = array<i64: 8, 1, 1>}, {pipeline_mode = #tpu.pipeline_mode<synchronous>, transform_indices = @transform_6, window_bounds = array<i64: 16, 384>}, {pipeline_mode = #tpu.pipeline_mode<synchronous>, transform_indices = @transform_7, window_bounds = array<i64: 8, 8>}, {pipeline_mode = #tpu.pipeline_mode<synchronous>, transform_indices = @transform_8, window_bounds = array<i64: 192, 16>}, {pipeline_mode = #tpu.pipeline_mode<synchronous>, transform_indices = @transform_9, window_bounds = array<i64: 1, 16>}, {pipeline_mode = #tpu.pipeline_mode<synchronous>, transform_indices = @transform_10, window_bounds = array<i64: 1, 16>}, {pipeline_mode = #tpu.pipeline_mode<synchronous>, transform_indices = @transform_11, window_bounds = array<i64: 1, 16>}, {transform_indices = @transform_12, window_bounds = array<i64: 1, 16, 16>}]} {
    %c0 = arith.constant 0 : index
    %c0_0 = arith.constant 0 : index
    %c0_1 = arith.constant 0 : index
    %0 = vector.load %arg2[%c0, %c0_0, %c0_1] : memref<1x16x16xf32, #tpu.memory_space<vmem>>, vector<1x16x16xf32>
    %1 = vector.shape_cast %0 : vector<1x16x16xf32> to vector<16x16xf32>
    %c0_2 = arith.constant 0 : index
    %c0_3 = arith.constant 0 : index
    %c0_4 = arith.constant 0 : index
    %c0_5 = arith.constant 0 : index
    %2 = vector.load %arg3[%c0_2, %c0_3, %c0_4, %c0_5] : memref<1x16x16x8xf32, #tpu.memory_space<vmem>>, vector<1x16x16x8xf32>
    %3 = vector.shape_cast %2 : vector<1x16x16x8xf32> to vector<16x16x8xf32>
    %4 = arith.truncf %1 : vector<16x16xf32> to vector<16x16xbf16>
    %c0_6 = arith.constant 0 : index
    %c0_7 = arith.constant 0 : index
    %5 = vector.load %arg8[%c0_6, %c0_7] : memref<16x384xf32, #tpu.memory_space<vmem>>, vector<16x384xf32>
    %6 = arith.truncf %5 : vector<16x384xf32> to vector<16x384xbf16>
    %cst = arith.constant dense<0.000000e+00> : vector<16x384xf32>
    %7 = tpu.matmul %4, %6, %cst {dimension_numbers = #tpu.dot_dimension_numbers<[1], [0], [0], [1], [0, 0, 1, 1], [], []>} : vector<16x16xbf16>, vector<16x384xbf16>, vector<16x384xf32> -> vector<16x384xf32>
    %8 = vector.extract_strided_slice %7 {offsets = [0, 0], sizes = [16, 128], strides = [1, 1]} : vector<16x384xf32> to vector<16x128xf32>
    %9 = vector.shape_cast %8 : vector<16x128xf32> to vector<16x8x16xf32>
    %10 = tpu.transpose %9, [1, 0, 2] : vector<16x8x16xf32> -> vector<8x16x16xf32>
    %11 = vector.extract_strided_slice %7 {offsets = [0, 128], sizes = [16, 128], strides = [1, 1]} : vector<16x384xf32> to vector<16x128xf32>
    %12 = vector.shape_cast %11 : vector<16x128xf32> to vector<16x8x16xf32>
    %13 = tpu.transpose %12, [1, 0, 2] : vector<16x8x16xf32> -> vector<8x16x16xf32>
    %14 = vector.extract_strided_slice %7 {offsets = [0, 256], sizes = [16, 128], strides = [1, 1]} : vector<16x384xf32> to vector<16x128xf32>
    %15 = vector.shape_cast %14 : vector<16x128xf32> to vector<16x8x16xf32>
    %16 = tpu.transpose %15, [1, 0, 2] : vector<16x8x16xf32> -> vector<8x16x16xf32>
    %17 = arith.truncf %10 : vector<8x16x16xf32> to vector<8x16x16xbf16>
    %18 = arith.truncf %13 : vector<8x16x16xf32> to vector<8x16x16xbf16>
    "tpu.trace_start"() <{level = 10 : i32, message = "hlc,hmc->hlm"}> : () -> ()
    %cst_8 = arith.constant dense<0.000000e+00> : vector<8x16x16xf32>
    %19 = tpu.matmul %17, %18, %cst_8 {dimension_numbers = #tpu.dot_dimension_numbers<[2], [2], [1], [1], [0, 0, 0, 1, 1, 1], [0], [0]>} : vector<8x16x16xbf16>, vector<8x16x16xbf16>, vector<8x16x16xf32> -> vector<8x16x16xf32>
    "tpu.trace_stop"() : () -> ()
    %cst_9 = arith.constant 2.500000e-01 : f32
    %20 = vector.broadcast %cst_9 : f32 to vector<8x16x16xf32>
    %21 = arith.mulf %19, %20 : vector<8x16x16xf32>
    %22 = vector.shape_cast %3 : vector<16x16x8xf32> to vector<256x8xf32>
    %23 = arith.truncf %22 : vector<256x8xf32> to vector<256x8xbf16>
    %c0_10 = arith.constant 0 : index
    %c0_11 = arith.constant 0 : index
    %24 = vector.load %arg9[%c0_10, %c0_11] : memref<8x8xf32, #tpu.memory_space<vmem>>, vector<8x8xf32>
    %25 = arith.truncf %24 : vector<8x8xf32> to vector<8x8xbf16>
    %cst_12 = arith.constant dense<0.000000e+00> : vector<256x8xf32>
    %26 = tpu.matmul %23, %25, %cst_12 {dimension_numbers = #tpu.dot_dimension_numbers<[1], [0], [0], [1], [0, 0, 1, 1], [], []>} : vector<256x8xbf16>, vector<8x8xbf16>, vector<256x8xf32> -> vector<256x8xf32>
    %27 = vector.shape_cast %26 : vector<256x8xf32> to vector<16x16x8xf32>
    %28 = tpu.transpose %27, [2, 0, 1] : vector<16x16x8xf32> -> vector<8x16x16xf32>
    %c0_13 = arith.constant 0 : index
    %c0_14 = arith.constant 0 : index
    %c0_15 = arith.constant 0 : index
    %29 = vector.load %arg4[%c0_13, %c0_14, %c0_15] : memref<1x16x16xf32, #tpu.memory_space<vmem>>, vector<1x16x16xf32>
    %30 = vector.shape_cast %29 : vector<1x16x16xf32> to vector<16x16xf32>
    %c0_16 = arith.constant 0 : index
    %c0_17 = arith.constant 0 : index
    %c0_18 = arith.constant 0 : index
    %31 = vector.load %arg4[%c0_16, %c0_17, %c0_18] : memref<1x16x16xf32, #tpu.memory_space<vmem>>, vector<1x16x16xf32>
    %32 = vector.shape_cast %31 : vector<1x16x16xf32> to vector<16x16xf32>
    %33 = arith.mulf %30, %32 : vector<16x16xf32>
    %c0_19 = arith.constant 0 : index
    %34 = memref.load %arg1[%c0_19] : memref<2xf32, #tpu.memory_space<smem>>
    %c1 = arith.constant 1 : index
    %35 = memref.load %arg1[%c1] : memref<2xf32, #tpu.memory_space<smem>>
    %36 = vector.broadcast %34 : f32 to vector<8x16x16xf32>
    %37 = arith.mulf %36, %21 : vector<8x16x16xf32>
    %38 = vector.broadcast %35 : f32 to vector<8x16x16xf32>
    %39 = arith.mulf %38, %28 : vector<8x16x16xf32>
    %40 = arith.addf %37, %39 : vector<8x16x16xf32>
    %c0_20 = arith.constant 0 : index
    %c0_21 = arith.constant 0 : index
    %c0_22 = arith.constant 0 : index
    %41 = vector.load %arg7[%c0_20, %c0_21, %c0_22] : memref<8x1x1xf32, #tpu.memory_space<vmem>>, vector<8x1x1xf32>
    %42 = vector.shape_cast %33 : vector<16x16xf32> to vector<1x16x16xf32>
    %43 = vector.broadcast %41 : vector<8x1x1xf32> to vector<8x16x16xf32>
    %44 = vector.broadcast %42 : vector<1x16x16xf32> to vector<8x16x16xf32>
    %45 = arith.mulf %43, %44 : vector<8x16x16xf32>
    %46 = arith.addf %40, %45 : vector<8x16x16xf32>
    %c0_23 = arith.constant 0 : index
    %c0_24 = arith.constant 0 : index
    %c0_25 = arith.constant 0 : index
    %47 = vector.load %arg5[%c0_23, %c0_24, %c0_25] : memref<1x16x1xf32, #tpu.memory_space<vmem>>, vector<1x16x1xf32>
    %48 = vector.shape_cast %47 : vector<1x16x1xf32> to vector<16x1xf32>
    %c0_26 = arith.constant 0 : index
    %c0_27 = arith.constant 0 : index
    %c0_28 = arith.constant 0 : index
    %49 = vector.load %arg6[%c0_26, %c0_27, %c0_28] : memref<1x1x16xf32, #tpu.memory_space<vmem>>, vector<1x1x16xf32>
    %50 = vector.shape_cast %49 : vector<1x1x16xf32> to vector<1x16xf32>
    %51 = vector.broadcast %48 : vector<16x1xf32> to vector<16x16xf32>
    %52 = vector.broadcast %50 : vector<1x16xf32> to vector<16x16xf32>
    %53 = arith.mulf %51, %52 : vector<16x16xf32>
    %54 = vector.shape_cast %53 : vector<16x16xf32> to vector<1x16x16xf32>
    %cst_29 = arith.constant 5.000000e-01 : f32
    %55 = vector.broadcast %cst_29 : f32 to vector<1x16x16xf32>
    %56 = arith.cmpf ogt, %54, %55 : vector<1x16x16xf32>
    %cst_30 = arith.constant 1.000000e+05 : f32
    %57 = vector.broadcast %cst_30 : f32 to vector<8x16x16xf32>
    %58 = arith.subf %46, %57 : vector<8x16x16xf32>
    %59 = vector.shape_cast %56 : vector<1x16x16xi1> to vector<1x16x16xi1>
    %60 = vector.broadcast %59 : vector<1x16x16xi1> to vector<8x16x16xi1>
    %61 = arith.select %60, %46, %58 : vector<8x16x16xi1>, vector<8x16x16xf32>
    %cst_31 = arith.constant dense<0xFF800000> : vector<8x16xf32>
    %62 = vector.multi_reduction <maximumf>, %61, %cst_31 [2] : vector<8x16x16xf32> to vector<8x16xf32>
    %63 = vector.shape_cast %62 : vector<8x16xf32> to vector<8x16x1xf32>
    %64 = vector.broadcast %63 : vector<8x16x1xf32> to vector<8x16x16xf32>
    %65 = arith.subf %61, %64 : vector<8x16x16xf32>
    %66 = math.exp %65 : vector<8x16x16xf32>
    %cst_32 = arith.constant dense<0.000000e+00> : vector<8x16xf32>
    %67 = vector.multi_reduction <add>, %66, %cst_32 [2] : vector<8x16x16xf32> to vector<8x16xf32>
    %68 = vector.shape_cast %67 : vector<8x16xf32> to vector<8x16x1xf32>
    %69 = tpu.reciprocal %68 {approx = true} : vector<8x16x1xf32> -> vector<8x16x1xf32>
    %70 = vector.broadcast %69 : vector<8x16x1xf32> to vector<8x16x16xf32>
    %71 = arith.mulf %66, %70 : vector<8x16x16xf32>
    %72 = vector.shape_cast %48 : vector<16x1xf32> to vector<1x16x1xf32>
    %cst_33 = arith.constant 5.000000e-01 : f32
    %73 = vector.broadcast %cst_33 : f32 to vector<1x16x1xf32>
    %74 = arith.cmpf ogt, %72, %73 : vector<1x16x1xf32>
    %cst_34 = arith.constant 0.000000e+00 : f32
    %75 = vector.shape_cast %74 : vector<1x16x1xi1> to vector<1x16x1xi1>
    %76 = vector.broadcast %75 : vector<1x16x1xi1> to vector<8x16x16xi1>
    %77 = vector.broadcast %cst_34 : f32 to vector<8x16x16xf32>
    %78 = arith.select %76, %71, %77 : vector<8x16x16xi1>, vector<8x16x16xf32>
    %79 = arith.truncf %78 : vector<8x16x16xf32> to vector<8x16x16xbf16>
    %80 = arith.truncf %16 : vector<8x16x16xf32> to vector<8x16x16xbf16>
    "tpu.trace_start"() <{level = 10 : i32, message = "hlm,hmv->hlv"}> : () -> ()
    %cst_35 = arith.constant dense<0.000000e+00> : vector<8x16x16xf32>
    %81 = tpu.matmul %79, %80, %cst_35 {dimension_numbers = #tpu.dot_dimension_numbers<[2], [1], [1], [2], [0, 0, 0, 1, 1, 2], [0], [0]>} : vector<8x16x16xbf16>, vector<8x16x16xbf16>, vector<8x16x16xf32> -> vector<8x16x16xf32>
    "tpu.trace_stop"() : () -> ()
    %82 = tpu.transpose %81, [1, 0, 2] : vector<8x16x16xf32> -> vector<16x8x16xf32>
    %83 = vector.shape_cast %82 : vector<16x8x16xf32> to vector<16x128xf32>
    %84 = tpu.transpose %79, [1, 0, 2] : vector<8x16x16xbf16> -> vector<16x8x16xbf16>
    %85 = arith.truncf %3 : vector<16x16x8xf32> to vector<16x16x8xbf16>
    "tpu.trace_start"() <{level = 10 : i32, message = "lhm,lmp->lhp"}> : () -> ()
    %cst_36 = arith.constant dense<0.000000e+00> : vector<16x8x8xf32>
    %86 = tpu.matmul %84, %85, %cst_36 {dimension_numbers = #tpu.dot_dimension_numbers<[2], [1], [1], [2], [0, 0, 0, 1, 1, 2], [0], [0]>} : vector<16x8x16xbf16>, vector<16x16x8xbf16>, vector<16x8x8xf32> -> vector<16x8x8xf32>
    "tpu.trace_stop"() : () -> ()
    %87 = vector.shape_cast %86 : vector<16x8x8xf32> to vector<16x64xf32>
    %88 = tpu.concatenate %87, %83 in 1 : vector<16x64xf32>, vector<16x128xf32> -> vector<16x192xf32>
    %89 = arith.truncf %88 : vector<16x192xf32> to vector<16x192xbf16>
    %c0_37 = arith.constant 0 : index
    %c0_38 = arith.constant 0 : index
    %90 = vector.load %arg10[%c0_37, %c0_38] : memref<192x16xf32, #tpu.memory_space<vmem>>, vector<192x16xf32>
    %91 = arith.truncf %90 : vector<192x16xf32> to vector<192x16xbf16>
    %cst_39 = arith.constant dense<0.000000e+00> : vector<16x16xf32>
    %92 = tpu.matmul %89, %91, %cst_39 {dimension_numbers = #tpu.dot_dimension_numbers<[1], [0], [0], [1], [0, 0, 1, 1], [], []>} : vector<16x192xbf16>, vector<192x16xbf16>, vector<16x16xf32> -> vector<16x16xf32>
    %c0_40 = arith.constant 0 : index
    %c0_41 = arith.constant 0 : index
    %93 = vector.load %arg11[%c0_40, %c0_41] : memref<1x16xf32, #tpu.memory_space<vmem>>, vector<1x16xf32>
    %94 = vector.broadcast %93 : vector<1x16xf32> to vector<16x16xf32>
    %95 = arith.addf %92, %94 : vector<16x16xf32>
    %96 = vector.broadcast %48 : vector<16x1xf32> to vector<16x16xf32>
    %97 = arith.mulf %95, %96 : vector<16x16xf32>
    %98 = arith.addf %1, %97 : vector<16x16xf32>
    %cst_42 = arith.constant dense<0.000000e+00> : vector<16xf32>
    %99 = vector.multi_reduction <add>, %98, %cst_42 [1] : vector<16x16xf32> to vector<16xf32>
    %100 = vector.shape_cast %99 : vector<16xf32> to vector<16x1xf32>
    %cst_43 = arith.constant 1.600000e+01 : f32
    %101 = vector.broadcast %cst_43 : f32 to vector<16x1xf32>
    %102 = arith.divf %100, %101 : vector<16x1xf32>
    %103 = vector.broadcast %102 : vector<16x1xf32> to vector<16x16xf32>
    %104 = arith.subf %98, %103 : vector<16x16xf32>
    %105 = arith.mulf %104, %104 : vector<16x16xf32>
    %cst_44 = arith.constant dense<0.000000e+00> : vector<16xf32>
    %106 = vector.multi_reduction <add>, %105, %cst_44 [1] : vector<16x16xf32> to vector<16xf32>
    %107 = vector.shape_cast %106 : vector<16xf32> to vector<16x1xf32>
    %cst_45 = arith.constant 1.600000e+01 : f32
    %108 = vector.broadcast %cst_45 : f32 to vector<16x1xf32>
    %109 = arith.divf %107, %108 : vector<16x1xf32>
    %110 = vector.broadcast %102 : vector<16x1xf32> to vector<16x16xf32>
    %111 = arith.subf %98, %110 : vector<16x16xf32>
    %cst_46 = arith.constant 9.99999974E-6 : f32
    %112 = vector.broadcast %cst_46 : f32 to vector<16x1xf32>
    %113 = arith.addf %109, %112 : vector<16x1xf32>
    %114 = math.rsqrt %113 : vector<16x1xf32>
    %115 = vector.broadcast %114 : vector<16x1xf32> to vector<16x16xf32>
    %116 = arith.mulf %111, %115 : vector<16x16xf32>
    %c0_47 = arith.constant 0 : index
    %c0_48 = arith.constant 0 : index
    %117 = vector.load %arg12[%c0_47, %c0_48] : memref<1x16xf32, #tpu.memory_space<vmem>>, vector<1x16xf32>
    %118 = vector.broadcast %117 : vector<1x16xf32> to vector<16x16xf32>
    %119 = arith.mulf %116, %118 : vector<16x16xf32>
    %c0_49 = arith.constant 0 : index
    %c0_50 = arith.constant 0 : index
    %120 = vector.load %arg13[%c0_49, %c0_50] : memref<1x16xf32, #tpu.memory_space<vmem>>, vector<1x16xf32>
    %121 = vector.broadcast %120 : vector<1x16xf32> to vector<16x16xf32>
    %122 = arith.addf %119, %121 : vector<16x16xf32>
    %c0_51 = arith.constant 0 : index
    %c0_52 = arith.constant 0 : index
    %c0_53 = arith.constant 0 : index
    %123 = vector.load %arg14[%c0_51, %c0_52, %c0_53] : memref<1x16x16xf32, #tpu.memory_space<vmem>>, vector<1x16x16xf32>
    %124 = vector.shape_cast %123 : vector<1x16x16xf32> to vector<16x16xf32>
    %125 = vector.shape_cast %122 : vector<16x16xf32> to vector<1x16x16xf32>
    tpu.vector_store %arg14[%c0_51, %c0_52, %c0_53], %125 {strides = array<i32>} : memref<1x16x16xf32, #tpu.memory_space<vmem>>, vector<1x16x16xf32>,
    return
  }
  func.func @transform_0(%arg0: i32, %arg1: memref<2xf32, #tpu.memory_space<smem>>) -> (i32, i32, i32) {
    %c0_i32 = arith.constant 0 : i32
    %c0_i32_0 = arith.constant 0 : i32
    %c0_i32_1 = arith.constant 0 : i32
    return %arg0, %c0_i32, %c0_i32_0 : i32, i32, i32
  }
  func.func @transform_1(%arg0: i32, %arg1: memref<2xf32, #tpu.memory_space<smem>>) -> (i32, i32, i32, i32) {
    %c0_i32 = arith.constant 0 : i32
    %c0_i32_0 = arith.constant 0 : i32
    %c0_i32_1 = arith.constant 0 : i32
    %c0_i32_2 = arith.constant 0 : i32
    return %arg0, %c0_i32, %c0_i32_0, %c0_i32_1 : i32, i32, i32, i32
  }
  func.func @transform_2(%arg0: i32, %arg1: memref<2xf32, #tpu.memory_space<smem>>) -> (i32, i32, i32) {
    %c0_i32 = arith.constant 0 : i32
    %c0_i32_0 = arith.constant 0 : i32
    %c0_i32_1 = arith.constant 0 : i32
    return %arg0, %c0_i32, %c0_i32_0 : i32, i32, i32
  }
  func.func @transform_3(%arg0: i32, %arg1: memref<2xf32, #tpu.memory_space<smem>>) -> (i32, i32, i32) {
    %c0_i32 = arith.constant 0 : i32
    %c0_i32_0 = arith.constant 0 : i32
    %c0_i32_1 = arith.constant 0 : i32
    return %arg0, %c0_i32, %c0_i32_0 : i32, i32, i32
  }
  func.func @transform_4(%arg0: i32, %arg1: memref<2xf32, #tpu.memory_space<smem>>) -> (i32, i32, i32) {
    %c0_i32 = arith.constant 0 : i32
    %c0_i32_0 = arith.constant 0 : i32
    %c0_i32_1 = arith.constant 0 : i32
    return %arg0, %c0_i32, %c0_i32_0 : i32, i32, i32
  }
  func.func @transform_5(%arg0: i32, %arg1: memref<2xf32, #tpu.memory_space<smem>>) -> (i32, i32, i32) {
    %c0_i32 = arith.constant 0 : i32
    %c0_i32_0 = arith.constant 0 : i32
    %c0_i32_1 = arith.constant 0 : i32
    %c0_i32_2 = arith.constant 0 : i32
    return %c0_i32, %c0_i32_0, %c0_i32_1 : i32, i32, i32
  }
  func.func @transform_6(%arg0: i32, %arg1: memref<2xf32, #tpu.memory_space<smem>>) -> (i32, i32) {
    %c0_i32 = arith.constant 0 : i32
    %c0_i32_0 = arith.constant 0 : i32
    %c0_i32_1 = arith.constant 0 : i32
    return %c0_i32, %c0_i32_0 : i32, i32
  }
  func.func @transform_7(%arg0: i32, %arg1: memref<2xf32, #tpu.memory_space<smem>>) -> (i32, i32) {
    %c0_i32 = arith.constant 0 : i32
    %c0_i32_0 = arith.constant 0 : i32
    %c0_i32_1 = arith.constant 0 : i32
    return %c0_i32, %c0_i32_0 : i32, i32
  }
  func.func @transform_8(%arg0: i32, %arg1: memref<2xf32, #tpu.memory_space<smem>>) -> (i32, i32) {
    %c0_i32 = arith.constant 0 : i32
    %c0_i32_0 = arith.constant 0 : i32
    %c0_i32_1 = arith.constant 0 : i32
    return %c0_i32, %c0_i32_0 : i32, i32
  }
  func.func @transform_9(%arg0: i32, %arg1: memref<2xf32, #tpu.memory_space<smem>>) -> (i32, i32) {
    %c0_i32 = arith.constant 0 : i32
    %c0_i32_0 = arith.constant 0 : i32
    %c0_i32_1 = arith.constant 0 : i32
    return %c0_i32, %c0_i32_0 : i32, i32
  }
  func.func @transform_10(%arg0: i32, %arg1: memref<2xf32, #tpu.memory_space<smem>>) -> (i32, i32) {
    %c0_i32 = arith.constant 0 : i32
    %c0_i32_0 = arith.constant 0 : i32
    %c0_i32_1 = arith.constant 0 : i32
    return %c0_i32, %c0_i32_0 : i32, i32
  }
  func.func @transform_11(%arg0: i32, %arg1: memref<2xf32, #tpu.memory_space<smem>>) -> (i32, i32) {
    %c0_i32 = arith.constant 0 : i32
    %c0_i32_0 = arith.constant 0 : i32
    %c0_i32_1 = arith.constant 0 : i32
    return %c0_i32, %c0_i32_0 : i32, i32
  }
  func.func @transform_12(%arg0: i32, %arg1: memref<2xf32, #tpu.memory_space<smem>>) -> (i32, i32, i32) {
    %c0_i32 = arith.constant 0 : i32
    %c0_i32_0 = arith.constant 0 : i32
    %c0_i32_1 = arith.constant 0 : i32
    return %arg0, %c0_i32, %c0_i32_0 : i32, i32, i32
  }
}

</mosaic_0001>

<bundles_post_ra>
// kernel: geometric_attention_pallas.2
= control target key start
LH: loop header
LB: loop body
LE: loop exit
PB: predicated region body
PF: predicated region fallthrough
CT: control target
= control target key end

     0   :  { %s859_s23 = smov 0   ;;  %s1016_s0 = inlined_call_operand.<no memory space> [shape: f32[1], index: 0, kind: input, shape index: {}]   ;;  %s1017_s1 = inlined_call_operand.vmem [shape: f32[2,16,16], index: 1, kind: input, shape index: {}]   ;;  %s1018_s2 = inlined_call_operand.vmem [shape: f32[2,16,16,8], index: 2, kind: input, shape index: {}]   ;;  %s1019_s3 = inlined_call_operand.vmem [shape: f32[2,16,16], index: 3, kind: input, shape index: {}]   ;;  %s1020_s4 = inlined_call_operand.vmem [shape: f32[16,256], index: 4, kind: input, shape index: {}]   ;;  %s1021_s5 = inlined_call_operand.vmem [shape: f32[8,8], index: 5, kind: input, shape index: {}]   ;;  %s1022_s6 = inlined_call_operand.vmem [shape: f32[2,16,3], index: 6, kind: output, shape index: {}]  }
   0x1   :  { %11 = sst [smem:[#allocation2]] %s1016_s0 }
   0x2 LB: > { %s770_s24 = sadd.s32 4294967295, %s816_s23   ;;  %p774_p0 = scmp.ge.s32.totalorder %s816_s23, 1  ;;  %s816_s23 = sphi %s859_s23, %s17_s23  }
   0x3   : > { %p233_p1 = scmp.lt.s32.totalorder %s816_s23, 3 }
   0x5   : > { %p234_p2 = pnand %p774_p0, %p233_p1 }
   0x6   : > { %v298_v0 = vld [vmem:[%s1020_s4 + $0x8] sm:$0xff] (!%p234_p2)  ;;  %v300_v1 = vld [vmem:[%s1020_s4 + $0x18] sm:$0xff] (!%p234_p2)  ;;  %v297_v2 = vld [vmem:[%s1020_s4] sm:$0xff] (!%p234_p2)  ;;  %p273_p3 = scmp.lt.s32.totalorder (!%p234_p2), %s770_s24, 1  ;;  %v818_v5 = vmov (!%p234_p2), 0   ;;  %vm617_vm0 = vcmask (!%p234_p2), 1043456  }
   0x7   : > { %237 = sbr.rel (%p234_p2) target bundleno = 431 (0x1af), region = 44  ;;  %v302_v3 = vpack.c.bf16 (!%p234_p2), %v300_v1, %v298_v0  ;;  %v299_v4 = vld [vmem:[%s1020_s4 + $0x10] sm:$0xff] (!%p234_p2)  ;;  %339 = vmatprep.mubr.bf16.mxu0 (!%p234_p2), %v818_v5  ;;  %v558_v6 = vld [vmem:[%s1021_s5] sm:$0xff] (!%p234_p2)  ;;  %v819_v8 = vmov (!%p234_p2), 0.0   ;;  %vm820_vm1 = vmmov (!%p234_p2), 0   ;;  %vm397_vm2 = vcmask (!%p234_p2), 64512  }
   0x8   : > { %v301_v7 = vpack.c.bf16 (!%p234_p2), %v299_v4, %v297_v2  ;;  %793 = vmatprep.subr.bf16.mxu1 (!%p234_p2), %v819_v8  ;;  %v559_v9 = vpack.c.bf16 (!%p234_p2), %v558_v6, %v558_v6  ;;  %795 = vmatprep.mubr.msk.bf16.mxu1 (!%p234_p2), %vm820_vm1, %v819_v8  ;;  %vm303_vm3 = vcmask (!%p234_p2), 130048   ;;  %vm592_vm4 = vcmask (!%p234_p2), 1041409   ;;  %s678_s21 = sld [smem:[#allocation2]] (!%p234_p2) }
   0x9   : > { %307 = vmatprep.subr.bf16.mxu0 (!%p234_p2), %v302_v3  ;;  %vm594_vm5 = vcmask (!%p234_p2), 1042434   ;;  %vm596_vm6 = vcmask (!%p234_p2), 1043459   ;;  %vm598_vm7 = vcmask (!%p234_p2), 1044484   ;;  %vm600_vm8 = vcmask (!%p234_p2), 1045509  }
   0xa   : > { %308 = vmatpush1.bf16.msra.mxu0 (!%p234_p2), %v301_v7  ;;  %v619_v10 = vsel (!%p234_p2), %vm617_vm0, %v559_v9, 0  ;;  %vm602_vm9 = vcmask (!%p234_p2), 1046534   ;;  %vm604_vm10 = vcmask (!%p234_p2), 1047559   ;;  %vm682_vm11 = vcmask (!%p234_p2), 7168  }
   0xb   : > { %794 = vmatpush3.bf16.msra.mxu1 (!%p234_p2), %v619_v10  ;;  %vm685_vm12 = vcmask (!%p234_p2), 15360   ;;  %vm688_vm13 = vcmask (!%p234_p2), 23552  }
   0xe   : > { %s1024_s24 = smov (!%p273_p3, %s770_s24), 1 }
   0xf   : > { %s882_s10 = sshll.u32 %s1024_s24, 4  ;;  %s788_s11 = sshll.u32 %s1024_s24, 8 }
  0x10   : > { %s277_s14 = scalar_lea.vmem %s1017_s1, %s882_s10  ;;  %s891_s17 = scalar_lea.vmem %s1018_s2, %s788_s11 }
  0x11   : > { %v294_v11 = vld [vmem:[%s277_s14] sm:$0xff]  ;;  %v295_v12 = vld [vmem:[%s277_s14 + $0x8] sm:$0xff]  ;;  %v367_v16 = vld [vmem:[%s891_s17 + $0x10] sm:$0xff]  ;;  %s287_s20 = scalar_lea.vmem %s1019_s3, %s882_s10  ;;  %s292_s25 = scalar_lea.vmem %s1022_s6, %s882_s10 }
  0x12   : > { %v365_v13 = vld [vmem:[%s891_s17] sm:$0xff]  ;;  %v296_v14 = vpack.c.bf16 %v295_v12, %v294_v11  ;;  %v366_v15 = vld [vmem:[%s891_s17 + $0x8] sm:$0xff]  ;;  %v368_v17 = vld [vmem:[%s891_s17 + $0x18] sm:$0xff]  ;;  %v407_v23 = vsel %vm397_vm2, %v367_v16, 0.0 }
  0x13   : > { %v398_v18 = vsel %vm397_vm2, %v365_v13, 0.0  ;;  %v369_v19 = vld [vmem:[%s891_s17 + $0x20] sm:$0xff]  ;;  %v370_v20 = vld [vmem:[%s891_s17 + $0x28] sm:$0xff]  ;;  %v371_v21 = vld [vmem:[%s891_s17 + $0x30] sm:$0xff]  ;;  %v399_v22 = vsel %vm397_vm2, %v366_v15, 0.0  ;;  %v408_v24 = vsel %vm397_vm2, %v368_v17, 0.0 }
  0x14   : > { %783 = vmatmul.mubr.msk.bf16.vlgmr.msra.gmra.mrb[0].mxu0 %vm303_vm3, %v296_v14  ;;  %v372_v25 = vld [vmem:[%s891_s17 + $0x38] sm:$0xff]  ;;  %v373_v26 = vld [vmem:[%s891_s17 + $0x40] sm:$0xff]  ;;  %v374_v27 = vld [vmem:[%s891_s17 + $0x48] sm:$0xff]  ;;  %v400_v28 = vadd.f32 %v399_v22, %v398_v18  ;;  %v409_v29 = vadd.f32 %v408_v24, %v407_v23  ;;  %v416_v30 = vsel %vm397_vm2, %v369_v19, 0.0  ;;  %v417_v31 = vsel %vm397_vm2, %v370_v20, 0.0 }
  0x15   : > { %v375_v32 = vld [vmem:[%s891_s17 + $0x50] sm:$0xff]  ;;  %v376_v33 = vld [vmem:[%s891_s17 + $0x58] sm:$0xff]  ;;  %v418_v34 = vadd.f32 %v417_v31, %v416_v30  ;;  %v425_v35 = vsel %vm397_vm2, %v371_v21, 0.0  ;;  %v426_v36 = vsel %vm397_vm2, %v372_v25, 0.0  ;;  %v434_v37 = vsel %vm397_vm2, %v373_v26, 0.0  ;;  %v377_v38 = vld [vmem:[%s891_s17 + $0x60] sm:$0xff] }
  0x16   : > { %v378_v39 = vld [vmem:[%s891_s17 + $0x68] sm:$0xff]  ;;  %v401_v40 = vrot.slane %v400_v28, 4  ;;  %v410_v41 = vrot.slane %v409_v29, 4  ;;  %v427_v42 = vadd.f32 %v426_v36, %v425_v35  ;;  %v435_v43 = vsel %vm397_vm2, %v374_v27, 0.0  ;;  %v379_v48 = vld [vmem:[%s891_s17 + $0x70] sm:$0xff]  ;;  %v380_v57 = vld [vmem:[%s891_s17 + $0x78] sm:$0xff] }
  0x17   : > { %v419_v44 = vrot.slane %v418_v34, 4  ;;  %v436_v45 = vadd.f32 %v435_v43, %v434_v37  ;;  %v443_v46 = vsel %vm397_vm2, %v375_v32, 0.0  ;;  %v444_v47 = vsel %vm397_vm2, %v376_v33, 0.0  ;;  %v381_v14 = vld [vmem:[%s891_s17 + $0x80] sm:$0xff]  ;;  %v382_v15 = vld [vmem:[%s891_s17 + $0x88] sm:$0xff]  ;;  %v383_v22 = vld [vmem:[%s891_s17 + $0x90] sm:$0xff] }
  0x18   : > { %v402_v49 = vadd.f32 %v401_v40, %v400_v28  ;;  %v411_v50 = vadd.f32 %v410_v41, %v409_v29  ;;  %v428_v51 = vrot.slane %v427_v42, 4  ;;  %v445_v52 = vadd.f32 %v444_v47, %v443_v46  ;;  %v384_v23 = vld [vmem:[%s891_s17 + $0x98] sm:$0xff]  ;;  %v385_v28 = vld [vmem:[%s891_s17 + $0xa0] sm:$0xff]  ;;  %v386_v29 = vld [vmem:[%s891_s17 + $0xa8] sm:$0xff] }
  0x19   : > { %v420_v53 = vadd.f32 %v419_v44, %v418_v34  ;;  %v437_v54 = vrot.slane %v436_v45, 4  ;;  %v452_v55 = vsel %vm397_vm2, %v377_v38, 0.0  ;;  %v453_v56 = vsel %vm397_vm2, %v378_v39, 0.0  ;;  %v387_v34 = vld [vmem:[%s891_s17 + $0xb0] sm:$0xff]  ;;  %v388_v35 = vld [vmem:[%s891_s17 + $0xb8] sm:$0xff]  ;;  %v389_v36 = vld [vmem:[%s891_s17 + $0xc0] sm:$0xff] }
  0x1a   : > { %v403_v58 = vrot.slane %v402_v49, 2  ;;  %v412_v59 = vrot.slane %v411_v50, 2  ;;  %v429_v60 = vadd.f32 %v428_v51, %v427_v42  ;;  %v446_v61 = vrot.slane %v445_v52, 4 }
  0x1b   : > { %v421_v62 = vrot.slane %v420_v53, 2  ;;  %v438_v63 = vadd.f32 %v437_v54, %v436_v45  ;;  %v454_v0 = vadd.f32 %v453_v56, %v452_v55  ;;  %v461_v1 = vsel %vm397_vm2, %v379_v48, 0.0  ;;  %v390_v45 = vld [vmem:[%s891_s17 + $0xc8] sm:$0xff]  ;;  %v392_v55 = vld [vmem:[%s891_s17 + $0xd8] sm:$0xff]  ;;  %v393_v56 = vld [vmem:[%s891_s17 + $0xe0] sm:$0xff] }
  0x1c   : > { %v404_v2 = vadd.f32 %v403_v58, %v402_v49  ;;  %v413_v3 = vadd.f32 %v412_v59, %v411_v50  ;;  %v430_v4 = vrot.slane %v429_v60, 2  ;;  %v447_v5 = vadd.f32 %v446_v61, %v445_v52  ;;  %v391_v50 = vld [vmem:[%s891_s17 + $0xd0] sm:$0xff] }
  0x1d   : > { %v422_v6 = vadd.f32 %v421_v62, %v420_v53  ;;  %v439_v7 = vrot.slane %v438_v63, 2  ;;  %v455_v8 = vrot.slane %v454_v0, 4  ;;  %v462_v9 = vsel %vm397_vm2, %v380_v57, 0.0 }
  0x1e   : > { %v405_v10 = vrot.slane %v404_v2, 1  ;;  %v414_v11 = vrot.slane %v413_v3, 1  ;;  %v431_v12 = vadd.f32 %v430_v4, %v429_v60  ;;  %v448_v13 = vrot.slane %v447_v5, 2 }
  0x1f   : > { %v423_v16 = vrot.slane %v422_v6, 1  ;;  %v440_v17 = vadd.f32 %v439_v7, %v438_v63  ;;  %v456_v18 = vadd.f32 %v455_v8, %v454_v0  ;;  %v463_v19 = vadd.f32 %v462_v9, %v461_v1  ;;  %v394_v1 = vld [vmem:[%s891_s17 + $0xe8] sm:$0xff] }
  0x20   : > { %v432_v20 = vrot.slane %v431_v12, 1  ;;  %v449_v21 = vadd.f32 %v448_v13, %v447_v5  ;;  %v930_v24 = vadd.f32 %v405_v10, %v404_v2  ;;  %v934_v30 = vadd.f32 %v414_v11, %v413_v3  ;;  %v395_v10 = vld [vmem:[%s891_s17 + $0xf0] sm:$0xff] }
  0x21   : > { %v441_v25 = vrot.slane %v440_v17, 1  ;;  %v457_v26 = vrot.slane %v456_v18, 2  ;;  %v464_v27 = vrot.slane %v463_v19, 4  ;;  %v936_v31 = vadd.f32 %v423_v16, %v422_v6 }
  0x22   : > { %v470_v32 = vsel %vm397_vm2, %v381_v14, 0.0  ;;  %v471_v33 = vsel %vm397_vm2, %v382_v15, 0.0  ;;  %v943_v37 = vadd.f32 %v432_v20, %v431_v12  ;;  %v450_v38 = vrot.slane %v449_v21, 1 }
  0x23   : > { %v465_v39 = vadd.f32 %v464_v27, %v463_v19  ;;  %v472_v40 = vadd.f32 %v471_v33, %v470_v32  ;;  %v945_v41 = vadd.f32 %v441_v25, %v440_v17  ;;  %v458_v42 = vadd.f32 %v457_v26, %v456_v18  ;;  %v396_v19 = vld [vmem:[%s891_s17 + $0xf8] sm:$0xff] }
  0x24   : > { %v479_v43 = vsel %vm397_vm2, %v383_v22, 0.0  ;;  %v480_v44 = vsel %vm397_vm2, %v384_v23, 0.0  ;;  %v488_v49 = vsel %vm397_vm2, %v385_v28, 0.0  ;;  %v489_v51 = vsel %vm397_vm2, %v386_v29, 0.0 }
  0x25   : > { %v466_v46 = vrot.slane %v465_v39, 2  ;;  %v473_v47 = vrot.slane %v472_v40, 4  ;;  %v481_v48 = vadd.f32 %v480_v44, %v479_v43  ;;  %v497_v52 = vsel %vm397_vm2, %v387_v34, 0.0 }
  0x26   : > { %v498_v53 = vsel %vm397_vm2, %v388_v35, 0.0  ;;  %v506_v54 = vsel %vm397_vm2, %v389_v36, 0.0  ;;  %v958_v57 = vadd.f32 %v450_v38, %v449_v21  ;;  %v459_v61 = vrot.slane %v458_v42, 1 }
  0x27   : > { %v467_v58 = vadd.f32 %v466_v46, %v465_v39  ;;  %v474_v59 = vadd.f32 %v473_v47, %v472_v40  ;;  %v482_v60 = vrot.slane %v481_v48, 4  ;;  %v490_v62 = vadd.f32 %v489_v51, %v488_v49 }
  0x28   : > { %v499_v63 = vadd.f32 %v498_v53, %v497_v52  ;;  %v507_v0 = vsel %vm397_vm2, %v390_v45, 0.0  ;;  %v515_v5 = vsel %vm397_vm2, %v391_v50, 0.0  ;;  %v516_v8 = vsel %vm397_vm2, %v392_v55, 0.0 }
  0x29   : > { %v475_v2 = vrot.slane %v474_v59, 2  ;;  %v483_v3 = vadd.f32 %v482_v60, %v481_v48  ;;  %v508_v4 = vadd.f32 %v507_v0, %v506_v54  ;;  %v491_v6 = vrot.slane %v490_v62, 4 }
  0x2a   : > { %v500_v7 = vrot.slane %v499_v63, 4  ;;  %v524_v9 = vsel %vm397_vm2, %v393_v56, 0.0  ;;  %v468_v11 = vrot.slane %v467_v58, 1  ;;  %v517_v17 = vadd.f32 %v516_v8, %v515_v5 }
  0x2b   : > { %v476_v12 = vadd.f32 %v475_v2, %v474_v59  ;;  %v484_v13 = vrot.slane %v483_v3, 2  ;;  %v509_v14 = vrot.slane %v508_v4, 4  ;;  %v492_v15 = vadd.f32 %v491_v6, %v490_v62 }
  0x2c   : > { %v501_v16 = vadd.f32 %v500_v7, %v499_v63  ;;  %v525_v18 = vsel %vm397_vm2, %v394_v1, 0.0  ;;  %v518_v27 = vrot.slane %v517_v17, 4  ;;  %v533_v28 = vsel %vm397_vm2, %v395_v10, 0.0 }
  0x2d   : > { %v477_v20 = vrot.slane %v476_v12, 1  ;;  %v485_v21 = vadd.f32 %v484_v13, %v483_v3  ;;  %v510_v22 = vadd.f32 %v509_v14, %v508_v4  ;;  %v526_v23 = vadd.f32 %v525_v18, %v524_v9 }
  0x2e   : > { %v493_v25 = vrot.slane %v492_v15, 2  ;;  %v502_v26 = vrot.slane %v501_v16, 2  ;;  %v969_v29 = vadd.f32 %v459_v61, %v458_v42  ;;  %v519_v38 = vadd.f32 %v518_v27, %v517_v17 }
  0x2f   : > { %v486_v32 = vrot.slane %v485_v21, 1  ;;  %v511_v33 = vrot.slane %v510_v22, 2  ;;  %v527_v34 = vrot.slane %v526_v23, 4  ;;  %v534_v39 = vsel %vm397_vm2, %v396_v19, 0.0 }
  0x30   : > { %v494_v35 = vadd.f32 %v493_v25, %v492_v15  ;;  %v503_v36 = vadd.f32 %v502_v26, %v501_v16  ;;  %v972_v40 = vadd.f32 %v468_v11, %v467_v58  ;;  %v535_v45 = vadd.f32 %v534_v39, %v533_v28 }
  0x31   : > { %v512_v43 = vadd.f32 %v511_v33, %v510_v22  ;;  %v528_v44 = vadd.f32 %v527_v34, %v526_v23  ;;  %v478_v46 = vadd.f32 %v477_v20, %v476_v12  ;;  %v520_v49 = vrot.slane %v519_v38, 2 }
  0x32   : > { %v495_v47 = vrot.slane %v494_v35, 1  ;;  %v504_v48 = vrot.slane %v503_v36, 1  ;;  %v487_v50 = vadd.f32 %v486_v32, %v485_v21  ;;  %v536_v52 = vrot.slane %v535_v45, 4 }
  0x33   : > { %v513_v42 = vrot.slane %v512_v43, 1  ;;  %v529_v51 = vrot.slane %v528_v44, 2  ;;  %v521_v54 = vadd.f32 %v520_v49, %v519_v38  ;;  %v542_v55 = vpack.c.bf16 %v930_v24, %v930_v24 }
  0x34   : > { %v496_v53 = vadd.f32 %v495_v47, %v494_v35  ;;  %v543_v56 = vpack.c.bf16 %v934_v30, %v934_v30  ;;  %v505_v58 = vadd.f32 %v504_v48, %v503_v36  ;;  %v537_v61 = vadd.f32 %v536_v52, %v535_v45 }
  0x35   : > { %v514_v59 = vadd.f32 %v513_v42, %v512_v43  ;;  %v530_v60 = vadd.f32 %v529_v51, %v528_v44  ;;  %v522_v62 = vrot.slane %v521_v54, 1  ;;  %v544_v63 = vpack.c.bf16 %v936_v31, %v936_v31  ;;  %v668_v42 = vld [vmem:[%s287_s20] sm:$0xff] }
  0x36   : > { %v545_v0 = vpack.c.bf16 %v943_v37, %v943_v37  ;;  %v546_v1 = vpack.c.bf16 %v945_v41, %v945_v41  ;;  %v538_v2 = vrot.slane %v537_v61, 2  ;;  %v547_v30 = vpack.c.bf16 %v958_v57, %v958_v57 }
  0x37   : > { %v531_v24 = vrot.slane %v530_v60, 1  ;;  %v548_v3 = vpack.c.bf16 %v969_v29, %v969_v29  ;;  %v523_v4 = vadd.f32 %v522_v62, %v521_v54  ;;  %v550_v5 = vpack.c.bf16 %v478_v46, %v478_v46 }
  0x38   : > { %v551_v6 = vpack.c.bf16 %v487_v50, %v487_v50  ;;  %v552_v31 = vpack.c.bf16 %v496_v53, %v496_v53  ;;  %v539_v8 = vadd.f32 %v538_v2, %v537_v61  ;;  %v553_v37 = vpack.c.bf16 %v505_v58, %v505_v58  ;;  %v669_v53 = vld [vmem:[%s287_s20 + $0x8] sm:$0xff] }
  0x39   : > { %v532_v7 = vadd.f32 %v531_v24, %v530_v60  ;;  %v554_v9 = vpack.c.bf16 %v514_v59, %v514_v59  ;;  %v549_v41 = vpack.c.bf16 %v972_v40, %v972_v40  ;;  %v555_v10 = vpack.c.bf16 %v523_v4, %v523_v4 }
  0x3a   : > { %v576_v11 = vunpack.c.l.b16 %v542_v55  ;;  %v577_v12 = vunpack.c.l.b16 %v543_v56  ;;  %v540_v13 = vrot.slane %v539_v8, 1  ;;  %v578_v14 = vunpack.c.l.b16 %v544_v63 }
  0x3b   : > { %v556_v57 = vpack.c.bf16 %v532_v7, %v532_v7  ;;  %v579_v15 = vunpack.c.l.b16 %v545_v0  ;;  %v580_v16 = vunpack.c.l.b16 %v546_v1  ;;  %v581_v17 = vunpack.c.l.b16 %v547_v30 }
  0x3c   : > { %v584_v18 = vunpack.c.l.b16 %v550_v5  ;;  %v585_v19 = vunpack.c.l.b16 %v551_v6  ;;  %v541_v20 = vadd.f32 %v540_v13, %v539_v8  ;;  %v586_v21 = vunpack.c.l.b16 %v552_v31 }
  0x3d   : > { %v587_v22 = vunpack.c.l.b16 %v553_v37  ;;  %v588_v23 = vunpack.c.l.b16 %v554_v9  ;;  %v582_v25 = vunpack.c.l.b16 %v548_v3  ;;  %v589_v26 = vunpack.c.l.b16 %v555_v10 }
  0x3e   : > { %v593_v27 = vsel %vm592_vm4, %v577_v12, %v576_v11  ;;  %v606_v28 = vsel %vm592_vm4, %v585_v19, %v584_v18  ;;  %v557_v29 = vpack.c.bf16 %v541_v20, %v541_v20  ;;  %v590_v32 = vunpack.c.l.b16 %v556_v57 }
  0x3f   : > { %v595_v33 = vsel %vm594_vm5, %v578_v14, %v593_v27  ;;  %v607_v34 = vsel %vm594_vm5, %v586_v21, %v606_v28  ;;  %v583_v35 = vunpack.c.l.b16 %v549_v41  ;;  %v670_v51 = vmul.f32 %v668_v42, %v668_v42 }
  0x40   : > { %v597_v36 = vsel %vm596_vm6, %v579_v15, %v595_v33  ;;  %v608_v38 = vsel %vm596_vm6, %v587_v22, %v607_v34  ;;  %v591_v39 = vunpack.c.l.b16 %v557_v29  ;;  %v671_v54 = vmul.f32 %v669_v53, %v669_v53 }
  0x41   : > { %v599_v40 = vsel %vm598_vm7, %v580_v16, %v597_v36  ;;  %v609_v43 = vsel %vm598_vm7, %v588_v23, %v608_v38  ;;  %v672_v52 = vsel %vm303_vm3, %v670_v51, 0.0  ;;  %v679_v11 = vstv %s678_s21 }
  0x42   : > { %v601_v44 = vsel %vm600_vm8, %v581_v17, %v599_v40  ;;  %v610_v45 = vsel %vm600_vm8, %v589_v26, %v609_v43  ;;  %673 = vadd.xlane.f32.xlu1 %v672_v52  ;;  %v675_v55 = vsel %vm303_vm3, %v671_v54, 0.0 }
  0x43   : > { %v603_v46 = vsel %vm602_vm9, %v582_v25, %v601_v44  ;;  %v611_v47 = vsel %vm602_vm9, %v590_v32, %v610_v45 }
  0x44   : > { %v605_v48 = vsel %vm604_vm10, %v583_v35, %v603_v46  ;;  %v612_v49 = vsel %vm604_vm10, %v591_v39, %v611_v47 }
  0x45   : > { %v613_v50 = vpack.c.b16 %v612_v49, %v605_v48 }
  0x46   : > { %676 = vadd.xlane.f32.xlu1 %v675_v55 }
  0x47   : > { %796 = vmatmul.mubr.msk.bf16.vlgmr.msra.gmra.mrb[0].mxu1 %vm397_vm2, %v613_v50 }
  0xcf   : > { %v674_v9 = vpop.xlane.xlu1 %673 }
  0xd0   : > { %v680_v13 = vmul.f32 %v679_v11, %v674_v9 }
  0xd3   : > { %v677_v10 = vpop.xlane.xlu1 %676 }
  0xd4   : > { %v681_v16 = vmul.f32 %v679_v11, %v677_v10 }
  0xe7   : > { %v341_v56 = vpop.f32.mrb[0].mxu0 }
  0xe8   : > { %v343_v58 = vpop.f32.mrb[1].mxu0 }
  0xe9   : > { %v345_v59 = vpop.f32.mrb[2].mxu0 }
  0xea   : > { %v347_v60 = vpop.f32.mrb[3].mxu0 }
  0xeb   : > { %v350_v61 = vadd.f32 %v347_v60, %v343_v58 }
  0xed   : > { %v351_v62 = vrot.slane %v350_v61, 4 }
  0xef   : > { %v352_v63 = vadd.f32 %v351_v62, %v350_v61 }
  0xf1   : > { %v353_v0 = vrot.slane %v352_v63, 2 }
  0xf3   : > { %v354_v1 = vadd.f32 %v353_v0, %v352_v63 }
  0xf5   : > { %v355_v24 = vrot.slane %v354_v1, 1 }
  0xf7   : > { %v356_v2 = vadd.f32 %v355_v24, %v354_v1 }
  0xf9   : > { %v357_v30 = vmul.f32 %v356_v2, %v341_v56  ;;  %v358_v3 = vmul.f32 %v356_v2, %v345_v59 }
  0xfb   : > { %359 = vadd.xlane.f32.xlu0 %v357_v30 }
  0xff   : > { %361 = vadd.xlane.f32.xlu0 %v358_v3 }
 0x11a   : > { %v655_v4 = vpop.f32.mrb[0].mxu1 }
 0x11b   : > { %v797_v5 = vpop.f32.mrb[1].mxu1  ;;  %v662_v6 = vsel %vm397_vm2, %v655_v4, 0.0 }
 0x11c   : > { %v658_v31 = vpop.f32.mrb[2].mxu1  ;;  %663 = vadd.xlane.f32.xlu0 %v662_v6 }
 0x11d   : > { %v798_v7 = vpop.f32.mrb[3].mxu1  ;;  %v665_v8 = vsel %vm397_vm2, %v658_v31, 0.0 }
 0x11e   : > { %666 = vadd.xlane.f32.xlu1 %v665_v8 }
 0x188   : > { %v360_v37 = vpop.xlane.xlu0 %359 }
 0x189   : > { %v363_v12 = vmul.f32 0.25, %v360_v37 }
 0x18c   : > { %v362_v41 = vpop.xlane.xlu0 %361 }
 0x18d   : > { %v364_v14 = vmul.f32 0.25, %v362_v41 }
 0x1a9   : > { %v664_v57 = vpop.xlane.xlu0 %663 }
 0x1aa   : > { %v683_v15 = vsel %vm682_vm11, %v363_v12, %v664_v57 }
 0x1ab   : > { %v686_v17 = vsel %vm685_vm12, %v683_v15, %v680_v13  ;;  %v667_v18 = vpop.xlane.xlu1 %666 }
 0x1ac   : > { %689 = vst.msk [vmem:[%s292_s25] sm:$0xff] %vm688_vm13, %v686_v17  ;;  %v684_v19 = vsel %vm682_vm11, %v364_v14, %v667_v18 }
 0x1ad   : > { %v687_v20 = vsel %vm685_vm12, %v684_v19, %v681_v16 }
 0x1ae   : > { %690 = vst.msk [vmem:[%s292_s25 + $0x8] sm:$0xff] %vm688_vm13, %v687_v20 }
 0x1af PF: > { %s17_s23 = sadd.s32 1, %s816_s23  }
 0x1b0   : > { %p14_p4 = scmp.ge.s32.totalorder %s17_s23, 4  }
 0x1b2   :  { %16 = sbr.rel (!%p14_p4) target bundleno = 2 (0x2), region = 80 }

// kernel: geometric_attention_pallas.3
= control target key start
LH: loop header
LB: loop body
LE: loop exit
PB: predicated region body
PF: predicated region fallthrough
CT: control target
= control target key end

     0   :  { %s9483_s0 = inlined_call_operand.vmem [shape: f32[2], index: 0, kind: input, shape index: {}]   ;;  %s9484_s1 = inlined_call_operand.vmem [shape: f32[2,16,16], index: 1, kind: input, shape index: {}]   ;;  %s9485_s2 = inlined_call_operand.vmem [shape: f32[2,16,16,8], index: 2, kind: input, shape index: {}]   ;;  %s9486_s3 = inlined_call_operand.vmem [shape: f32[2,16,16], index: 3, kind: input, shape index: {}]   ;;  %s9487_s4 = inlined_call_operand.vmem [shape: f32[2,16,1], index: 4, kind: input, shape index: {}]   ;;  %s9488_s5 = inlined_call_operand.vmem [shape: f32[2,1,16], index: 5, kind: input, shape index: {}]   ;;  %s9489_s6 = inlined_call_operand.vmem [shape: f32[8,1,1], index: 6, kind: input, shape index: {}]   ;;  %s9490_s7 = inlined_call_operand.vmem [shape: f32[16,384], index: 7, kind: input, shape index: {}]   ;;  %s9491_s8 = inlined_call_operand.vmem [shape: f32[8,8], index: 8, kind: input, shape index: {}]   ;;  %s9492_s9 = inlined_call_operand.vmem [shape: f32[192,16], index: 9, kind: input, shape index: {}]   ;;  %s9493_s10 = inlined_call_operand.vmem [shape: f32[1,16], index: 10, kind: input, shape index: {}]   ;;  %s9494_s11 = inlined_call_operand.vmem [shape: f32[1,16], index: 11, kind: input, shape index: {}]   ;;  %s9495_s12 = inlined_call_operand.vmem [shape: f32[1,16], index: 12, kind: input, shape index: {}]   ;;  %s9496_s13 = inlined_call_operand.hbm [shape: f32[2,16,16], index: 13, kind: output, shape index: {}]  }
   0x1   :  { %9540 = sst [smem:[#allocation37_spill]] %s9484_s1  ;;  %s18_s27 = sshll.u32 %s9483_s0, 4  ;;  %s19_s27 = int_to_ptr.vmem [resolvable:$true] %s18_s27 }
   0x2   :  { %9541 = sst [smem:[#allocation38_spill]] %s9485_s2  ;;  %s7387_s28 = scalar_lea.vmem %s19_s27, 16 }
   0x3   :  { %9542 = sst [smem:[#allocation39_spill]] %s9487_s4  ;;  %p7388_p0 = scmp.ne.s32.totalorder %s19_s27, %s7387_s28 }
   0x4   :  { %9543 = sst [smem:[#allocation40_spill]] %s9490_s7  ;;  %p7392_p1 = scmp.lt.s32.totalorder %s19_s27, %s19_s27 }
   0x5   :  { %p7393_p2 = scmp.lt.s32.totalorder %s7387_s28, %s7387_s28 }
   0x7   :  { %p7394_p3 = por %p7393_p2, %p7392_p1 }
   0x9   :  { %p7395_p4 = pnand %p7394_p3, %p7388_p0 }
   0xb   :  { %7398 = shalt.err (!%p7395_p4)  }
   0xc   :  { %s7465_s29 = smov [#allocation3]  }
   0xd   :  { %21 = dma.vmem_to_smem %s19_s27, 16, %s7465_s29, [#allocation2] }
   0xe   :  { %7443 = dma.done.wait [#allocation2], 16 }
   0xf   :  { %7444 = vsyncadd [#allocation2], 4294967280 }
  0x10   :  { %23 = sfence }
  0x11   :  { %24 = vsyncpa [#allocation5], 0 }
  0x12   :  { %26 = vsyncpa [#allocation5 + $0x1], 0  ;;  %s7557_s30 = smov 0   ;;  %s7559_s14 = smov 0  }
  0x13   :  { %s7561_s0 = smov 0   ;;  %s7563_s15 = smov 0  }
  0x14 LB: > { %s7578_s16 = sadd.s32 4294967295, %s7463_s15   ;;  %s6697_s17 = sadd.s32 4294967294, %s7463_s15   ;;  %s7463_s15 = sphi %s7563_s15, %s9620_s15   ;;  %s7459_s0 = sphi %s7561_s0, %s9619_s0   ;;  %s7455_s14 = sphi %s7559_s14, %s9618_s14   ;;  %s7451_s30 = sphi %s7557_s30, %s9617_s30  }
  0x15   : > { %s7582_s18 = sadd.s32 1, %s7463_s15   ;;  %s316_s19 = sadd.s32 1, %s7459_s0 }
  0x16   : > { %s313_s20 = ssub.s32 %s7463_s15, %s7582_s18  ;;  %p326_p5 = scmp.ne.s32.totalorder %s7459_s0, %s7455_s14 }
  0x17   : > { %p314_p6 = scmp.eq.s32.totalorder %s313_s20, 0  ;;  %p327_p7 = scmp.eq.s32.totalorder %s7578_s16, 1 }
  0x18   : > { %p332_p8 = scmp.ne.s32.totalorder %s7455_s14, %s7451_s30  ;;  %p333_p9 = scmp.eq.s32.totalorder %s6697_s17, 1 }
  0x19   : > { %s7593_s21 = scalar_select %p314_p6, %s7459_s0, %s316_s19  }
  0x1a   : > { %p7595_p10 = por %p327_p7, %p326_p5  ;;  %p7599_p11 = por %p333_p9, %p332_p8 }
  0x1b   : > { %9544 = sst [smem:[#allocation8_spill]] %s7593_s21  ;;  %p6700_p12 = scmp.ge.s32.totalorder %s7463_s15, 1 }
  0x1c   : > { %p410_p13 = scmp.lt.s32.totalorder %s7463_s15, 3 }
  0x1e   : > { %p411_p0 = pnand %p6700_p12, %p410_p13 }
  0x20   : > { %414 = sbr.rel (%p411_p0) target bundleno = 2390 (0x956), region = 68 }
  0x27   : > { %s9547_s7 = sld [smem:[#allocation40_spill]]  ;;  %p470_p1 = scmp.lt.s32.totalorder %s7578_s16, 1  ;;  %v9511_v5 = vmov 0   ;;  %vm538_vm0 = vcmask 130048   ;;  %v9513_v13 = vmov 0.0   ;;  %vm7468_vm1 = vmmov 0  }
  0x28   : > { %574 = vmatprep.mubr.bf16.mxu0 %v9511_v5  ;;  %7241 = vset.pattern.permute.xlu1 %v9511_v5  ;;  %s9548_s1 = sld [smem:[#allocation37_spill]]  ;;  %s9507_s25 = smov 112   ;;  %v6787_v20 = vld [vmem:[%s9489_s6 + $0x2] ss:$0 sm:$0xff]  ;;  %v6788_v21 = vld [vmem:[%s9489_s6 + $0x3] ss:$0 sm:$0xff]  ;;  %v675_v28 = vlaneseq }
  0x29   : > { %s7621_s20 = scalar_select %p470_p1, %s7578_s16, 1  ;;  %7240 = vset.pattern.permute.xlu0 %v9511_v5  ;;  %6947 = vmatprep.subr.bf16.mxu1 %v9513_v13  ;;  %v6785_v22 = vld [vmem:[%s9489_s6] ss:$0 sm:$0xff]  ;;  %v6790_v23 = vld [vmem:[%s9489_s6 + $0x5] ss:$0 sm:$0xff]  ;;  %vm2865_vm4 = vcmask 1043456  }
  0x2a   : > { %6949 = vmatprep.mubr.msk.bf16.mxu1 %vm7468_vm1, %v9513_v13  ;;  %s9501_s26 = smov 96   ;;  %s9499_s28 = smov 80   ;;  %v6786_v25 = vld [vmem:[%s9489_s6 + $0x1] ss:$0 sm:$0xff]  ;;  %v7476_v26 = vmov 1983009808  }
  0x2b   : > { %s7625_s24 = sshll.u32 %s7621_s20, 4  ;;  %s9497_s29 = smov 64   ;;  %v673_v27 = vunpack.c.l.s4 %v7476_v26  ;;  %v7477_v30 = vmov 1934713408   ;;  %v6789_v32 = vld [vmem:[%s9489_s6 + $0x4] ss:$0 sm:$0xff] }
  0x2c   : > { %s9503_s17 = smov 48   ;;  %s9505_s19 = smov 32   ;;  %v737_v31 = vunpack.c.l.s4 %v7477_v30  ;;  %v6791_v33 = vld [vmem:[%s9489_s6 + $0x6] ss:$0 sm:$0xff]  ;;  %v676_v36 = vshrl.u32 %v675_v28, 7  ;;  %vm2816_vm5 = vcmask 64512  }
  0x2d   : > { %v530_v0 = vld [vmem:[%s9547_s7 + $0x8] sm:$0xff]  ;;  %v533_v1 = vld [vmem:[%s9547_s7 + $0x20] sm:$0xff]  ;;  %v532_v4 = vld [vmem:[%s9547_s7 + $0x18] sm:$0xff]  ;;  %s9549_s4 = sld [smem:[#allocation39_spill]]  ;;  %v674_v35 = vunpack.c.0.s8 %v673_v27  ;;  %s9555_s2 = sld [smem:[#allocation38_spill]]  ;;  %vm5215_vm10 = vcmask 261120  }
  0x2e   : > { %v529_v2 = vld [vmem:[%s9547_s7] sm:$0xff]  ;;  %v536_v3 = vpack.c.bf16 %v533_v1, %v530_v0  ;;  %s7631_s27 = scalar_lea.vmem %s9548_s1, %s7625_s24  ;;  %v531_v10 = vld [vmem:[%s9547_s7 + $0x10] sm:$0xff]  ;;  %v534_v11 = vld [vmem:[%s9547_s7 + $0x28] sm:$0xff]  ;;  %s9509_s1 = smov 16   ;;  %v738_v38 = vunpack.c.0.s8 %v737_v31  ;;  %vm5218_vm11 = vcmask 392192   ;;  %vm5221_vm12 = vcmask 523264  }
  0x2f   : > { %v535_v6 = vpack.c.bf16 %v532_v4, %v529_v2  ;;  %v494_v7 = vld [vmem:[%s7631_s27] sm:$0xff]  ;;  %v495_v8 = vld [vmem:[%s7631_s27 + $0x8] sm:$0xff]  ;;  %v537_v12 = vpack.c.bf16 %v534_v11, %v531_v10  ;;  %v7756_v44 = vsub.s32 %v674_v35, %v676_v36  ;;  %s3818_s21 = sld [smem:[#allocation3]]  ;;  %s484_s7 = scalar_lea.vmem %s9486_s3, %s7625_s24  ;;  %vm5224_vm13 = vcmask 654336  }
  0x30   : > { %542 = vmatprep.subr.bf16.mxu0 %v536_v3  ;;  %v528_v9 = vpack.c.bf16 %v495_v8, %v494_v7  ;;  %v6792_v41 = vld [vmem:[%s9489_s6 + $0x7] ss:$0 sm:$0xff]  ;;  %v7760_v49 = vsub.s32 %v738_v38, %v676_v36  ;;  %vm5227_vm14 = vcmask 785408   ;;  %vm5230_vm15 = vcmask 916480  }
  0x31   : > { %543 = vmatpush1.bf16.msra.mxu0 %v535_v6  ;;  %6948 = vmatpush3.bf16.msra.mxu1 %v537_v12 }
  0x32   : > { %6953 = vmatprep.subr.bf16.mxu0 %v9513_v13  ;;  %6959 = vmatprep.subr.bf16.mxu1 %v9513_v13 }
  0x34   : > { %6710 = vmatmul.mubr.msk.bf16.vlgmr.msra.gmra.mrb[0].mxu0 %vm538_vm0, %v528_v9  ;;  %6950 = vmatmul.mubr.msk.bf16.vlgmr.msra.gmra.mrb[0].mxu1 %vm538_vm0, %v528_v9 }
  0x35   : > { %6955 = vmatprep.mubr.msk.bf16.mxu0 %vm7468_vm1, %v9513_v13  ;;  %6961 = vmatprep.mubr.msk.bf16.mxu1 %vm7468_vm1, %v9513_v13 }
 0x107   : > { %v7652_v14 = vpop.f32.mrb[0].mxu0  ;;  %v7754_v43 = vpop.f32.mrb[0].mxu1 }
 0x108   : > { %628 = vrot.lane.b32.xlu0 %v7652_v14, %s9507_s25  ;;  %v7656_v15 = vpop.f32.mrb[1].mxu0  ;;  %9550 = vst [vmem:[#allocation9_spill] sm:$0xff] %v7754_v43  ;;  %v6951_v48 = vpop.f32.mrb[1].mxu1 }
 0x109   : > { %1222 = vrot.lane.b32.xlu1 %v7656_v15, %s9501_s26  ;;  %v7660_v16 = vpop.f32.mrb[2].mxu0  ;;  %v7762_v50 = vpop.f32.mrb[2].mxu1 }
 0x10a   : > { %v7662_v17 = vpop.f32.mrb[3].mxu0  ;;  %9552 = vst [vmem:[#allocation10_spill] sm:$0xff] %v7762_v50  ;;  %v6952_v55 = vpop.f32.mrb[3].mxu1 }
 0x10c   : > { %634 = vrot.lane.b32.xlu0 %v7652_v14, %s9501_s26 }
 0x10d   : > { %630 = vrot.lane.b32.xlu1 %v7660_v16, %s9507_s25 }
 0x110   : > { %640 = vrot.lane.b32.xlu0 %v7652_v14, %s9499_s28 }
 0x111   : > { %636 = vrot.lane.b32.xlu1 %v7660_v16, %s9501_s26 }
 0x114   : > { %1216 = vrot.lane.b32.xlu0 %v7656_v15, %s9507_s25 }
 0x115   : > { %642 = vrot.lane.b32.xlu1 %v7660_v16, %s9499_s28 }
 0x118   : > { %1228 = vrot.lane.b32.xlu0 %v7656_v15, %s9499_s28 }
 0x119   : > { %648 = vrot.lane.b32.xlu1 %v7660_v16, %s9497_s29 }
 0x11c   : > { %1234 = vrot.lane.b32.xlu0 %v7656_v15, %s9497_s29 }
 0x11d   : > { %654 = vrot.lane.b32.xlu1 %v7660_v16, %s9503_s17 }
 0x120   : > { %1240 = vrot.lane.b32.xlu0 %v7656_v15, %s9503_s17 }
 0x121   : > { %1224 = vrot.lane.b32.xlu1 %v7662_v17, %s9501_s26  ;;  %s489_s26 = scalar_lea.vmem %s9549_s4, %s7625_s24  ;;  %s9585_s24 = smov 64  }
 0x122   : > { %v7720_v18 = vld [vmem:[%s489_s26] sm:$0xff]  ;;  %v7723_v19 = vld [vmem:[%s489_s26 + $0x8] sm:$0xff]  ;;  %s6860_s26 = sshll.u32 %s7621_s20, 8 }
 0x123   : > { %vm4218_vm2 = vcmp.gt.f32.partialorder %v7723_v19, 0.5  ;;  %vm4217_vm3 = vcmp.gt.f32.partialorder %v7720_v18, 0.5  ;;  %s8140_s4 = scalar_lea.vmem %s9555_s2, %s6860_s26  ;;  %s9591_s26 = smov 32  }
 0x124   : > { %1218 = vrot.lane.b32.xlu0 %v7662_v17, %s9507_s25  ;;  %s7480_s2 = smov 40  }
 0x125   : > { %1230 = vrot.lane.b32.xlu1 %v7662_v17, %s9499_s28  ;;  %s9553_s28 = smov 96  }
 0x128   : > { %1246 = vrot.lane.b32.xlu0 %v7656_v15, %s9505_s19 }
 0x129   : > { %1236 = vrot.lane.b32.xlu1 %v7662_v17, %s9497_s29 }
 0x12c   : > { %1252 = vrot.lane.b32.xlu0 %v7656_v15, %s9509_s1 }
 0x12d   : > { %1242 = vrot.lane.b32.xlu1 %v7662_v17, %s9503_s17 }
 0x130   : > { %646 = vrot.lane.b32.xlu0 %v7652_v14, %s9497_s29  ;;  %s9554_s29 = smov 80  }
 0x131   : > { %1248 = vrot.lane.b32.xlu1 %v7662_v17, %s9505_s19 }
 0x134   : > { %652 = vrot.lane.b32.xlu0 %v7652_v14, %s9503_s17 }
 0x135   : > { %1254 = vrot.lane.b32.xlu1 %v7662_v17, %s9509_s1 }
 0x138   : > { %658 = vrot.lane.b32.xlu0 %v7652_v14, %s9505_s19 }
 0x139   : > { %660 = vrot.lane.b32.xlu1 %v7660_v16, %s9505_s19  ;;  %s9551_s19 = smov 112  }
 0x13c   : > { %664 = vrot.lane.b32.xlu0 %v7652_v14, %s9509_s1 }
 0x13d   : > { %666 = vrot.lane.b32.xlu1 %v7660_v16, %s9509_s1  ;;  %s9592_s1 = smov 16  }
 0x140   : > { %3919 = vperm.xlu0 %7240, %v6785_v22  }
 0x141   : > { %3987 = vperm.xlu1 %7241, %v7720_v18  }
 0x144   : > { %3923 = vperm.xlu0 %7240, %v6786_v25  }
 0x145   : > { %3992 = vperm.xlu1 %7241, %v7723_v19  }
 0x148   : > { %3935 = vperm.xlu0 %7240, %v6789_v32  }
 0x149   : > { %3927 = vperm.xlu1 %7241, %v6787_v20  }
 0x14c   : > { %1804 = vrot.lane.b32.xlu0 %v7754_v43, %s9551_s19 }
 0x14d   : > { %3931 = vperm.xlu1 %7241, %v6788_v21  }
 0x150   : > { %1812 = vrot.lane.b32.xlu0 %v7762_v50, %s9553_s28 }
 0x151   : > { %3939 = vperm.xlu1 %7241, %v6790_v23  }
 0x154   : > { %1818 = vrot.lane.b32.xlu0 %v7762_v50, %s9554_s29 }
 0x155   : > { %3943 = vperm.xlu1 %7241, %v6791_v33  }
 0x159   : > { %3947 = vperm.xlu1 %7241, %v6792_v41  }
 0x15d   : > { %1806 = vrot.lane.b32.xlu1 %v7762_v50, %s9551_s19 }
 0x161   : > { %1810 = vrot.lane.b32.xlu1 %v7754_v43, %s9553_s28 }
 0x165   : > { %1816 = vrot.lane.b32.xlu1 %v7754_v43, %s9554_s29 }
 0x17a   : > { %v629_v24 = vpop.permute.xlu0 %628 }
 0x17b   : > { %v7741_v29 = vpop.permute.xlu1 %1222 }
 0x17c   : > { %v1258_v26 = vcombine.low %v7656_v15, %v7741_v29  ;;  %v1259_v27 = vcombine.high %v7656_v15, %v7741_v29 }
 0x17e   : > { %v635_v34 = vpop.permute.xlu0 %634 }
 0x17f   : > { %v631_v37 = vpop.permute.xlu1 %630  ;;  %v670_v39 = vcombine.low %v7652_v14, %v635_v34  ;;  %v671_v40 = vcombine.high %v7652_v14, %v635_v34 }
 0x181   : > { %v678_v51 = vrot.slane %v670_v39, %v7756_v44  ;;  %v685_v52 = vrot.slane %v671_v40, %v7756_v44 }
 0x182   : > { %v641_v42 = vpop.permute.xlu0 %640 }
 0x183   : > { %v686_v45 = vcombine.low %v629_v24, %v641_v42  ;;  %v687_v46 = vcombine.high %v629_v24, %v641_v42  ;;  %v637_v47 = vpop.permute.xlu1 %636 }
 0x184   : > { %v806_v56 = vcombine.low %v7660_v16, %v637_v47  ;;  %v807_v57 = vcombine.high %v7660_v16, %v637_v47 }
 0x185   : > { %v694_v53 = vrot.slane %v686_v45, %v7756_v44  ;;  %v701_v54 = vrot.slane %v687_v46, %v7756_v44 }
 0x186   : > { %v1217_v58 = vpop.permute.xlu0 %1216  ;;  %v814_v7 = vrot.slane %v806_v56, %v7756_v44  ;;  %v821_v8 = vrot.slane %v807_v57, %v7756_v44 }
 0x187   : > { %v734_v59 = vcombine.low %v678_v51, %v694_v53  ;;  %v735_v60 = vcombine.high %v678_v51, %v694_v53  ;;  %v750_v61 = vcombine.low %v685_v52, %v701_v54  ;;  %v751_v62 = vcombine.high %v685_v52, %v701_v54  ;;  %v643_v63 = vpop.permute.xlu1 %642 }
 0x188   : > { %v822_v0 = vcombine.low %v631_v37, %v643_v63  ;;  %v823_v1 = vcombine.high %v631_v37, %v643_v63  ;;  %v1266_v52 = vrot.slane %v1258_v26, %v7756_v44  ;;  %v1273_v53 = vrot.slane %v1259_v27, %v7756_v44 }
 0x189   : > { %v742_v2 = vrot.slane %v734_v59, %v7760_v49  ;;  %v749_v3 = vrot.slane %v735_v60, %v7760_v49  ;;  %v758_v4 = vrot.slane %v750_v61, %v7760_v49  ;;  %v765_v6 = vrot.slane %v751_v62, %v7760_v49 }
 0x18a   : > { %v830_v9 = vrot.slane %v822_v0, %v7756_v44  ;;  %v837_v10 = vrot.slane %v823_v1, %v7756_v44  ;;  %v1229_v11 = vpop.permute.xlu0 %1228 }
 0x18b   : > { %v6712_v12 = vcombine.low %v742_v2, %v749_v3  ;;  %v6714_v14 = vcombine.high %v742_v2, %v749_v3  ;;  %v6716_v16 = vcombine.low %v758_v4, %v765_v6  ;;  %v6718_v20 = vcombine.high %v758_v4, %v765_v6  ;;  %v7782_v21 = vpop.permute.xlu1 %648 }
 0x18c   : > { %v870_v22 = vcombine.low %v814_v7, %v830_v9  ;;  %v871_v23 = vcombine.high %v814_v7, %v830_v9  ;;  %v886_v24 = vcombine.low %v821_v8, %v837_v10  ;;  %v887_v25 = vcombine.high %v821_v8, %v837_v10 }
 0x18d   : > { %v7799_v34 = vrot.slane %v6712_v12, %v7756_v44  ;;  %v7802_v35 = vrot.slane %v6714_v14, %v7756_v44  ;;  %v7805_v36 = vrot.slane %v6716_v16, %v7756_v44  ;;  %v7808_v15 = vrot.slane %v6718_v20, %v7756_v44 }
 0x18e   : > { %v878_v28 = vrot.slane %v870_v22, %v7760_v49  ;;  %v885_v30 = vrot.slane %v871_v23, %v7760_v49  ;;  %v894_v31 = vrot.slane %v886_v24, %v7760_v49  ;;  %v901_v32 = vrot.slane %v887_v25, %v7760_v49  ;;  %v7796_v33 = vpop.permute.xlu0 %1234 }
 0x18f   : > { %v7810_v29 = vpop.permute.xlu1 %654  ;;  %v1274_v41 = vcombine.low %v1217_v58, %v1229_v11  ;;  %v1275_v42 = vcombine.high %v1217_v58, %v1229_v11  ;;  %v1006_v57 = vcombine.low %v7799_v34, %v7802_v35  ;;  %v1038_v58 = vcombine.low %v7805_v36, %v7808_v15 }
 0x190   : > { %v6720_v37 = vcombine.low %v878_v28, %v885_v30  ;;  %v6722_v38 = vcombine.high %v878_v28, %v885_v30  ;;  %v6724_v39 = vcombine.low %v894_v31, %v901_v32  ;;  %v6726_v40 = vcombine.high %v894_v31, %v901_v32 }
 0x191   : > { %v1282_v54 = vrot.slane %v1274_v41, %v7756_v44  ;;  %v1289_v55 = vrot.slane %v1275_v42, %v7756_v44  ;;  %v7847_v12 = vrot.slane %v1006_v57, %v7760_v49  ;;  %v7857_v30 = vrot.slane %v1038_v58, %v7760_v49 }
 0x192   : > { %v7815_v45 = vrot.slane %v6720_v37, %v7756_v44  ;;  %v7818_v46 = vrot.slane %v6722_v38, %v7756_v44  ;;  %v7821_v47 = vrot.slane %v6724_v39, %v7756_v44  ;;  %v7824_v48 = vrot.slane %v6726_v40, %v7756_v44  ;;  %v7826_v51 = vpop.permute.xlu0 %1240 }
 0x193   : > { %v1225_v56 = vpop.permute.xlu1 %1224  ;;  %v1322_v59 = vcombine.low %v1266_v52, %v1282_v54  ;;  %v1323_v60 = vcombine.high %v1266_v52, %v1282_v54  ;;  %v1338_v61 = vcombine.low %v1273_v53, %v1289_v55  ;;  %v1339_v62 = vcombine.high %v1273_v53, %v1289_v55 }
 0x194   : > { %v1142_v63 = vcombine.low %v7815_v45, %v7818_v46  ;;  %v1174_v0 = vcombine.low %v7821_v47, %v7824_v48  ;;  %v1394_v1 = vcombine.low %v7662_v17, %v1225_v56  ;;  %v1395_v2 = vcombine.high %v7662_v17, %v1225_v56 }
 0x195   : > { %v1330_v4 = vrot.slane %v1322_v59, %v7760_v49  ;;  %v1337_v6 = vrot.slane %v1323_v60, %v7760_v49  ;;  %v1346_v7 = vrot.slane %v1338_v61, %v7760_v49  ;;  %v1353_v8 = vrot.slane %v1339_v62, %v7760_v49 }
 0x196   : > { %v1219_v3 = vpop.permute.xlu0 %1218  ;;  %v1402_v17 = vrot.slane %v1394_v1, %v7756_v44  ;;  %v1409_v23 = vrot.slane %v1395_v2, %v7756_v44  ;;  %v1150_v31 = vrot.slane %v1142_v63, %v7760_v49  ;;  %v1182_v32 = vrot.slane %v1174_v0, %v7760_v49 }
 0x197   : > { %v1231_v9 = vpop.permute.xlu1 %1230  ;;  %v6728_v14 = vcombine.low %v1330_v4, %v1337_v6  ;;  %v6730_v16 = vcombine.high %v1330_v4, %v1337_v6  ;;  %v6732_v20 = vcombine.low %v1346_v7, %v1353_v8  ;;  %v6734_v22 = vcombine.high %v1346_v7, %v1353_v8 }
 0x198   : > { %v1410_v10 = vcombine.low %v1219_v3, %v1231_v9  ;;  %v1411_v11 = vcombine.high %v1219_v3, %v1231_v9 }
 0x199   : > { %v7862_v41 = vrot.slane %v6728_v14, %v7756_v44  ;;  %v7865_v42 = vrot.slane %v6730_v16, %v7756_v44  ;;  %v7868_v52 = vrot.slane %v6732_v20, %v7756_v44  ;;  %v7871_v53 = vrot.slane %v6734_v22, %v7756_v44 }
 0x19a   : > { %v1418_v24 = vrot.slane %v1410_v10, %v7756_v44  ;;  %v1425_v25 = vrot.slane %v1411_v11, %v7756_v44  ;;  %v1247_v26 = vpop.permute.xlu0 %1246 }
 0x19b   : > { %v1290_v27 = vcombine.low %v7796_v33, %v1247_v26  ;;  %v7854_v28 = vpop.permute.xlu1 %1236  ;;  %v1291_v59 = vcombine.high %v7796_v33, %v1247_v26  ;;  %v1594_v7 = vcombine.low %v7862_v41, %v7865_v42  ;;  %v1626_v33 = vcombine.low %v7868_v52, %v7871_v53 }
 0x19c   : > { %v1458_v37 = vcombine.low %v1402_v17, %v1418_v24  ;;  %v1459_v38 = vcombine.high %v1402_v17, %v1418_v24  ;;  %v1474_v39 = vcombine.low %v1409_v23, %v1425_v25  ;;  %v1475_v40 = vcombine.high %v1409_v23, %v1425_v25 }
 0x19d   : > { %v1298_v60 = vrot.slane %v1290_v27, %v7756_v44  ;;  %v1305_v14 = vrot.slane %v1291_v59, %v7756_v44  ;;  %v1070_v23 = vcombine.low %v7847_v12, %v7857_v30  ;;  %v1206_v26 = vcombine.low %v1150_v31, %v1182_v32 }
 0x19e   : > { %v1466_v54 = vrot.slane %v1458_v37, %v7760_v49  ;;  %v1473_v55 = vrot.slane %v1459_v38, %v7760_v49  ;;  %v1482_v56 = vrot.slane %v1474_v39, %v7760_v49  ;;  %v1489_v57 = vrot.slane %v1475_v40, %v7760_v49  ;;  %v1253_v58 = vpop.permute.xlu0 %1252 }
 0x19f   : > { %v1306_v61 = vcombine.low %v7826_v51, %v1253_v58  ;;  %v1307_v62 = vcombine.high %v7826_v51, %v1253_v58  ;;  %v1243_v63 = vpop.permute.xlu1 %1242  ;;  %v1207_v27 = vcombine.high %v1150_v31, %v1182_v32  ;;  %v1602_v38 = vrot.slane %v1594_v7, %v7760_v49 }
 0x1a0   : > { %v6736_v0 = vcombine.low %v1466_v54, %v1473_v55  ;;  %v6738_v1 = vcombine.high %v1466_v54, %v1473_v55  ;;  %v6740_v2 = vcombine.low %v1482_v56, %v1489_v57  ;;  %v6742_v3 = vcombine.high %v1482_v56, %v1489_v57 }
 0x1a1   : > { %v1314_v4 = vrot.slane %v1306_v61, %v7756_v44  ;;  %v1321_v6 = vrot.slane %v1307_v62, %v7756_v44  ;;  %v1634_v39 = vrot.slane %v1626_v33, %v7760_v49  ;;  %v1071_v54 = vcombine.high %v7847_v12, %v7857_v30 }
 0x1a2   : > { %v7887_v8 = vpop.permute.xlu0 %646  ;;  %v7890_v9 = vrot.slane %v6736_v0, %v7756_v44  ;;  %v7893_v51 = vrot.slane %v6738_v1, %v7756_v44  ;;  %v7896_v10 = vrot.slane %v6740_v2, %v7756_v44  ;;  %v7899_v11 = vrot.slane %v6742_v3, %v7756_v44 }
 0x1a3   : > { %v1354_v16 = vcombine.low %v1298_v60, %v1314_v4  ;;  %v1249_v20 = vpop.permute.xlu1 %1248  ;;  %v1355_v22 = vcombine.high %v1298_v60, %v1314_v4  ;;  %v1370_v24 = vcombine.low %v1305_v14, %v1321_v6  ;;  %v1371_v25 = vcombine.high %v1305_v14, %v1321_v6 }
 0x1a4   : > { %v1730_v17 = vcombine.low %v7890_v9, %v7893_v51  ;;  %v1762_v40 = vcombine.low %v7896_v10, %v7899_v11  ;;  %v1426_v56 = vcombine.low %v7854_v28, %v1249_v20  ;;  %v1427_v57 = vcombine.high %v7854_v28, %v1249_v20 }
 0x1a5   : > { %v7915_v55 = vrot.slane %v1354_v16, %v7760_v49  ;;  %v7922_v58 = vrot.slane %v1355_v22, %v7760_v49  ;;  %v7926_v12 = vrot.slane %v1370_v24, %v7760_v49  ;;  %v7929_v30 = vrot.slane %v1371_v25, %v7760_v49 }
 0x1a6   : > { %v7906_v37 = vpop.permute.xlu0 %652  ;;  %v1738_v32 = vrot.slane %v1730_v17, %v7760_v49  ;;  %v1770_v61 = vrot.slane %v1762_v40, %v7760_v49  ;;  %v7931_v62 = vpack.c.bf16 %v1206_v26, %v1070_v23  ;;  %v7933_v28 = vpack.c.bf16 %v1207_v27, %v1071_v54 }
 0x1a7   : > { %v1255_v31 = vpop.permute.xlu1 %1254  ;;  %v1007_v0 = vcombine.high %v7799_v34, %v7802_v35  ;;  %v1039_v1 = vcombine.high %v7805_v36, %v7808_v15  ;;  %v1175_v3 = vcombine.high %v7821_v47, %v7824_v48  ;;  %v1434_v14 = vrot.slane %v1426_v56, %v7756_v44 }
 0x1a8   : > { %v1442_v59 = vcombine.low %v1243_v63, %v1255_v31  ;;  %v1443_v60 = vcombine.high %v1243_v63, %v1255_v31  ;;  %v1143_v63 = vcombine.high %v7815_v45, %v7818_v46  ;;  %v1794_v7 = vcombine.low %v1738_v32, %v1770_v61 }
 0x1a9   : > { %v1795_v33 = vcombine.high %v1738_v32, %v1770_v61  ;;  %v7949_v16 = vrot.slane %v1427_v57, %v7756_v44  ;;  %v1658_v22 = vcombine.low %v1602_v38, %v1634_v39  ;;  %v6729_v17 = vcombine.low %v7915_v55, %v7922_v58 }
 0x1aa   : > { %v659_v2 = vpop.permute.xlu0 %658  ;;  %v7945_v4 = vrot.slane %v1442_v59, %v7756_v44  ;;  %v7952_v20 = vrot.slane %v1443_v60, %v7756_v44  ;;  %v6731_v23 = vcombine.high %v7915_v55, %v7922_v58  ;;  %v6733_v24 = vcombine.low %v7926_v12, %v7929_v30 }
 0x1ab   : > { %v661_v6 = vpop.permute.xlu1 %660  ;;  %v1659_v25 = vcombine.high %v1602_v38, %v1634_v39  ;;  %v702_v26 = vcombine.low %v7887_v8, %v659_v2  ;;  %v703_v27 = vcombine.high %v7887_v8, %v659_v2  ;;  %v1595_v54 = vcombine.high %v7862_v41, %v7865_v42 }
 0x1ac   : > { %v1627_v56 = vcombine.high %v7868_v52, %v7871_v53  ;;  %v1490_v57 = vcombine.low %v1434_v14, %v7945_v4  ;;  %v1491_v31 = vcombine.high %v1434_v14, %v7945_v4  ;;  %v2398_v32 = vpack.c.bf16 %v1794_v7, %v1658_v22 }
 0x1ad   : > { %v2399_v59 = vpack.c.bf16 %v1795_v33, %v1659_v25  ;;  %v1506_v38 = vcombine.low %v7949_v16, %v7952_v20  ;;  %v1507_v8 = vcombine.high %v7949_v16, %v7952_v20  ;;  %v838_v39 = vcombine.low %v7782_v21, %v661_v6 }
 0x1ae   : > { %v665_v40 = vpop.permute.xlu0 %664  ;;  %v839_v41 = vcombine.high %v7782_v21, %v661_v6  ;;  %v2410_v42 = vsel %vm538_vm0, %v2398_v32, 0  ;;  %v710_v2 = vrot.slane %v702_v26, %v7756_v44  ;;  %v4220_v21 = vsel %vm4218_vm2, 1, %v9511_v5 }
 0x1af   : > { %v667_v60 = vpop.permute.xlu1 %666  ;;  %v2457_v52 = vsel %vm538_vm0, %v2399_v59, 0  ;;  %v718_v53 = vcombine.low %v7906_v37, %v665_v40  ;;  %v719_v61 = vcombine.high %v7906_v37, %v665_v40  ;;  %6954 = vmatpush3.bf16.xpose.msra.mxu0 %v2410_v42  ;;  %v717_v6 = vrot.slane %v703_v27, %v7756_v44  ;;  %4225 = vperm.xlu1 %7241, %v4220_v21  }
 0x1b0   : > { %6960 = vmatpush3.bf16.xpose.msra.mxu1 %v2457_v52  ;;  %v854_v4 = vcombine.low %v7810_v29, %v667_v60  ;;  %v855_v7 = vcombine.high %v7810_v29, %v667_v60  ;;  %6965 = vmatprep.subr.bf16.mxu0 %v9513_v13  ;;  %v4219_v37 = vsel %vm4217_vm3, 1, %v9511_v5  ;;  %v846_v29 = vrot.slane %v838_v39, %v7756_v44 }
 0x1b1   : > { %v726_v33 = vrot.slane %v718_v53, %v7756_v44  ;;  %v733_v14 = vrot.slane %v719_v61, %v7756_v44  ;;  %6971 = vmatprep.subr.bf16.mxu1 %v9513_v13  ;;  %v853_v16 = vrot.slane %v839_v41, %v7756_v44  ;;  %4222 = vperm.xlu0 %7240, %v4219_v37   ;;  %vm6418_vm2 = vcmask 326656  }
 0x1b2   : > { %v862_v19 = vrot.slane %v854_v4, %v7756_v44  ;;  %v869_v20 = vrot.slane %v855_v7, %v7756_v44  ;;  %v1498_v4 = vrot.slane %v1490_v57, %v7760_v49  ;;  %v1505_v7 = vrot.slane %v1491_v31, %v7760_v49 }
 0x1b3   : > { %v766_v22 = vcombine.low %v710_v2, %v726_v33  ;;  %v767_v25 = vcombine.high %v710_v2, %v726_v33  ;;  %v782_v26 = vcombine.low %v717_v6, %v733_v14  ;;  %v783_v27 = vcombine.high %v717_v6, %v733_v14 }
 0x1b4   : > { %v902_v40 = vcombine.low %v846_v29, %v862_v19  ;;  %v903_v32 = vcombine.high %v846_v29, %v862_v19  ;;  %v918_v59 = vcombine.low %v853_v16, %v869_v20  ;;  %v919_v60 = vcombine.high %v853_v16, %v869_v20 }
 0x1b5   : > { %v774_v18 = vrot.slane %v766_v22, %v7760_v49  ;;  %v781_v39 = vrot.slane %v767_v25, %v7760_v49  ;;  %v790_v41 = vrot.slane %v782_v26, %v7760_v49  ;;  %v797_v42 = vrot.slane %v783_v27, %v7760_v49 }
 0x1b6   : > { %v910_v52 = vrot.slane %v902_v40, %v7760_v49  ;;  %v917_v53 = vrot.slane %v903_v32, %v7760_v49  ;;  %v926_v61 = vrot.slane %v918_v59, %v7760_v49  ;;  %v933_v2 = vrot.slane %v919_v60, %v7760_v49  ;;  %6956 = vmatmul.mubr.msk.bf16.vlgmr.msra.gmra.mrb[4].mxu0 %vm538_vm0, %v7931_v62 }
 0x1b7   : > { %v6713_v21 = vcombine.low %v774_v18, %v781_v39  ;;  %v6715_v6 = vcombine.high %v774_v18, %v781_v39  ;;  %v8009_v33 = vrot.slane %v1506_v38, %v7760_v49  ;;  %v1521_v14 = vrot.slane %v1507_v8, %v7760_v49  ;;  %6962 = vmatmul.mubr.msk.bf16.vlgmr.msra.gmra.mrb[4].mxu1 %vm538_vm0, %v7933_v28 }
 0x1b8   : > { %v1609_v37 = vrot.slane %v1595_v54, %v7760_v49  ;;  %v1641_v29 = vrot.slane %v1627_v56, %v7760_v49  ;;  %v6717_v57 = vcombine.low %v790_v41, %v797_v42  ;;  %v6719_v16 = vcombine.high %v790_v41, %v797_v42  ;;  %6967 = vmatprep.mubr.msk.bf16.mxu0 %vm7468_vm1, %v9513_v13 }
 0x1b9   : > { %v6721_v31 = vcombine.low %v910_v52, %v917_v53  ;;  %v6723_v19 = vcombine.high %v910_v52, %v917_v53  ;;  %v8019_v62 = vrot.slane %v6713_v21, %v7756_v44  ;;  %v8022_v38 = vrot.slane %v6715_v6, %v7756_v44  ;;  %6973 = vmatprep.mubr.msk.bf16.mxu1 %vm7468_vm1, %v9513_v13 }
 0x1ba   : > { %v6725_v8 = vcombine.low %v926_v61, %v933_v2  ;;  %v6727_v20 = vcombine.high %v926_v61, %v933_v2  ;;  %v6735_v28 = vcombine.high %v7926_v12, %v7929_v30  ;;  %v6737_v54 = vcombine.low %v1498_v4, %v1505_v7 }
 0x1bb   : > { %v1731_v56 = vcombine.high %v7890_v9, %v7893_v51  ;;  %v1763_v22 = vcombine.high %v7896_v10, %v7899_v11  ;;  %v6739_v25 = vcombine.high %v1498_v4, %v1505_v7  ;;  %v6741_v26 = vcombine.low %v8009_v33, %v1521_v14 }
 0x1bc   : > { %v6743_v27 = vcombine.high %v8009_v33, %v1521_v14  ;;  %v1660_v40 = vcombine.low %v1609_v37, %v1641_v29  ;;  %v8035_v32 = vrot.slane %v6717_v57, %v7756_v44  ;;  %v8038_v59 = vrot.slane %v6719_v16, %v7756_v44 }
 0x1bd   : > { %v8041_v60 = vrot.slane %v6721_v31, %v7756_v44  ;;  %v1661_v18 = vcombine.high %v1609_v37, %v1641_v29  ;;  %v1022_v9 = vcombine.low %v8019_v62, %v8022_v38  ;;  %v8046_v51 = vrot.slane %v6723_v19, %v7756_v44 }
 0x1be   : > { %v8049_v10 = vrot.slane %v6725_v8, %v7756_v44  ;;  %v8052_v11 = vrot.slane %v6727_v20, %v7756_v44  ;;  %v1745_v39 = vrot.slane %v1731_v56, %v7760_v49  ;;  %v1777_v41 = vrot.slane %v1763_v22, %v7760_v49 }
 0x1bf   : > { %v1021_v42 = vrot.slane %v1007_v0, %v7760_v49  ;;  %v1053_v52 = vrot.slane %v1039_v1, %v7760_v49  ;;  %v1157_v53 = vrot.slane %v1143_v63, %v7760_v49  ;;  %v1189_v61 = vrot.slane %v1175_v3, %v7760_v49 }
 0x1c0   : > { %v1545_v34 = vrot.slane %v6729_v17, %v7756_v44  ;;  %v1561_v35 = vrot.slane %v6731_v23, %v7756_v44  ;;  %v1796_v36 = vcombine.low %v1745_v39, %v1777_v41  ;;  %v1797_v15 = vcombine.high %v1745_v39, %v1777_v41 }
 0x1c1   : > { %v1072_v0 = vcombine.low %v1021_v42, %v1053_v52  ;;  %v1073_v45 = vcombine.high %v1021_v42, %v1053_v52  ;;  %v1208_v46 = vcombine.low %v1157_v53, %v1189_v61  ;;  %v1209_v1 = vcombine.high %v1157_v53, %v1189_v61 }
 0x1c2   : > { %v1577_v47 = vrot.slane %v6733_v24, %v7756_v44  ;;  %v1593_v48 = vrot.slane %v6735_v28, %v7756_v44  ;;  %v2400_v63 = vpack.c.bf16 %v1796_v36, %v1660_v40  ;;  %v2401_v3 = vpack.c.bf16 %v1797_v15, %v1661_v18 }
 0x1c3   : > { %v1610_v17 = vcombine.low %v1545_v34, %v1561_v35  ;;  %v1681_v2 = vrot.slane %v6737_v54, %v7756_v44  ;;  %v2392_v55 = vpack.c.bf16 %v1208_v46, %v1072_v0  ;;  %v2393_v58 = vpack.c.bf16 %v1209_v1, %v1073_v45 }
 0x1c4   : > { %v1642_v23 = vcombine.low %v1577_v47, %v1593_v48  ;;  %v1697_v4 = vrot.slane %v6739_v25, %v7756_v44  ;;  %v1054_v7 = vcombine.low %v8035_v32, %v8038_v59  ;;  %v2504_v21 = vsel %vm538_vm0, %v2400_v63, 0 }
 0x1c5   : > { %v2551_v12 = vsel %vm538_vm0, %v2401_v3, 0  ;;  %v1713_v30 = vrot.slane %v6741_v26, %v7756_v44  ;;  %v1158_v24 = vcombine.low %v8041_v60, %v8046_v51  ;;  %6966 = vmatpush3.bf16.xpose.msra.mxu0 %v2504_v21  ;;  %v1729_v6 = vrot.slane %v6743_v27, %v7756_v44 }
 0x1c6   : > { %6972 = vmatpush3.bf16.xpose.msra.mxu1 %v2551_v12  ;;  %v1746_v33 = vcombine.low %v1681_v2, %v1697_v4  ;;  %v1190_v14 = vcombine.low %v8049_v10, %v8052_v11  ;;  %6977 = vmatprep.subr.bf16.mxu0 %v9513_v13  ;;  %v1618_v37 = vrot.slane %v1610_v17, %v7760_v49  ;;  %vm6423_vm3 = vcmask 457728  }
 0x1c7   : > { %6983 = vmatprep.subr.bf16.mxu1 %v9513_v13  ;;  %v1650_v29 = vrot.slane %v1642_v23, %v7760_v49  ;;  %v1778_v16 = vcombine.low %v1713_v30, %v1729_v6  ;;  %v1030_v31 = vrot.slane %v1022_v9, %v7760_v49  ;;  %v1062_v19 = vrot.slane %v1054_v7, %v7760_v49 }
 0x1c8   : > { %v1754_v57 = vrot.slane %v1746_v33, %v7760_v49  ;;  %v1611_v8 = vcombine.high %v1545_v34, %v1561_v35  ;;  %v1643_v28 = vcombine.high %v1577_v47, %v1593_v48  ;;  %v1747_v54 = vcombine.high %v1681_v2, %v1697_v4  ;;  %v517_v33 = vld [vmem:[%s8140_s4 + $0xa8] sm:$0xff] }
 0x1c9   : > { %v1786_v20 = vrot.slane %v1778_v16, %v7760_v49  ;;  %v1779_v56 = vcombine.high %v1713_v30, %v1729_v6  ;;  %v1166_v22 = vrot.slane %v1158_v24, %v7760_v49  ;;  %v1198_v25 = vrot.slane %v1190_v14, %v7760_v49  ;;  %v496_v30 = vld [vmem:[%s8140_s4] sm:$0xff]  ;;  %v497_v24 = vld [vmem:[%s8140_s4 + $0x8] sm:$0xff] }
 0x1ca   : > { %v1662_v26 = vcombine.low %v1618_v37, %v1650_v29  ;;  %v1663_v27 = vcombine.high %v1618_v37, %v1650_v29  ;;  %v1761_v39 = vrot.slane %v1747_v54, %v7760_v49  ;;  %v1625_v41 = vrot.slane %v1611_v8, %v7760_v49  ;;  %v516_v6 = vld [vmem:[%s8140_s4 + $0xa0] sm:$0xff]  ;;  %v518_v8 = vld [vmem:[%s8140_s4 + $0xb0] sm:$0xff]  ;;  %v501_v54 = vld [vmem:[%s8140_s4 + $0x28] sm:$0xff] }
 0x1cb   : > { %v1798_v40 = vcombine.low %v1754_v57, %v1786_v20  ;;  %v1799_v18 = vcombine.high %v1754_v57, %v1786_v20  ;;  %v1793_v9 = vrot.slane %v1779_v56, %v7760_v49  ;;  %v1657_v53 = vrot.slane %v1643_v28, %v7760_v49  ;;  %v519_v20 = vld [vmem:[%s8140_s4 + $0xb8] sm:$0xff]  ;;  %v500_v28 = vld [vmem:[%s8140_s4 + $0x20] sm:$0xff] }
 0x1cc   : > { %6968 = vmatmul.mubr.msk.bf16.vlgmr.msra.gmra.mrb[8].mxu0 %vm538_vm0, %v2392_v55  ;;  %v1074_v61 = vcombine.low %v1030_v31, %v1062_v19  ;;  %v1210_v34 = vcombine.low %v1166_v22, %v1198_v25  ;;  %v1075_v35 = vcombine.high %v1030_v31, %v1062_v19  ;;  %v1211_v36 = vcombine.high %v1166_v22, %v1198_v25  ;;  %v498_v31 = vld [vmem:[%s8140_s4 + $0x10] sm:$0xff]  ;;  %v499_v19 = vld [vmem:[%s8140_s4 + $0x18] sm:$0xff]  ;;  %v520_v56 = vld [vmem:[%s8140_s4 + $0xc0] sm:$0xff] }
 0x1cd   : > { %6974 = vmatmul.mubr.msk.bf16.vlgmr.msra.gmra.mrb[8].mxu1 %vm538_vm0, %v2393_v58  ;;  %v2402_v42 = vpack.c.bf16 %v1798_v40, %v1662_v26  ;;  %v2403_v52 = vpack.c.bf16 %v1799_v18, %v1663_v27  ;;  %6979 = vmatprep.mubr.msk.bf16.mxu0 %vm7468_vm1, %v9513_v13  ;;  %v1800_v45 = vcombine.low %v1761_v39, %v1793_v9  ;;  %v521_v22 = vld [vmem:[%s8140_s4 + $0xc8] sm:$0xff]  ;;  %v502_v18 = vld [vmem:[%s8140_s4 + $0x30] sm:$0xff] }
 0x1ce   : > { %6985 = vmatprep.mubr.msk.bf16.mxu1 %vm7468_vm1, %v9513_v13  ;;  %v1801_v46 = vcombine.high %v1761_v39, %v1793_v9  ;;  %v1023_v1 = vcombine.high %v8019_v62, %v8022_v38  ;;  %v1055_v47 = vcombine.high %v8035_v32, %v8038_v59  ;;  %v1159_v48 = vcombine.high %v8041_v60, %v8046_v51  ;;  %v2814_v32 = vld [vmem:[%s9491_s8] sm:$0xff]  ;;  %v503_v39 = vld [vmem:[%s8140_s4 + $0x38] sm:$0xff]  ;;  %v522_v9 = vld [vmem:[%s8140_s4 + $0xd0] sm:$0xff] }
 0x1cf   : > { %v2598_v15 = vsel %vm538_vm0, %v2402_v42, 0  ;;  %v2645_v0 = vsel %vm538_vm0, %v2403_v52, 0  ;;  %v1191_v63 = vcombine.high %v8049_v10, %v8052_v11  ;;  %v1664_v3 = vcombine.low %v1625_v41, %v1657_v53  ;;  %v504_v42 = vld [vmem:[%s8140_s4 + $0x40] sm:$0xff]  ;;  %v8195_v52 = vpop.permute.xlu1 %3987 }
 0x1d0   : > { %6978 = vmatpush3.bf16.xpose.msra.mxu0 %v2598_v15  ;;  %6984 = vmatpush3.bf16.xpose.msra.mxu1 %v2645_v0  ;;  %v1665_v17 = vcombine.high %v1625_v41, %v1657_v53  ;;  %v2394_v2 = vpack.c.bf16 %v1210_v34, %v1074_v61  ;;  %v2395_v62 = vpack.c.bf16 %v1211_v36, %v1075_v35  ;;  %v523_v41 = vld [vmem:[%s8140_s4 + $0xd8] sm:$0xff]  ;;  %v505_v53 = vld [vmem:[%s8140_s4 + $0x48] sm:$0xff]  ;;  %v524_v61 = vld [vmem:[%s8140_s4 + $0xe0] sm:$0xff] }
 0x1d1   : > { %6989 = vmatprep.subr.bf16.mxu0 %v9513_v13  ;;  %6995 = vmatprep.subr.bf16.mxu1 %v9513_v13  ;;  %v2404_v38 = vpack.c.bf16 %v1800_v45, %v1664_v3  ;;  %v1037_v59 = vrot.slane %v1023_v1, %v7760_v49  ;;  %v1069_v60 = vrot.slane %v1055_v47, %v7760_v49  ;;  %v525_v34 = vld [vmem:[%s8140_s4 + $0xe8] sm:$0xff]  ;;  %v507_v1 = vld [vmem:[%s8140_s4 + $0x58] sm:$0xff]  ;;  %v526_v47 = vld [vmem:[%s8140_s4 + $0xf0] sm:$0xff] }
 0x1d2   : > { %v2405_v55 = vpack.c.bf16 %v1801_v46, %v1665_v17  ;;  %v1173_v51 = vrot.slane %v1159_v48, %v7760_v49  ;;  %v1205_v10 = vrot.slane %v1191_v63, %v7760_v49  ;;  %v2815_v11 = vpack.c.bf16 %v2814_v32, %v2814_v32  ;;  %9561 = vst [vmem:[#allocation16_spill] sm:$0xff] %v8195_v52  ;;  %v506_v46 = vld [vmem:[%s8140_s4 + $0x50] sm:$0xff]  ;;  %v527_v48 = vld [vmem:[%s8140_s4 + $0xf8] sm:$0xff]  ;;  %v508_v3 = vld [vmem:[%s8140_s4 + $0x60] sm:$0xff] }
 0x1d3   : > { %v2692_v58 = vsel %vm538_vm0, %v2404_v38, 0  ;;  %v1076_v4 = vcombine.low %v1037_v59, %v1069_v60  ;;  %v1077_v21 = vcombine.high %v1037_v59, %v1069_v60  ;;  %v2798_v14 = vpack.c.bf16 %v497_v24, %v496_v30  ;;  %v8209_v45 = vpop.permute.xlu1 %3992  ;;  %v509_v17 = vld [vmem:[%s8140_s4 + $0x68] sm:$0xff]  ;;  %v510_v60 = vld [vmem:[%s8140_s4 + $0x70] sm:$0xff]  ;;  %v515_v24 = vld [vmem:[%s8140_s4 + $0x98] sm:$0xff] }
 0x1d4   : > { %v2739_v23 = vsel %vm538_vm0, %v2405_v55, 0  ;;  %v1212_v7 = vcombine.low %v1173_v51, %v1205_v10  ;;  %v1213_v12 = vcombine.high %v1173_v51, %v1205_v10  ;;  %v2867_v57 = vsel %vm2865_vm4, %v2815_v11, 0  ;;  %9566 = vst [vmem:[#allocation21_spill] sm:$0xff] %v8209_v45  ;;  %v511_v51 = vld [vmem:[%s8140_s4 + $0x78] sm:$0xff]  ;;  %v514_v30 = vld [vmem:[%s8140_s4 + $0x90] sm:$0xff] }
 0x1d5   : > { %v8157_v16 = vpack.c.bf16 %v517_v33, %v516_v6  ;;  %v8174_v25 = vpack.c.bf16 %v499_v19, %v498_v31  ;;  %v8176_v26 = vpack.c.bf16 %v519_v20, %v518_v8  ;;  %v8178_v27 = vpack.c.bf16 %v501_v54, %v500_v28 }
 0x1d6   : > { %v2396_v37 = vpack.c.bf16 %v1212_v7, %v1076_v4  ;;  %v2397_v29 = vpack.c.bf16 %v1213_v12, %v1077_v21  ;;  %v8180_v40 = vpack.c.bf16 %v521_v22, %v520_v56  ;;  %v8201_v35 = vpack.c.bf16 %v503_v39, %v502_v18 }
 0x1d7   : > { %6980 = vmatmul.mubr.msk.bf16.vlgmr.msra.gmra.mrb[12].mxu0 %vm538_vm0, %v2394_v2  ;;  %6986 = vmatmul.mubr.msk.bf16.vlgmr.msra.gmra.mrb[12].mxu1 %vm538_vm0, %v2395_v62  ;;  %9556 = vst [vmem:[#allocation11_spill] sm:$0xff] %v8157_v16  ;;  %9557 = vst [vmem:[#allocation12_spill] sm:$0xff] %v8174_v25  ;;  %v8203_v36 = vpack.c.bf16 %v523_v41, %v522_v9  ;;  %v8205_v15 = vpack.c.bf16 %v505_v53, %v504_v42  ;;  %v8223_v63 = vpop.permute.xlu1 %3927  ;;  %v8227_v2 = vpop.permute.xlu0 %3919 }
 0x1d8   : > { %6990 = vmatpush3.bf16.xpose.msra.mxu0 %v2692_v58  ;;  %6996 = vmatpush3.bf16.xpose.msra.mxu1 %v2739_v23  ;;  %9558 = vst [vmem:[#allocation13_spill] sm:$0xff] %v8176_v26  ;;  %9559 = vst [vmem:[#allocation14_spill] sm:$0xff] %v8178_v27  ;;  %v8207_v0 = vpack.c.bf16 %v525_v34, %v524_v61  ;;  %v8229_v62 = vpack.c.bf16 %v507_v1, %v506_v46  ;;  %v513_v58 = vld [vmem:[%s8140_s4 + $0x88] sm:$0xff] }
 0x1d9   : > { %6991 = vmatprep.mubr.msk.bf16.mxu0 %vm7468_vm1, %v9513_v13  ;;  %6997 = vmatprep.mubr.msk.bf16.mxu1 %vm7468_vm1, %v9513_v13  ;;  %9560 = vst [vmem:[#allocation15_spill] sm:$0xff] %v8180_v40  ;;  %9562 = vst [vmem:[#allocation17_spill] sm:$0xff] %v8201_v35  ;;  %v8231_v38 = vpack.c.bf16 %v527_v48, %v526_v47  ;;  %v8233_v55 = vpack.c.bf16 %v509_v17, %v508_v3 }
 0x1da   : > { %7182 = vmatprep.subr.msk.bf16.mxu1 %vm2865_vm4, %v2815_v11  ;;  %7181 = vmatprep.subr.msk.bf16.mxu0 %vm2865_vm4, %v2815_v11  ;;  %9563 = vst [vmem:[#allocation18_spill] sm:$0xff] %v8203_v36  ;;  %9564 = vst [vmem:[#allocation19_spill] sm:$0xff] %v8205_v15  ;;  %v512_v11 = vld [vmem:[%s8140_s4 + $0x80] sm:$0xff]  ;;  %v8253_v23 = vpack.c.bf16 %v511_v51, %v510_v60  ;;  %v8269_v33 = vpack.c.bf16 %v515_v24, %v514_v30  ;;  %s492_s4 = scalar_lea.vmem %s9488_s5, %s7621_s20  ;;  %s8473_s20 = sld [smem:[#allocation3 + $0x1]] }
 0x1db   : > { %9565 = vst [vmem:[#allocation20_spill] sm:$0xff] %v8207_v0  ;;  %9567 = vst [vmem:[#allocation22_spill] sm:$0xff] %v8229_v62  ;;  %v8235_v32 = vpop.permute.xlu1 %3931  ;;  %v8241_v59 = vpop.permute.xlu0 %3923  ;;  %v8257_v7 = vpack.c.bf16 %v513_v58, %v512_v11 }
 0x1dc   : > { %9568 = vst [vmem:[#allocation23_spill] sm:$0xff] %v8231_v38  ;;  %9569 = vst [vmem:[#allocation24_spill] sm:$0xff] %v8233_v55 }
 0x1dd   : > { %9570 = vst [vmem:[#allocation25_spill] sm:$0xff] %v8253_v23  ;;  %9571 = vst [vmem:[#allocation26_spill] sm:$0xff] %v8257_v7 }
 0x1de   : > { %9573 = vst [vmem:[#allocation28_spill] sm:$0xff] %v8269_v33 }
 0x1df   : > { %6992 = vmatmul.mubr.msk.bf16.vlgmr.msra.gmra.mrb[16].mxu0 %vm538_vm0, %v2396_v37  ;;  %6998 = vmatmul.mubr.msk.bf16.vlgmr.msra.gmra.mrb[16].mxu1 %vm538_vm0, %v2397_v29  ;;  %v8247_v10 = vpop.permute.xlu1 %3939  ;;  %v8255_v4 = vpop.permute.xlu0 %3935 }
 0x1e0   : > { %7180 = vmatpush3.bf16.msra.mxu1 %v2867_v57  ;;  %7002 = vmatpush3.bf16.msra.mxu0 %v2867_v57 }
 0x1e1   : > { %7003 = vmatprep.mubr.msk.bf16.mxu0 %vm2816_vm5, %v2798_v14  ;;  %7023 = vmatprep.mubr.msk.bf16.mxu1 %vm2816_vm5, %v8157_v16 }
 0x1e2   : > { %7035 = vmatprep.subr.bf16.mxu1 %v9513_v13  ;;  %7083 = vmatprep.subr.bf16.mxu0 %v9513_v13 }
 0x1e3   : > { %v8259_v21 = vpop.permute.xlu1 %3943  ;;  %v1805_v12 = vpop.permute.xlu0 %1804 }
 0x1e4   : > { %9572 = vst [vmem:[#allocation27_spill] sm:$0xff] %v8259_v21 }
 0x1e7   : > { %7004 = vmatmul.mubr.msk.bf16.vlgmr.msra.gmra.mrb[20].mxu0 %vm2816_vm5, %v8174_v25  ;;  %7024 = vmatmul.mubr.msk.bf16.vlgmr.msra.gmra.mrb[20].mxu1 %vm2816_vm5, %v8176_v26  ;;  %v8267_v6 = vpop.permute.xlu1 %3947 }
 0x1e8   : > { %7007 = vmatprep.mubr.msk.bf16.mxu0 %vm2816_vm5, %v8178_v27  ;;  %7027 = vmatprep.mubr.msk.bf16.mxu1 %vm2816_vm5, %v8180_v40 }
 0x1e9   : > { %7084 = vmatpush3.bf16.msra.mxu0 %v2798_v14  ;;  %v1813_v14 = vpop.permute.xlu0 %1812 }
 0x1ea   : > { %7095 = vmatprep.subr.bf16.mxu0 %v9513_v13  ;;  %v1982_v31 = vcombine.low %v7762_v50, %v1813_v14  ;;  %v1983_v19 = vcombine.high %v7762_v50, %v1813_v14 }
 0x1eb   : > { %v1807_v37 = vpop.permute.xlu1 %1806 }
 0x1ec   : > { %v1990_v39 = vrot.slane %v1982_v31, %v7756_v44  ;;  %v1997_v9 = vrot.slane %v1983_v19, %v7756_v44 }
 0x1ed   : > { %v1819_v57 = vpop.permute.xlu0 %1818 }
 0x1ee   : > { %v1998_v8 = vcombine.low %v1807_v37, %v1819_v57  ;;  %v1999_v20 = vcombine.high %v1807_v37, %v1819_v57 }
 0x1ef   : > { %7008 = vmatmul.mubr.msk.bf16.gmra.mrb[24].mxu0 %vm2816_vm5, %v8201_v35  ;;  %7028 = vmatmul.mubr.msk.bf16.gmra.mrb[24].mxu1 %vm2816_vm5, %v8203_v36  ;;  %v1811_v29 = vpop.permute.xlu1 %1810 }
 0x1f0   : > { %7011 = vmatprep.mubr.msk.bf16.mxu0 %vm2816_vm5, %v8205_v15  ;;  %7031 = vmatprep.mubr.msk.bf16.mxu1 %vm2816_vm5, %v8207_v0  ;;  %v1846_v28 = vcombine.low %v7754_v43, %v1811_v29  ;;  %v1847_v54 = vcombine.high %v7754_v43, %v1811_v29  ;;  %v2006_v41 = vrot.slane %v1998_v8, %v7756_v44 }
 0x1f1   : > { %v2013_v42 = vrot.slane %v1999_v20, %v7756_v44 }
 0x1f2   : > { %v1854_v53 = vrot.slane %v1846_v28, %v7756_v44  ;;  %v1861_v61 = vrot.slane %v1847_v54, %v7756_v44  ;;  %v2046_v1 = vcombine.low %v1990_v39, %v2006_v41  ;;  %v2047_v47 = vcombine.high %v1990_v39, %v2006_v41 }
 0x1f3   : > { %v1817_v56 = vpop.permute.xlu1 %1816  ;;  %v2062_v48 = vcombine.low %v1997_v9, %v2013_v42  ;;  %v2063_v3 = vcombine.high %v1997_v9, %v2013_v42 }
 0x1f4   : > { %v1862_v22 = vcombine.low %v1805_v12, %v1817_v56  ;;  %v1863_v18 = vcombine.high %v1805_v12, %v1817_v56  ;;  %v2054_v58 = vrot.slane %v2046_v1, %v7760_v49  ;;  %v2061_v12 = vrot.slane %v2047_v47, %v7760_v49 }
 0x1f5   : > { %v2070_v30 = vrot.slane %v2062_v48, %v7760_v49  ;;  %v2077_v24 = vrot.slane %v2063_v3, %v7760_v49 }
 0x1f6   : > { %v1870_v34 = vrot.slane %v1862_v22, %v7756_v44  ;;  %v1877_v46 = vrot.slane %v1863_v18, %v7756_v44  ;;  %v6752_v31 = vcombine.low %v2054_v58, %v2061_v12  ;;  %v6754_v19 = vcombine.high %v2054_v58, %v2061_v12 }
 0x1f7   : > { %7012 = vmatmul.mubr.msk.bf16.gmra.mrb[28].mxu0 %vm2816_vm5, %v8229_v62  ;;  %7032 = vmatmul.mubr.msk.bf16.gmra.mrb[28].mxu1 %vm2816_vm5, %v8231_v38  ;;  %v6756_v8 = vcombine.low %v2070_v30, %v2077_v24  ;;  %v6758_v20 = vcombine.high %v2070_v30, %v2077_v24 }
 0x1f8   : > { %7015 = vmatprep.mubr.msk.bf16.mxu0 %vm2816_vm5, %v8233_v55  ;;  %7037 = vmatprep.mubr.msk.bf16.mxu1 %vm7468_vm1, %v9513_v13  ;;  %v1910_v17 = vcombine.low %v1854_v53, %v1870_v34  ;;  %v1911_v60 = vcombine.high %v1854_v53, %v1870_v34  ;;  %v1926_v51 = vcombine.low %v1861_v61, %v1877_v46 }
 0x1f9   : > { %v1927_v11 = vcombine.high %v1861_v61, %v1877_v46  ;;  %v2262_v18 = vrot.slane %v6752_v31, %v7756_v44  ;;  %v2278_v39 = vrot.slane %v6754_v19, %v7756_v44  ;;  %v2294_v9 = vrot.slane %v6756_v8, %v7756_v44 }
 0x1fa   : > { %v1918_v14 = vrot.slane %v1910_v17, %v7760_v49  ;;  %v1925_v37 = vrot.slane %v1911_v60, %v7760_v49  ;;  %v1934_v29 = vrot.slane %v1926_v51, %v7760_v49  ;;  %v2310_v41 = vrot.slane %v6758_v20, %v7756_v44 }
 0x1fb   : > { %v1941_v57 = vrot.slane %v1927_v11, %v7760_v49  ;;  %v2318_v47 = vcombine.low %v2262_v18, %v2278_v39 }
 0x1fc   : > { %v6744_v28 = vcombine.low %v1918_v14, %v1925_v37  ;;  %v6746_v54 = vcombine.high %v1918_v14, %v1925_v37  ;;  %v2350_v48 = vcombine.low %v2294_v9, %v2310_v41  ;;  %v2319_v14 = vcombine.high %v2262_v18, %v2278_v39 }
 0x1fd   : > { %v6748_v56 = vcombine.low %v1934_v29, %v1941_v57  ;;  %v6750_v22 = vcombine.high %v1934_v29, %v1941_v57  ;;  %v2326_v60 = vrot.slane %v2318_v47, %v7760_v49  ;;  %v2351_v37 = vcombine.high %v2294_v9, %v2310_v41 }
 0x1fe   : > { %v2126_v42 = vrot.slane %v6744_v28, %v7756_v44  ;;  %v2142_v53 = vrot.slane %v6746_v54, %v7756_v44  ;;  %v2358_v51 = vrot.slane %v2350_v48, %v7760_v49  ;;  %v2333_v31 = vrot.slane %v2319_v14, %v7760_v49 }
 0x1ff   : > { %7016 = vmatmul.mubr.msk.bf16.gmra.mrb[32].mxu0 %vm2816_vm5, %v8253_v23  ;;  %v2158_v61 = vrot.slane %v6748_v56, %v7756_v44  ;;  %v2174_v34 = vrot.slane %v6750_v22, %v7756_v44  ;;  %v2365_v19 = vrot.slane %v2351_v37, %v7760_v49 }
 0x200   : > { %7019 = vmatprep.mubr.msk.bf16.mxu0 %vm2816_vm5, %v8257_v7  ;;  %v2182_v46 = vcombine.low %v2126_v42, %v2142_v53  ;;  %v2382_v58 = vcombine.low %v2326_v60, %v2358_v51  ;;  %v2183_v30 = vcombine.high %v2126_v42, %v2142_v53  ;;  %v2383_v20 = vcombine.high %v2326_v60, %v2358_v51 }
 0x201   : > { %v2214_v1 = vcombine.low %v2158_v61, %v2174_v34  ;;  %v2215_v24 = vcombine.high %v2158_v61, %v2174_v34  ;;  %v2384_v54 = vcombine.low %v2333_v31, %v2365_v19  ;;  %v2385_v22 = vcombine.high %v2333_v31, %v2365_v19 }
 0x202   : > { %v2190_v3 = vrot.slane %v2182_v46, %v7760_v49  ;;  %v2197_v29 = vrot.slane %v2183_v30, %v7760_v49 }
 0x203   : > { %v2222_v17 = vrot.slane %v2214_v1, %v7760_v49  ;;  %v2229_v57 = vrot.slane %v2215_v24, %v7760_v49  ;;  %v8332_v24 = vstv %s3818_s21  ;;  %s9589_s21 = smov 48  }
 0x205   : > { %v2246_v11 = vcombine.low %v2190_v3, %v2222_v17  ;;  %v2247_v8 = vcombine.high %v2190_v3, %v2222_v17  ;;  %v2248_v28 = vcombine.low %v2197_v29, %v2229_v57  ;;  %v2249_v56 = vcombine.high %v2197_v29, %v2229_v57 }
 0x207   : > { %7020 = vmatmul.mubr.msk.bf16.gmra.mrb[36].mxu0 %vm2816_vm5, %v8269_v33  ;;  %v4253_v12 = vpack.c.bf16 %v2382_v58, %v2246_v11  ;;  %v8312_v46 = vpack.c.bf16 %v2383_v20, %v2247_v8  ;;  %v8314_v42 = vpack.c.bf16 %v2384_v54, %v2248_v28  ;;  %v8316_v18 = vpack.c.bf16 %v2385_v22, %v2249_v56 }
 0x208   : > { %7085 = vmatprep.mubr.msk.bf16.mxu0 %vm7468_vm1, %v9513_v13 }
 0x209   : > { %7036 = vmatpush3.bf16.msra.mxu1 %v4253_v12  ;;  %9574 = vst [vmem:[#allocation29_spill] sm:$0xff] %v8312_v46  ;;  %9575 = vst [vmem:[#allocation30_spill] sm:$0xff] %v8314_v42 }
 0x20a   : > { %7041 = vmatprep.subr.bf16.mxu1 %v9513_v13  ;;  %9576 = vst [vmem:[#allocation31_spill] sm:$0xff] %v8316_v18 }
 0x289   : > { %v8318_v39 = vpop.f32.mrb[4].mxu0 }
 0x28a   : > { %v8320_v9 = vpop.f32.mrb[4].mxu1  ;;  %v6957_v41 = vpop.f32.mrb[5].mxu0 }
 0x28b   : > { %v6963_v53 = vpop.f32.mrb[5].mxu1  ;;  %v8322_v61 = vpop.f32.mrb[6].mxu0 }
 0x28c   : > { %v8324_v34 = vpop.f32.mrb[6].mxu1  ;;  %v6958_v1 = vpop.f32.mrb[7].mxu0  ;;  %v2783_v7 = vmul.f32 0.25, %v8322_v61 }
 0x28d   : > { %v6964_v47 = vpop.f32.mrb[7].mxu1  ;;  %v2785_v15 = vmul.f32 0.25, %v8324_v34 }
 0x28f   : > { %v8468_v45 = vmul.f32 %v8332_v24, %v2785_v15 }
 0x29f   : > { %v8326_v48 = vpop.f32.mrb[8].mxu0 }
 0x2a0   : > { %v8328_v3 = vpop.f32.mrb[8].mxu1  ;;  %v6969_v17 = vpop.f32.mrb[9].mxu0  ;;  %v2786_v46 = vmul.f32 0.25, %v8326_v48 }
 0x2a1   : > { %v6975_v60 = vpop.f32.mrb[9].mxu1  ;;  %v8330_v51 = vpop.f32.mrb[10].mxu0 }
 0x2a2   : > { %v2590_v11 = vpop.f32.mrb[10].mxu1  ;;  %v6970_v12 = vpop.f32.mrb[11].mxu0  ;;  %v2787_v43 = vmul.f32 0.25, %v8330_v51 }
 0x2a3   : > { %v2789_v58 = vmul.f32 0.25, %v2590_v11  ;;  %v6976_v30 = vpop.f32.mrb[11].mxu1 }
 0x2a5   : > { %v8335_v14 = vmul.f32 %v8332_v24, %v2789_v58 }
 0x2aa   : > { %v8337_v37 = vpop.f32.mrb[12].mxu0  ;;  %v8339_v29 = vpop.f32.mrb[12].mxu1 }
 0x2ab   : > { %v6981_v57 = vpop.f32.mrb[13].mxu0  ;;  %v6987_v31 = vpop.f32.mrb[13].mxu1  ;;  %v2792_v48 = vmul.f32 0.25, %v8339_v29 }
 0x2ac   : > { %v2637_v19 = vpop.f32.mrb[14].mxu0  ;;  %v2684_v8 = vpop.f32.mrb[14].mxu1 }
 0x2ad   : > { %v2791_v20 = vmul.f32 0.25, %v2637_v19  ;;  %v2793_v28 = vmul.f32 0.25, %v2684_v8  ;;  %v6982_v54 = vpop.f32.mrb[15].mxu0  ;;  %v6988_v56 = vpop.f32.mrb[15].mxu1 }
 0x2af   : > { %v8342_v22 = vmul.f32 %v8332_v24, %v2791_v20  ;;  %v8345_v41 = vmul.f32 %v8332_v24, %v2793_v28 }
 0x2b2   : > { %v8347_v53 = vpop.f32.mrb[16].mxu0  ;;  %v8349_v1 = vpop.f32.mrb[16].mxu1 }
 0x2b3   : > { %v6993_v47 = vpop.f32.mrb[17].mxu0  ;;  %v6999_v17 = vpop.f32.mrb[17].mxu1 }
 0x2b4   : > { %v2731_v60 = vpop.f32.mrb[18].mxu0  ;;  %v2778_v11 = vpop.f32.mrb[18].mxu1 }
 0x2b5   : > { %v2795_v58 = vmul.f32 0.25, %v2731_v60  ;;  %v2797_v12 = vmul.f32 0.25, %v2778_v11  ;;  %v6994_v30 = vpop.f32.mrb[19].mxu0  ;;  %v7000_v57 = vpop.f32.mrb[19].mxu1 }
 0x2b7   : > { %v8352_v31 = vmul.f32 %v8332_v24, %v2795_v58  ;;  %v8355_v19 = vmul.f32 %v8332_v24, %v2797_v12 }
 0x2b9   : > { %9577 = vst [vmem:[#allocation32_spill] sm:$0xff] %v8352_v31  ;;  %9578 = vst [vmem:[#allocation33_spill] sm:$0xff] %v8355_v19 }
 0x2ba   : > { %v7005_v8 = vpop.f32.mrb[20].mxu0  ;;  %v7025_v20 = vpop.f32.mrb[20].mxu1 }
 0x2bb   : > { %3382 = vxpose.xlu0.b32.start [1/2] (short) (narrow) %v7025_v20, 8  ;;  %v2983_v28 = vpop.f32.mrb[21].mxu1  ;;  %3062 = vxpose.xlu1.b32.start [1/2] (short) (narrow) %v7005_v8, 8  ;;  %v2903_v54 = vpop.f32.mrb[21].mxu0 }
 0x2bc   : > { %v7026_v56 = vpop.f32.mrb[22].mxu1  ;;  %v7006_v47 = vpop.f32.mrb[22].mxu0 }
 0x2bd   : > { %v2986_v17 = vpop.f32.mrb[23].mxu1  ;;  %v2906_v5 = vpop.f32.mrb[23].mxu0 }
 0x2bf   : > { %3383 = vxpose.xlu0.b32.end [2/2] (short) (narrow) %v7026_v56, 8  ;;  %3063 = vxpose.xlu1.b32.end [2/2] (short) (narrow) %v7006_v47, 8 }
 0x2c2   : > { %v7009_v60 = vpop.f32.mrb[24].mxu0  ;;  %v7029_v11 = vpop.f32.mrb[24].mxu1 }
 0x2c3   : > { %3030 = vxpose.xlu0.b32.start [1/2] (short) (narrow) %v2903_v54, 8  ;;  %3350 = vxpose.xlu1.b32.start [1/2] (short) (narrow) %v2983_v28, 8  ;;  %v2919_v58 = vpop.f32.mrb[25].mxu0  ;;  %v2999_v30 = vpop.f32.mrb[25].mxu1 }
 0x2c4   : > { %v7010_v12 = vpop.f32.mrb[26].mxu0  ;;  %v7030_v57 = vpop.f32.mrb[26].mxu1 }
 0x2c5   : > { %v2922_v13 = vpop.f32.mrb[27].mxu0  ;;  %v3002_v38 = vpop.f32.mrb[27].mxu1 }
 0x2c7   : > { %3351 = vxpose.xlu1.b32.end [2/2] (short) (narrow) %v2986_v17, 8  ;;  %3031 = vxpose.xlu0.b32.end [2/2] (short) (narrow) %v2906_v5, 8 }
 0x2ca   : > { %v7013_v8 = vpop.f32.mrb[28].mxu0  ;;  %v7033_v20 = vpop.f32.mrb[28].mxu1 }
 0x2cb   : > { %3414 = vxpose.xlu1.b32.start [1/2] (short) (narrow) %v2999_v30, 8  ;;  %3126 = vxpose.xlu0.b32.start [1/2] (short) (narrow) %v7009_v60, 8  ;;  %v2935_v0 = vpop.f32.mrb[29].mxu0  ;;  %v3015_v36 = vpop.f32.mrb[29].mxu1 }
 0x2cc   : > { %v7014_v56 = vpop.f32.mrb[30].mxu0  ;;  %v7034_v47 = vpop.f32.mrb[30].mxu1 }
 0x2cd   : > { %v2938_v40 = vpop.f32.mrb[31].mxu0  ;;  %v3018_v26 = vpop.f32.mrb[31].mxu1 }
 0x2cf   : > { %3415 = vxpose.xlu1.b32.end [2/2] (short) (narrow) %v3002_v38, 8  ;;  %3127 = vxpose.xlu0.b32.end [2/2] (short) (narrow) %v7010_v12, 8 }
 0x2d2   : > { %v7017_v28 = vpop.f32.mrb[32].mxu0 }
 0x2d3   : > { %3446 = vxpose.xlu0.b32.start [1/2] (short) (narrow) %v7029_v11, 8  ;;  %3158 = vxpose.xlu1.b32.start [1/2] (short) (narrow) %v2935_v0, 8  ;;  %v2951_v54 = vpop.f32.mrb[33].mxu0 }
 0x2d4   : > { %v7018_v16 = vpop.f32.mrb[34].mxu0 }
 0x2d5   : > { %v2954_v33 = vpop.f32.mrb[35].mxu0 }
 0x2d7   : > { %3447 = vxpose.xlu0.b32.end [2/2] (short) (narrow) %v7030_v57, 8  ;;  %3159 = vxpose.xlu1.b32.end [2/2] (short) (narrow) %v2938_v40, 8  ;;  %v8357_v40 = vpop.permute.xlu1 %4225 }
 0x2d8   : > { %9579 = vst [vmem:[#allocation34_spill] sm:$0xff] %v8357_v40 }
 0x2da   : > { %v7021_v5 = vpop.f32.mrb[36].mxu0 }
 0x2db   : > { %3094 = vxpose.xlu0.b32.start [1/2] (short) (narrow) %v2919_v58, 8  ;;  %3478 = vxpose.xlu1.b32.start [1/2] (short) (narrow) %v3015_v36, 8  ;;  %v2967_v17 = vpop.f32.mrb[37].mxu0 }
 0x2dc   : > { %v7022_v60 = vpop.f32.mrb[38].mxu0 }
 0x2dd   : > { %v2970_v30 = vpop.f32.mrb[39].mxu0 }
 0x2df   : > { %3095 = vxpose.xlu0.b32.end [2/2] (short) (narrow) %v2922_v13, 8  ;;  %3479 = vxpose.xlu1.b32.end [2/2] (short) (narrow) %v3018_v26, 8  ;;  %v8361_v13 = vpop.permute.xlu0 %4222 }
 0x2e0   : > { %9580 = vst [vmem:[#allocation35_spill] sm:$0xff] %v8361_v13  ;;  %v2788_v13 = vmul.f32 0.25, %v8328_v3 }
 0x2e3   : > { %3190 = vxpose.xlu0.b32.start [1/2] (short) (narrow) %v7013_v8, 8  ;;  %3222 = vxpose.xlu1.b32.start [1/2] (short) (narrow) %v2951_v54, 8  ;;  %v3814_v8 = vld [vmem:[%s484_s7] sm:$0xff] }
 0x2e4   : > { %v8389_v54 = vld [vmem:[%s492_s4] ss:$0 sm:$0xff] }
 0x2e5   : > { %9581 = vst [vmem:[#allocation36_spill] sm:$0xff] %v8389_v54 }
 0x2e7   : > { %3191 = vxpose.xlu0.b32.end [2/2] (short) (narrow) %v7014_v56, 8  ;;  %3223 = vxpose.xlu1.b32.end [2/2] (short) (narrow) %v2954_v33, 8 }
 0x2eb   : > { %3510 = vxpose.xlu0.b32.start [1/2] (short) (narrow) %v7033_v20, 8  ;;  %3286 = vxpose.xlu1.b32.start [1/2] (short) (narrow) %v2967_v17, 8  ;;  %v3815_v20 = vld [vmem:[%s484_s7 + $0x8] sm:$0xff]  ;;  %v8395_v17 = vmul.f32 %v8389_v54, %v8195_v52  ;;  %v2790_v54 = vmul.f32 0.25, %v8337_v37 }
 0x2ed   : > { %vm4003_vm6 = vcmp.gt.f32.partialorder %v8395_v17, 0.5 }
 0x2ef   : > { %3511 = vxpose.xlu0.b32.end [2/2] (short) (narrow) %v7034_v47, 8  ;;  %3287 = vxpose.xlu1.b32.end [2/2] (short) (narrow) %v2970_v30, 8  ;;  %v8385_v47 = vmul.f32 %v3814_v8, %v3814_v8 }
 0x2f1   : > { %v8400_v30 = vmul.f32 %v8223_v63, %v8385_v47  ;;  %v8410_v23 = vmul.f32 %v8235_v32, %v8385_v47  ;;  %v8430_v61 = vmul.f32 %v8241_v59, %v8385_v47  ;;  %v8438_v55 = vmul.f32 %v8255_v4, %v8385_v47 }
 0x2f3   : > { %3254 = vxpose.xlu0.b32.start [1/2] (short) (narrow) %v7017_v28, 8  ;;  %v8387_v28 = vmul.f32 %v3815_v20, %v3815_v20  ;;  %v2784_v20 = vmul.f32 0.25, %v8320_v9  ;;  %v8426_v9 = vmul.f32 %v8247_v10, %v8385_v47 }
 0x2f5   : > { %v8404_v8 = vmul.f32 %v8223_v63, %v8387_v28  ;;  %v8414_v52 = vmul.f32 %v8235_v32, %v8387_v28  ;;  %v8422_v63 = vmul.f32 %v8227_v2, %v8387_v28  ;;  %v8434_v32 = vmul.f32 %v8241_v59, %v8387_v28 }
 0x2f6   : > { %v8450_v25 = vmul.f32 %v8332_v24, %v2784_v20  ;;  %v8453_v59 = vmul.f32 %v8332_v24, %v2783_v7 }
 0x2f7   : > { %3255 = vxpose.xlu0.b32.end [2/2] (short) (narrow) %v7018_v16, 8 }
 0x2fb   : > { %3318 = vxpose.xlu0.b32.start [1/2] (short) (narrow) %v7021_v5, 8 }
 0x2ff   : > { %3319 = vxpose.xlu0.b32.end [2/2] (short) (narrow) %v7022_v60, 8  ;;  %v2782_v60 = vmul.f32 0.25, %v8318_v39  ;;  %v8418_v39 = vmul.f32 %v8227_v2, %v8385_v47  ;;  %v8442_v2 = vmul.f32 %v8259_v21, %v8385_v47  ;;  %v8518_v21 = vstv %s8473_s20 }
 0x301   : > { %v8445_v62 = vmul.f32 %v8332_v24, %v2782_v60 }
 0x33b   : > { %v8359_v36 = vpop.trf.xlu1  ;;  %v8363_v26 = vpop.trf.xlu0 }
 0x343   : > { %v8365_v0 = vpop.trf.xlu1  ;;  %v3046_v38 = vpop.trf.xlu0 }
 0x34b   : > { %v8367_v33 = vpop.trf.xlu1  ;;  %v3142_v11 = vpop.trf.xlu0 }
 0x34c   : > { %v3558_v35 = vcombine.low %v8359_v36, %v3142_v11  ;;  %v3559_v60 = vcombine.high %v8359_v36, %v3142_v11  ;;  %v8495_v11 = vmul.f32 %v8332_v24, %v2790_v54 }
 0x34e   : > { %v3566_v3 = vrot.slane %v3558_v35, %v7756_v44  ;;  %v3573_v35 = vrot.slane %v3559_v60, %v7756_v44 }
 0x353   : > { %v8369_v58 = vpop.trf.xlu1  ;;  %v8371_v16 = vpop.trf.xlu0 }
 0x35b   : > { %v8373_v12 = vpop.trf.xlu1  ;;  %v3110_v56 = vpop.trf.xlu0 }
 0x35c   : > { %v3711_v57 = vcombine.high %v8367_v33, %v8373_v12  ;;  %v3542_v18 = vcombine.low %v3046_v38, %v3110_v56  ;;  %v3543_v40 = vcombine.high %v3046_v38, %v3110_v56  ;;  %v3710_v37 = vcombine.low %v8367_v33, %v8373_v12 }
 0x35d   : > { %v8483_v38 = vmul.f32 %v8332_v24, %v2786_v46  ;;  %v8492_v33 = vmul.f32 %v8332_v24, %v2787_v43  ;;  %v8499_v46 = vmul.f32 %v8332_v24, %v2792_v48  ;;  %v8502_v12 = vmul.f32 0.25, %v8347_v53 }
 0x35e   : > { %v8462_v20 = vrot.slane %v3711_v57, %v7756_v44  ;;  %v3550_v51 = vrot.slane %v3542_v18, %v7756_v44  ;;  %v8489_v18 = vmul.f32 %v8332_v24, %v2788_v13  ;;  %v3718_v54 = vrot.slane %v3710_v37, %v7756_v44 }
 0x360   : > { %v3606_v43 = vcombine.low %v3550_v51, %v3566_v3 }
 0x363   : > { %v8391_v5 = vpop.trf.xlu0  ;;  %v3238_v34 = vpop.trf.xlu1 }
 0x364   : > { %v3574_v29 = vcombine.low %v8369_v58, %v3238_v34 }
 0x366   : > { %v3582_v53 = vrot.slane %v3574_v29, %v7756_v44 }
 0x36b   : > { %v3526_v27 = vpop.trf.xlu0  ;;  %v3302_v57 = vpop.trf.xlu1 }
 0x36c   : > { %v3727_v42 = vcombine.high %v8371_v16, %v3526_v27  ;;  %v3726_v36 = vcombine.low %v8371_v16, %v3526_v27  ;;  %v3557_v27 = vrot.slane %v3543_v40, %v7756_v44  ;;  %v3575_v16 = vcombine.high %v8369_v58, %v3238_v34 }
 0x36d   : > { %v8505_v40 = vmul.f32 0.25, %v8349_v1  ;;  %v3607_v34 = vcombine.high %v3550_v51, %v3566_v3  ;;  %v3678_v48 = vcombine.low %v3302_v57, %v8365_v0  ;;  %v3679_v19 = vcombine.high %v3302_v57, %v8365_v0 }
 0x36e   : > { %v8465_v7 = vrot.slane %v3727_v42, %v7756_v44  ;;  %v3734_v13 = vrot.slane %v3726_v36, %v7756_v44  ;;  %v3589_v1 = vrot.slane %v3575_v16, %v7756_v44 }
 0x36f   : > { %v3621_v29 = vrot.slane %v3607_v34, %v7760_v49 }
 0x370   : > { %v3790_v42 = vcombine.low %v8462_v20, %v8465_v7  ;;  %v3791_v15 = vcombine.high %v8462_v20, %v8465_v7  ;;  %v3622_v20 = vcombine.low %v3557_v27, %v3573_v35  ;;  %v3623_v7 = vcombine.high %v3557_v27, %v3573_v35 }
 0x371   : > { %v3774_v37 = vcombine.low %v3718_v54, %v3734_v13  ;;  %v3775_v31 = vcombine.high %v3718_v54, %v3734_v13  ;;  %v3614_v27 = vrot.slane %v3606_v43, %v7760_v49  ;;  %v3693_v54 = vrot.slane %v3679_v19, %v7756_v44 }
 0x372   : > { %v3630_v16 = vrot.slane %v3622_v20, %v7760_v49 }
 0x373   : > { %v3270_v56 = vpop.trf.xlu0  ;;  %v8535_v43 = vrot.slane %v3775_v31, %v7760_v49 }
 0x374   : > { %v3590_v60 = vcombine.low %v8391_v5, %v3270_v56  ;;  %v3591_v58 = vcombine.high %v8391_v5, %v3270_v56  ;;  %v8524_v56 = vrot.slane %v3623_v7, %v7760_v49 }
 0x376   : > { %v3598_v36 = vrot.slane %v3590_v60, %v7756_v44  ;;  %v3605_v50 = vrot.slane %v3591_v58, %v7756_v44  ;;  %v3686_v60 = vrot.slane %v3678_v48, %v7756_v44  ;;  %v8541_v48 = vrot.slane %v3790_v42, %v7760_v49 }
 0x378   : > { %v3638_v5 = vcombine.low %v3582_v53, %v3598_v36  ;;  %v3639_v3 = vcombine.high %v3582_v53, %v3598_v36  ;;  %v3654_v51 = vcombine.low %v3589_v1, %v3605_v50  ;;  %v3655_v35 = vcombine.high %v3589_v1, %v3605_v50 }
 0x379   : > { %v8532_v50 = vrot.slane %v3774_v37, %v7760_v49  ;;  %v8544_v36 = vrot.slane %v3791_v15, %v7760_v49 }
 0x37a   : > { %v3646_v0 = vrot.slane %v3638_v5, %v7760_v49  ;;  %v3653_v57 = vrot.slane %v3639_v3, %v7760_v49  ;;  %v3662_v13 = vrot.slane %v3654_v51, %v7760_v49  ;;  %v8538_v58 = vrot.slane %v3655_v35, %v7760_v49 }
 0x37b   : > { %v3334_v34 = vpop.trf.xlu0 }
 0x37c   : > { %v3670_v20 = vcombine.low %v3614_v27, %v3646_v0  ;;  %v3671_v7 = vcombine.high %v3614_v27, %v3646_v0  ;;  %v3672_v53 = vcombine.low %v3621_v29, %v3653_v57  ;;  %v3673_v1 = vcombine.high %v3621_v29, %v3653_v57 }
 0x37d   : > { %v3674_v19 = vcombine.low %v3630_v16, %v3662_v13  ;;  %v3675_v37 = vcombine.high %v3630_v16, %v3662_v13  ;;  %v3694_v5 = vcombine.low %v3334_v34, %v8363_v26  ;;  %v3695_v31 = vcombine.high %v3334_v34, %v8363_v26 }
 0x37e   : > { %v3840_v3 = vmul.f32 %v8518_v21, %v3671_v7  ;;  %v3838_v51 = vmul.f32 %v8518_v21, %v3670_v20  ;;  %v3676_v35 = vcombine.low %v8524_v56, %v8538_v58  ;;  %v3677_v42 = vcombine.high %v8524_v56, %v8538_v58 }
 0x37f   : > { %v3842_v15 = vmul.f32 %v8518_v21, %v3672_v53  ;;  %v3844_v27 = vmul.f32 %v8518_v21, %v3673_v1  ;;  %v3702_v29 = vrot.slane %v3694_v5, %v7756_v44  ;;  %v3709_v26 = vrot.slane %v3695_v31, %v7756_v44 }
 0x380   : > { %v3856_v16 = vadd.f32 %v3840_v3, %v8450_v25  ;;  %v3854_v0 = vadd.f32 %v3838_v51, %v8445_v62  ;;  %v3846_v34 = vmul.f32 %v8518_v21, %v3674_v19  ;;  %v3848_v56 = vmul.f32 %v8518_v21, %v3675_v37 }
 0x381   : > { %v3858_v57 = vadd.f32 %v3842_v15, %v8483_v38  ;;  %v3860_v13 = vadd.f32 %v3844_v27, %v8489_v18  ;;  %v3742_v58 = vcombine.low %v3686_v60, %v3702_v29  ;;  %v3743_v20 = vcombine.high %v3686_v60, %v3702_v29 }
 0x382   : > { %v3758_v7 = vcombine.low %v3693_v54, %v3709_v26  ;;  %v3759_v53 = vcombine.high %v3693_v54, %v3709_v26  ;;  %v3968_v1 = vadd.f32 %v8430_v61, %v3856_v16  ;;  %v3966_v5 = vadd.f32 %v8418_v39, %v3854_v0 }
 0x383   : > { %v3970_v25 = vadd.f32 %v8400_v30, %v3858_v57  ;;  %v3972_v62 = vadd.f32 %v8410_v23, %v3860_v13  ;;  %v3750_v38 = vrot.slane %v3742_v58, %v7760_v49  ;;  %v3757_v18 = vrot.slane %v3743_v20, %v7760_v49 }
 0x384   : > { %v3766_v19 = vrot.slane %v3758_v7, %v7760_v49  ;;  %v8573_v37 = vrot.slane %v3759_v53, %v7760_v49  ;;  %v6796_v60 = vadd.f32 -100000.0, %v3968_v1  ;;  %v6794_v31 = vadd.f32 -100000.0, %v3966_v5 }
 0x385   : > { %v6798_v54 = vadd.f32 -100000.0, %v3970_v25  ;;  %v3862_v61 = vadd.f32 %v3846_v34, %v8495_v11  ;;  %v3806_v39 = vcombine.low %v3750_v38, %v8532_v50  ;;  %v3807_v30 = vcombine.high %v3750_v38, %v8532_v50 }
 0x386   : > { %v3808_v23 = vcombine.low %v3757_v18, %v8535_v43  ;;  %v3864_v3 = vadd.f32 %v3848_v56, %v8499_v46  ;;  %v3810_v51 = vcombine.low %v3766_v19, %v8541_v48  ;;  %v3811_v15 = vcombine.high %v3766_v19, %v8541_v48 }
 0x387   : > { %v3812_v27 = vcombine.low %v8573_v37, %v8544_v36  ;;  %v3813_v29 = vcombine.high %v8573_v37, %v8544_v36  ;;  %v3833_v11 = vmul.f32 %v8332_v24, %v8502_v12  ;;  %v3809_v26 = vcombine.high %v3757_v18, %v8535_v43 }
 0x388   : > { %v8591_v50 = vsel %vm4003_vm6, %v3968_v1, %v6796_v60  ;;  %v8595_v46 = vsel %vm4003_vm6, %v3966_v5, %v6794_v31  ;;  %v3835_v48 = vmul.f32 %v8332_v24, %v8505_v40  ;;  %v8605_v12 = vsel %vm4003_vm6, %v3970_v25, %v6798_v54 }
 0x389   : > { %v4047_v16 = vsel %vm538_vm0, %v8591_v50, -inf  ;;  %v4041_v36 = vsel %vm538_vm0, %v8595_v46, -inf  ;;  %v6800_v43 = vadd.f32 -100000.0, %v3972_v62  ;;  %v3974_v0 = vadd.f32 %v8438_v55, %v3862_v61 }
 0x38a   : > { %4048 = vmax.xlane.f32.xlu0 %v4047_v16  ;;  %4042 = vmax.xlane.f32.xlu1 %v4041_v36  ;;  %v3976_v57 = vadd.f32 %v8426_v9, %v3864_v3  ;;  %v3850_v13 = vmul.f32 %v8518_v21, %v3676_v35  ;;  %v3852_v24 = vmul.f32 %v8518_v21, %v3677_v42  ;;  %v4053_v20 = vsel %vm538_vm0, %v8605_v12, -inf  ;;  %v9583_v3 = vld [vmem:[#allocation32_spill] sm:$0xff] }
 0x38b   : > { %v3839_v40 = vmul.f32 %v8518_v21, %v3806_v39  ;;  %v3841_v34 = vmul.f32 %v8518_v21, %v3807_v30  ;;  %v3843_v56 = vmul.f32 %v8518_v21, %v3808_v23  ;;  %v3964_v58 = vmul.f32 %v8267_v6, %v8385_v47 }
 0x38c   : > { %v3866_v7 = vadd.f32 %v3850_v13, %v3833_v11  ;;  %v3845_v55 = vmul.f32 %v8518_v21, %v3809_v26  ;;  %v3868_v9 = vadd.f32 %v3852_v24, %v3835_v48  ;;  %v8624_v1 = vsel %vm4003_vm6, %v3972_v62, %v6800_v43  ;;  %v9586_v48 = vld [vmem:[#allocation10_spill] sm:$0xff] }
 0x38d   : > { %v3855_v35 = vadd.f32 %v3839_v40, %v8453_v59  ;;  %v3857_v42 = vadd.f32 %v3841_v34, %v8468_v45  ;;  %v3859_v53 = vadd.f32 %v3843_v56, %v8492_v33  ;;  %v6802_v5 = vadd.f32 -100000.0, %v3974_v0 }
 0x38e   : > { %4054 = vmax.xlane.f32.xlu0 %v4053_v20  ;;  %v3978_v47 = vadd.f32 %v8442_v2, %v3866_v7  ;;  %v3861_v25 = vadd.f32 %v3845_v55, %v8335_v14  ;;  %v3980_v38 = vadd.f32 %v3964_v58, %v3868_v9  ;;  %v4059_v33 = vsel %vm538_vm0, %v8624_v1, -inf }
 0x38f   : > { %v3967_v18 = vadd.f32 %v8422_v63, %v3855_v35  ;;  %v3969_v19 = vadd.f32 %v8434_v32, %v3857_v42  ;;  %v3971_v59 = vadd.f32 %v8404_v8, %v3859_v53  ;;  %v6804_v37 = vadd.f32 -100000.0, %v3976_v57 }
 0x390   : > { %v3973_v45 = vadd.f32 %v8414_v52, %v3861_v25  ;;  %v3847_v62 = vmul.f32 %v8518_v21, %v3810_v51  ;;  %v3849_v60 = vmul.f32 %v8518_v21, %v3811_v15  ;;  %v8638_v14 = vsel %vm4003_vm6, %v3974_v0, %v6802_v5  ;;  %v9584_v15 = vld [vmem:[#allocation33_spill] sm:$0xff] }
 0x391   : > { %v3959_v63 = vmul.f32 %v8255_v4, %v8387_v28  ;;  %v3961_v52 = vmul.f32 %v8247_v10, %v8387_v28  ;;  %v4065_v32 = vsel %vm538_vm0, %v8638_v14, -inf  ;;  %v8649_v2 = vsel %vm4003_vm6, %v3976_v57, %v6804_v37  ;;  %v9590_v57 = vld [vmem:[#allocation9_spill] sm:$0xff] }
 0x392   : > { %4060 = vmax.xlane.f32.xlu0 %v4059_v33  ;;  %v3863_v8 = vadd.f32 %v3847_v62, %v8342_v22  ;;  %v6806_v54 = vadd.f32 -100000.0, %v3978_v47  ;;  %v3865_v61 = vadd.f32 %v3849_v60, %v8345_v41  ;;  %v3851_v39 = vmul.f32 %v8518_v21, %v3812_v27  ;;  %v9582_v22 = vld [vmem:[#allocation27_spill] sm:$0xff] }
 0x393   : > { %v3853_v4 = vmul.f32 %v8518_v21, %v3813_v29  ;;  %v3963_v30 = vmul.f32 %v9582_v22, %v8387_v28  ;;  %v3965_v10 = vmul.f32 %v8267_v6, %v8387_v28  ;;  %v4071_v26 = vsel %vm538_vm0, %v8649_v2, -inf  ;;  %v9587_v6 = vld [vmem:[#allocation21_spill] sm:$0xff]  ;;  %v9588_v28 = vld [vmem:[#allocation36_spill] sm:$0xff] }
 0x394   : > { %v3975_v31 = vadd.f32 %v3959_v63, %v3863_v8  ;;  %v3977_v23 = vadd.f32 %v3961_v52, %v3865_v61  ;;  %v3867_v51 = vadd.f32 %v3851_v39, %v9583_v3  ;;  %v8664_v41 = vsel %vm4003_vm6, %v3978_v47, %v6806_v54 }
 0x395   : > { %v3869_v11 = vadd.f32 %v3853_v4, %v9584_v15  ;;  %v6808_v21 = vadd.f32 -100000.0, %v3980_v38  ;;  %v4002_v16 = vmul.f32 %v9588_v28, %v9587_v6  ;;  %v4077_v36 = vsel %vm538_vm0, %v8664_v41, -inf }
 0x396   : > { %4066 = vmax.xlane.f32.xlu0 %v4065_v32  ;;  %v3979_v27 = vadd.f32 %v3963_v30, %v3867_v51  ;;  %v6795_v0 = vadd.f32 -100000.0, %v3967_v18  ;;  %v6797_v34 = vadd.f32 -100000.0, %v3969_v19  ;;  %v6799_v56 = vadd.f32 -100000.0, %v3971_v59 }
 0x397   : > { %v3981_v29 = vadd.f32 %v3965_v10, %v3869_v11  ;;  %v8674_v43 = vsel %vm4003_vm6, %v3980_v38, %v6808_v21  ;;  %vm4004_vm7 = vcmp.gt.f32.partialorder %v4002_v16, 0.5  ;;  %v6801_v7 = vadd.f32 -100000.0, %v3973_v45 }
 0x398   : > { %v4083_v13 = vsel %vm538_vm0, %v8674_v43, -inf  ;;  %v8681_v24 = vsel %vm4004_vm7, %v3967_v18, %v6795_v0  ;;  %v8688_v17 = vsel %vm4004_vm7, %v3969_v19, %v6797_v34  ;;  %v8695_v20 = vsel %vm4004_vm7, %v3971_v59, %v6799_v56 }
 0x399   : > { %v4044_v40 = vsel %vm538_vm0, %v8681_v24, -inf  ;;  %v4050_v58 = vsel %vm538_vm0, %v8688_v17, -inf  ;;  %v4056_v55 = vsel %vm538_vm0, %v8695_v20, -inf  ;;  %v8702_v9 = vsel %vm4004_vm7, %v3973_v45, %v6801_v7 }
 0x39a   : > { %4072 = vmax.xlane.f32.xlu0 %v4071_v26  ;;  %v6803_v35 = vadd.f32 -100000.0, %v3975_v31  ;;  %v4062_v42 = vsel %vm538_vm0, %v8702_v9, -inf  ;;  %v6805_v5 = vadd.f32 -100000.0, %v3977_v23  ;;  %v6807_v38 = vadd.f32 -100000.0, %v3979_v27 }
 0x39b   : > { %1824 = vrot.lane.b32.xlu1 %v9586_v48, %s9585_s24  ;;  %v6809_v59 = vadd.f32 -100000.0, %v3981_v29 }
 0x39c   : > { %v8707_v53 = vsel %vm4004_vm7, %v3975_v31, %v6803_v35  ;;  %v8712_v25 = vsel %vm4004_vm7, %v3977_v23, %v6805_v5  ;;  %v8717_v19 = vsel %vm4004_vm7, %v3979_v27, %v6807_v38 }
 0x39d   : > { %v4068_v47 = vsel %vm538_vm0, %v8707_v53, -inf  ;;  %v4074_v18 = vsel %vm538_vm0, %v8712_v25, -inf  ;;  %v4080_v45 = vsel %vm538_vm0, %v8717_v19, -inf  ;;  %v8722_v33 = vsel %vm4004_vm7, %v3981_v29, %v6809_v59 }
 0x39e   : > { %4078 = vmax.xlane.f32.xlu0 %v4077_v36  ;;  %v4086_v37 = vsel %vm538_vm0, %v8722_v33, -inf }
 0x39f   : > { %1828 = vrot.lane.b32.xlu1 %v9590_v57, %s9589_s21 }
 0x3a2   : > { %4084 = vmax.xlane.f32.xlu0 %v4083_v13 }
 0x3a6   : > { %4045 = vmax.xlane.f32.xlu0 %v4044_v40 }
 0x3bc   : > { %1822 = vrot.lane.b32.xlu0 %v9590_v57, %s9585_s24 }
 0x3c0   : > { %1830 = vrot.lane.b32.xlu0 %v9586_v48, %s9589_s21 }
 0x3c3   : > { %4051 = vmax.xlane.f32.xlu1 %v4050_v58 }
 0x3c4   : > { %1836 = vrot.lane.b32.xlu0 %v9586_v48, %s9591_s26 }
 0x3c7   : > { %4057 = vmax.xlane.f32.xlu1 %v4056_v55 }
 0x3cb   : > { %4063 = vmax.xlane.f32.xlu1 %v4062_v42 }
 0x3cf   : > { %4069 = vmax.xlane.f32.xlu1 %v4068_v47 }
 0x3d3   : > { %4075 = vmax.xlane.f32.xlu1 %v4074_v18 }
 0x3d7   : > { %4081 = vmax.xlane.f32.xlu1 %v4080_v45 }
 0x3db   : > { %4087 = vmax.xlane.f32.xlu1 %v4086_v37 }
 0x3ec   : > { %1834 = vrot.lane.b32.xlu1 %v9590_v57, %s9591_s26 }
 0x417   : > { %v4043_v62 = vpop.xlane.xlu1 %4042  ;;  %v4049_v60 = vpop.xlane.xlu0 %4048 }
 0x418   : > { %v4089_v63 = vsub.f32 %v8595_v46, %v4043_v62  ;;  %v4091_v8 = vsub.f32 %v8591_v50, %v4049_v60 }
 0x41a   : > { %v4105_v52 = vmul.f32 1.442695, %v4089_v63  ;;  %v4109_v32 = vmul.f32 1.442695, %v4091_v8 }
 0x41b   : > { %v4055_v31 = vpop.xlane.xlu0 %4054  ;;  %v8758_v40 = vpop.permute.xlu1 %1824 }
 0x41c   : > { %7317 = vpow2.f32 %v4105_v52  ;;  %v4093_v54 = vsub.f32 %v8605_v12, %v4055_v31 }
 0x41d   : > { %7319 = vpow2.f32 %v4109_v32 }
 0x41e   : > { %v4113_v61 = vmul.f32 1.442695, %v4093_v54 }
 0x41f   : > { %v4061_v39 = vpop.xlane.xlu0 %4060  ;;  %v8760_v34 = vpop.permute.xlu1 %1828 }
 0x420   : > { %7321 = vpow2.f32 %v4113_v61  ;;  %v4095_v4 = vsub.f32 %v8624_v1, %v4061_v39 }
 0x422   : > { %v4117_v22 = vmul.f32 1.442695, %v4095_v4 }
 0x423   : > { %v4067_v30 = vpop.xlane.xlu0 %4066 }
 0x424   : > { %7323 = vpow2.f32 %v4117_v22  ;;  %v4097_v10 = vsub.f32 %v8638_v14, %v4067_v30 }
 0x426   : > { %v8733_v46 = vpop.eup %7317  ;;  %v4121_v50 = vmul.f32 1.442695, %v4097_v10 }
 0x427   : > { %v8735_v23 = vpop.eup %7319  ;;  %v4073_v3 = vpop.xlane.xlu0 %4072  ;;  %v4137_v12 = vsel %vm538_vm0, %v8733_v46, 0.0 }
 0x428   : > { %7325 = vpow2.f32 %v4121_v50  ;;  %4138 = vadd.xlane.f32.xlu0 %v4137_v12  ;;  %v4143_v51 = vsel %vm538_vm0, %v8735_v23, 0.0  ;;  %v4099_v52 = vsub.f32 %v8649_v2, %v4073_v3 }
 0x429   : > { %4144 = vadd.xlane.f32.xlu1 %v4143_v51 }
 0x42a   : > { %v8741_v1 = vpop.eup %7321  ;;  %v4125_v61 = vmul.f32 1.442695, %v4099_v52 }
 0x42b   : > { %v4079_v15 = vpop.xlane.xlu0 %4078  ;;  %v4149_v14 = vsel %vm538_vm0, %v8741_v1, 0.0 }
 0x42c   : > { %4150 = vadd.xlane.f32.xlu0 %v4149_v14  ;;  %v4101_v31 = vsub.f32 %v8664_v41, %v4079_v15 }
 0x42e   : > { %v8745_v11 = vpop.eup %7323  ;;  %v4129_v4 = vmul.f32 1.442695, %v4101_v31 }
 0x42f   : > { %v4085_v26 = vpop.xlane.xlu0 %4084  ;;  %v4155_v21 = vsel %vm538_vm0, %v8745_v11, 0.0 }
 0x430   : > { %4156 = vadd.xlane.f32.xlu1 %v4155_v21  ;;  %v4103_v39 = vsub.f32 %v8674_v43, %v4085_v26 }
 0x432   : > { %v8749_v27 = vpop.eup %7325  ;;  %v4133_v30 = vmul.f32 1.442695, %v4103_v39 }
 0x433   : > { %v4046_v29 = vpop.xlane.xlu0 %4045  ;;  %v4161_v28 = vsel %vm538_vm0, %v8749_v27, 0.0 }
 0x434   : > { %v4090_v16 = vsub.f32 %v8681_v24, %v4046_v29  ;;  %4162 = vadd.xlane.f32.xlu0 %v4161_v28 }
 0x436   : > { %v4107_v36 = vmul.f32 1.442695, %v4090_v16 }
 0x437   : > { %v1823_v21 = vpop.permute.xlu0 %1822 }
 0x438   : > { %7327 = vpow2.f32 %v4107_v36 }
 0x43b   : > { %v1831_v29 = vpop.permute.xlu0 %1830 }
 0x43f   : > { %v1837_v16 = vpop.permute.xlu0 %1836 }
 0x440   : > { %v2015_v52 = vcombine.high %v8758_v40, %v1837_v16 }
 0x442   : > { %v8754_v0 = vpop.eup %7327 }
 0x443   : > { %v4140_v13 = vsel %vm538_vm0, %v8754_v0, 0.0 }
 0x444   : > { %4141 = vadd.xlane.f32.xlu1 %v4140_v13 }
 0x450   : > { %v4052_v56 = vpop.xlane.xlu1 %4051 }
 0x451   : > { %v4092_v58 = vsub.f32 %v8688_v17, %v4052_v56 }
 0x453   : > { %v4111_v7 = vmul.f32 1.442695, %v4092_v58 }
 0x454   : > { %v4058_v55 = vpop.xlane.xlu1 %4057 }
 0x455   : > { %7329 = vpow2.f32 %v4111_v7  ;;  %v4094_v24 = vsub.f32 %v8695_v20, %v4058_v55 }
 0x457   : > { %v4115_v35 = vmul.f32 1.442695, %v4094_v24 }
 0x458   : > { %v4064_v42 = vpop.xlane.xlu1 %4063 }
 0x459   : > { %7331 = vpow2.f32 %v4115_v35  ;;  %v4096_v5 = vsub.f32 %v8702_v9, %v4064_v42  ;;  %v9593_v42 = vld [vmem:[#allocation34_spill] sm:$0xff] }
 0x45a   : > { %vm4228_vm8 = vcmp.eq.s32.totalorder %v9593_v42, 1 }
 0x45b   : > { %v4119_v47 = vmul.f32 1.442695, %v4096_v5  ;;  %v9594_v5 = vld [vmem:[#allocation35_spill] sm:$0xff] }
 0x45c   : > { %v4070_v38 = vpop.xlane.xlu1 %4069  ;;  %vm4227_vm9 = vcmp.eq.s32.totalorder %v9594_v5, 1 }
 0x45d   : > { %7333 = vpow2.f32 %v4119_v47  ;;  %v4098_v18 = vsub.f32 %v8707_v53, %v4070_v38 }
 0x45f   : > { %v8766_v59 = vpop.eup %7329  ;;  %v4123_v45 = vmul.f32 1.442695, %v4098_v18 }
 0x460   : > { %v4146_v17 = vsel %vm538_vm0, %v8766_v59, 0.0  ;;  %v4076_v63 = vpop.xlane.xlu1 %4075 }
 0x461   : > { %7335 = vpow2.f32 %v4123_v45  ;;  %4147 = vadd.xlane.f32.xlu0 %v4146_v17  ;;  %v4100_v8 = vsub.f32 %v8712_v25, %v4076_v63  ;;  %v9595_v45 = vld [vmem:[#allocation29_spill] sm:$0xff] }
 0x463   : > { %v8770_v37 = vpop.eup %7331  ;;  %v4127_v54 = vmul.f32 1.442695, %v4100_v8  ;;  %v2014_v8 = vcombine.low %v8758_v40, %v1837_v16 }
 0x464   : > { %v4152_v20 = vsel %vm538_vm0, %v8770_v37, 0.0  ;;  %v4082_v32 = vpop.xlane.xlu1 %4081 }
 0x465   : > { %4153 = vadd.xlane.f32.xlu1 %v4152_v20  ;;  %7337 = vpow2.f32 %v4127_v54  ;;  %v4102_v22 = vsub.f32 %v8717_v19, %v4082_v32 }
 0x466   : > { %7339 = vpow2.f32 %v4125_v61 }
 0x467   : > { %v8774_v9 = vpop.eup %7333  ;;  %7341 = vpow2.f32 %v4129_v4 }
 0x468   : > { %v4158_v62 = vsel %vm538_vm0, %v8774_v9, 0.0  ;;  %7343 = vpow2.f32 %v4133_v30  ;;  %v2022_v30 = vrot.slane %v2014_v8, %v7756_v44 }
 0x469   : > { %4159 = vadd.xlane.f32.xlu0 %v4158_v62 }
 0x46b   : > { %v8778_v53 = vpop.eup %7335 }
 0x46c   : > { %v4164_v60 = vsel %vm538_vm0, %v8778_v53, 0.0 }
 0x46d   : > { %4165 = vadd.xlane.f32.xlu1 %v4164_v60 }
 0x46f   : > { %v8792_v10 = vpop.eup %7337 }
 0x470   : > { %v8794_v41 = vpop.eup %7339  ;;  %v4170_v43 = vsel %vm538_vm0, %v8792_v10, 0.0 }
 0x471   : > { %v8798_v50 = vpop.eup %7341 }
 0x472   : > { %v8800_v19 = vpop.eup %7343  ;;  %v4173_v3 = vsel %vm538_vm0, %v8798_v50, 0.0 }
 0x473   : > { %v4179_v51 = vsel %vm538_vm0, %v8800_v19, 0.0 }
 0x47e   : > { %1840 = vrot.lane.b32.xlu1 %v9590_v57, %s9592_s1  ;;  %v4088_v57 = vpop.xlane.xlu1 %4087 }
 0x47f   : > { %1842 = vrot.lane.b32.xlu0 %v9586_v48, %s9592_s1  ;;  %v4131_v48 = vmul.f32 1.442695, %v4102_v22  ;;  %v4104_v25 = vsub.f32 %v8722_v33, %v4088_v57  ;;  %v4167_v33 = vsel %vm538_vm0, %v8794_v41, 0.0 }
 0x481   : > { %7345 = vpow2.f32 %v4131_v48  ;;  %v4135_v2 = vmul.f32 1.442695, %v4104_v25 }
 0x482   : > { %v1835_v28 = vpop.permute.xlu1 %1834 }
 0x483   : > { %7347 = vpow2.f32 %v4135_v2  ;;  %v1878_v32 = vcombine.low %v1823_v21, %v1835_v28  ;;  %v1879_v61 = vcombine.high %v1823_v21, %v1835_v28  ;;  %v2029_v2 = vrot.slane %v2015_v52, %v7756_v44 }
 0x48b   : > { %v8806_v12 = vpop.eup %7345 }
 0x48c   : > { %v4176_v15 = vsel %vm538_vm0, %v8806_v12, 0.0 }
 0x48d   : > { %v8812_v14 = vpop.eup %7347 }
 0x48e   : > { %v4182_v26 = vsel %vm538_vm0, %v8812_v14, 0.0 }
 0x49e   : > { %4171 = vadd.xlane.f32.xlu0 %v4170_v43  ;;  %v1886_v43 = vrot.slane %v1878_v32, %v7756_v44 }
 0x4a2   : > { %4174 = vadd.xlane.f32.xlu0 %v4173_v3  ;;  %4168 = vadd.xlane.f32.xlu1 %v4167_v33 }
 0x4a6   : > { %4180 = vadd.xlane.f32.xlu0 %v4179_v51  ;;  %4177 = vadd.xlane.f32.xlu1 %v4176_v15  ;;  %v1893_v51 = vrot.slane %v1879_v61, %v7756_v44 }
 0x4aa   : > { %4183 = vadd.xlane.f32.xlu1 %v4182_v26 }
 0x4b5   : > { %v4139_v13 = vpop.xlane.xlu0 %4138 }
 0x4b6   : > { %v4145_v36 = vpop.xlane.xlu1 %4144  ;;  %7349 = vrcp.f32 %v4139_v13 }
 0x4bd   : > { %v4157_v56 = vpop.xlane.xlu1 %4156 }
 0x4c0   : > { %v7350_v7 = vpop.eup %7349 }
 0x4c1   : > { %v4201_v55 = vmul.f32 %v7350_v7, %v8733_v46  ;;  %v9596_v46 = vmov 0.0  }
 0x4c3   : > { %v4229_v47 = vsel %vm4227_vm9, %v4201_v55, 0.0 }
 0x4d1   : > { %v4142_v58 = vpop.xlane.xlu1 %4141 }
 0x4d2   : > { %7351 = vrcp.f32 %v4142_v58 }
 0x4d3   : > { %7353 = vrcp.f32 %v4145_v36 }
 0x4dc   : > { %v7352_v24 = vpop.eup %7351 }
 0x4dd   : > { %v4202_v35 = vmul.f32 %v7352_v24, %v8754_v0  ;;  %v4151_v0 = vpop.xlane.xlu0 %4150  ;;  %v7354_v60 = vpop.eup %7353 }
 0x4de   : > { %v4203_v31 = vmul.f32 %v7354_v60, %v8735_v23 }
 0x4df   : > { %v4230_v38 = vsel %vm4228_vm8, %v4202_v35, 0.0 }
 0x4e0   : > { %v8824_v18 = vpack.c.bf16 %v4230_v38, %v4229_v47  ;;  %v4231_v40 = vsel %vm4227_vm9, %v4203_v31, 0.0 }
 0x4e1   : > { %v8832_v17 = vpop.xlane.xlu0 %4162 }
 0x4e2   : > { %7038 = vmatmul.mubr.msk.bf16.vlgmr.msra.gmra.mrb[32].mxu1 %vm538_vm0, %v8824_v18  ;;  %v5235_v26 = vshrl.u32 %v8824_v18, 16 }
 0x4e3   : > { %7042 = vmatpush3.bf16.msra.mxu1 %v9595_v45  ;;  %7043 = vmatprep.mubr.msk.bf16.mxu1 %vm7468_vm1, %v9596_v46 }
 0x4e4   : > { %7047 = vmatprep.subr.bf16.mxu1 %v9596_v46 }
 0x4ee   : > { %v4148_v20 = vpop.xlane.xlu0 %4147 }
 0x4ef   : > { %7355 = vrcp.f32 %v4148_v20 }
 0x4f0   : > { %7357 = vrcp.f32 %v4151_v0 }
 0x4f2   : > { %v4154_v62 = vpop.xlane.xlu1 %4153 }
 0x4f3   : > { %7359 = vrcp.f32 %v4154_v62 }
 0x4f6   : > { %v4160_v63 = vpop.xlane.xlu0 %4159 }
 0x4f7   : > { %7361 = vrcp.f32 %v4160_v63 }
 0x4f8   : > { %7363 = vrcp.f32 %v4157_v56 }
 0x4f9   : > { %v7356_v54 = vpop.eup %7355 }
 0x4fa   : > { %v4204_v39 = vmul.f32 %v7356_v54, %v8766_v59  ;;  %v4166_v4 = vpop.xlane.xlu1 %4165  ;;  %v1843_v22 = vpop.permute.xlu0 %1842 }
 0x4fb   : > { %v7358_v57 = vpop.eup %7357  ;;  %v2030_v48 = vcombine.low %v1831_v29, %v1843_v22  ;;  %v2031_v25 = vcombine.high %v1831_v29, %v1843_v22  ;;  %7365 = vrcp.f32 %v4166_v4 }
 0x4fc   : > { %v4232_v23 = vsel %vm4228_vm8, %v4204_v39, 0.0  ;;  %v4205_v15 = vmul.f32 %v7358_v57, %v8741_v1  ;;  %v9597_v1 = vld [vmem:[#allocation30_spill] sm:$0xff]  ;;  %7367 = vrcp.f32 %v8832_v17 }
 0x4fd   : > { %v2038_v59 = vrot.slane %v2030_v48, %v7756_v44  ;;  %v2045_v3 = vrot.slane %v2031_v25, %v7756_v44  ;;  %v4246_v33 = vpack.c.bf16 %v4232_v23, %v4231_v40  ;;  %v7360_v29 = vpop.eup %7359 }
 0x4fe   : > { %v1841_v21 = vpop.permute.xlu1 %1840 }
 0x4ff   : > { %v2078_v28 = vcombine.low %v2022_v30, %v2038_v59  ;;  %v2079_v16 = vcombine.high %v2022_v30, %v2038_v59  ;;  %v2094_v36 = vcombine.low %v2029_v2, %v2045_v3  ;;  %v2095_v13 = vcombine.high %v2029_v2, %v2045_v3  ;;  %7044 = vmatmul.mubr.msk.bf16.vlgmr.msra.gmra.mrb[36].mxu1 %vm538_vm0, %v4246_v33 }
 0x500   : > { %v1894_v56 = vcombine.low %v8760_v34, %v1841_v21  ;;  %v1895_v58 = vcombine.high %v8760_v34, %v1841_v21  ;;  %v8854_v7 = vpack.i.b16 %v4246_v33, %v8824_v18  ;;  %v5236_v55 = vshrl.u32 %v4246_v33, 16  ;;  %7048 = vmatpush3.bf16.msra.mxu1 %v9597_v1  ;;  %7049 = vmatprep.mubr.msk.bf16.mxu1 %vm7468_vm1, %v9596_v46 }
 0x501   : > { %v2086_v24 = vrot.slane %v2078_v28, %v7760_v49  ;;  %v2093_v35 = vrot.slane %v2079_v16, %v7760_v49  ;;  %v2102_v47 = vrot.slane %v2094_v36, %v7760_v49  ;;  %v2109_v38 = vrot.slane %v2095_v13, %v7760_v49  ;;  %7053 = vmatprep.subr.bf16.mxu1 %v9596_v46  ;;  %v7362_v54 = vpop.eup %7361  ;;  %v9598_v36 = vld [vmem:[#allocation31_spill] sm:$0xff] }
 0x502   : > { %v4206_v34 = vmul.f32 %v7360_v29, %v8770_v37  ;;  %v1902_v18 = vrot.slane %v1894_v56, %v7756_v44  ;;  %v1909_v45 = vrot.slane %v1895_v58, %v7756_v44  ;;  %v8867_v0 = vpack.i.b16 %v5236_v55, %v5235_v26  ;;  %v7364_v48 = vpop.eup %7363 }
 0x503   : > { %v6753_v20 = vcombine.low %v2086_v24, %v2093_v35  ;;  %v6755_v62 = vcombine.high %v2086_v24, %v2093_v35  ;;  %v6757_v60 = vcombine.low %v2102_v47, %v2109_v38  ;;  %v6759_v63 = vcombine.high %v2102_v47, %v2109_v38 }
 0x504   : > { %v1942_v8 = vcombine.low %v1886_v43, %v1902_v18  ;;  %v1943_v52 = vcombine.high %v1886_v43, %v1902_v18  ;;  %v1958_v32 = vcombine.low %v1893_v51, %v1909_v45  ;;  %v1959_v31 = vcombine.high %v1893_v51, %v1909_v45 }
 0x505   : > { %v8870_v61 = vrot.slane %v6753_v20, %v7756_v44  ;;  %v8873_v37 = vrot.slane %v6755_v62, %v7756_v44  ;;  %v8876_v39 = vrot.slane %v6757_v60, %v7756_v44  ;;  %v8879_v4 = vrot.slane %v6759_v63, %v7756_v44  ;;  %v7366_v40 = vpop.eup %7365 }
 0x506   : > { %v1950_v22 = vrot.slane %v1942_v8, %v7760_v49  ;;  %v1957_v57 = vrot.slane %v1943_v52, %v7760_v49  ;;  %v1966_v30 = vrot.slane %v1958_v32, %v7760_v49  ;;  %v1973_v25 = vrot.slane %v1959_v31, %v7760_v49  ;;  %v7368_v47 = vpop.eup %7367 }
 0x507   : > { %v4233_v2 = vsel %vm4227_vm9, %v4205_v15, 0.0  ;;  %v4234_v43 = vsel %vm4228_vm8, %v4206_v34, 0.0  ;;  %v4208_v23 = vmul.f32 %v7362_v54, %v8774_v9  ;;  %v2334_v26 = vcombine.low %v8870_v61, %v8873_v37 }
 0x508   : > { %v6745_v59 = vcombine.low %v1950_v22, %v1957_v57  ;;  %v6747_v17 = vcombine.high %v1950_v22, %v1957_v57  ;;  %v8891_v3 = vpack.c.bf16 %v4234_v43, %v4233_v2  ;;  %v6749_v33 = vcombine.low %v1966_v30, %v1973_v25 }
 0x509   : > { %v6751_v51 = vcombine.high %v1966_v30, %v1973_v25  ;;  %v2366_v21 = vcombine.low %v8876_v39, %v8879_v4  ;;  %v4207_v9 = vmul.f32 %v7364_v48, %v8745_v11  ;;  %v4236_v56 = vsel %vm4228_vm8, %v4208_v23, 0.0 }
 0x50a   : > { %v2133_v15 = vrot.slane %v6745_v59, %v7756_v44  ;;  %v2149_v29 = vrot.slane %v6747_v17, %v7756_v44  ;;  %7050 = vmatmul.mubr.msk.bf16.vlgmr.msra.gmra.mrb[40].mxu1 %vm538_vm0, %v8891_v3  ;;  %v2165_v28 = vrot.slane %v6749_v33, %v7756_v44  ;;  %v2342_v55 = vrot.slane %v2334_v26, %v7760_v49 }
 0x50b   : > { %v2181_v16 = vrot.slane %v6751_v51, %v7756_v44  ;;  %7054 = vmatpush3.bf16.msra.mxu1 %v9598_v36  ;;  %7055 = vmatprep.mubr.msk.bf16.mxu1 %vm7468_vm1, %v9596_v46  ;;  %v2374_v11 = vrot.slane %v2366_v21, %v7760_v49  ;;  %v4235_v24 = vsel %vm4227_vm9, %v4207_v9, 0.0  ;;  %v4210_v34 = vmul.f32 %v7366_v40, %v8778_v53 }
 0x50c   : > { %7059 = vmatprep.subr.bf16.mxu1 %v9596_v46  ;;  %v2198_v13 = vcombine.low %v2133_v15, %v2149_v29  ;;  %v8916_v38 = vpack.c.bf16 %v4236_v56, %v4235_v24  ;;  %v4209_v20 = vmul.f32 %v7368_v47, %v8749_v27  ;;  %v2199_v30 = vcombine.high %v2133_v15, %v2149_v29 }
 0x50d   : > { %v2230_v58 = vcombine.low %v2165_v28, %v2181_v16  ;;  %v2386_v45 = vcombine.low %v2342_v55, %v2374_v11  ;;  %v4238_v60 = vsel %vm4228_vm8, %v4210_v34, 0.0  ;;  %v2387_v8 = vcombine.high %v2342_v55, %v2374_v11 }
 0x50e   : > { %v2206_v1 = vrot.slane %v2198_v13, %v7760_v49  ;;  %v4237_v53 = vsel %vm4227_vm9, %v4209_v20, 0.0  ;;  %v2231_v48 = vcombine.high %v2165_v28, %v2181_v16  ;;  %v2335_v25 = vcombine.high %v8870_v61, %v8873_v37 }
 0x50f   : > { %v2238_v35 = vrot.slane %v2230_v58, %v7760_v49  ;;  %v4249_v52 = vpack.c.bf16 %v4238_v60, %v4237_v53  ;;  %v2367_v2 = vcombine.high %v8876_v39, %v8879_v4  ;;  %v2213_v23 = vrot.slane %v2199_v30, %v7760_v49 }
 0x510   : > { %v2245_v59 = vrot.slane %v2231_v48, %v7760_v49  ;;  %v2349_v33 = vrot.slane %v2335_v25, %v7760_v49  ;;  %v5242_v34 = vshrl.u32 %v8916_v38, 16  ;;  %v8969_v20 = vpack.i.b16 %v8916_v38, %v8891_v3 }
 0x511   : > { %v2250_v18 = vcombine.low %v2206_v1, %v2238_v35  ;;  %v2251_v63 = vcombine.high %v2206_v1, %v2238_v35  ;;  %v2381_v51 = vrot.slane %v2367_v2, %v7760_v49  ;;  %v5247_v11 = vshrl.u32 %v4249_v52, 16 }
 0x512   : > { %7056 = vmatmul.mubr.msk.bf16.vlgmr.msra.gmra.mrb[44].mxu1 %vm538_vm0, %v8916_v38  ;;  %v2252_v61 = vcombine.low %v2213_v23, %v2245_v59  ;;  %v2253_v55 = vcombine.high %v2213_v23, %v2245_v59  ;;  %v9600_v59 = vld [vmem:[#allocation14_spill] sm:$0xff] }
 0x513   : > { %v4257_v62 = vpack.c.bf16 %v2386_v45, %v2250_v18  ;;  %7061 = vmatprep.mubr.msk.bf16.mxu1 %vm7468_vm1, %v9596_v46  ;;  %v4258_v32 = vpack.c.bf16 %v2387_v8, %v2251_v63  ;;  %v2388_v15 = vcombine.low %v2349_v33, %v2381_v51  ;;  %v2389_v24 = vcombine.high %v2349_v33, %v2381_v51 }
 0x514   : > { %v9601_v51 = vmov 0  }
 0x515   : > { %7060 = vmatpush3.bf16.msra.mxu1 %v4257_v62  ;;  %v4259_v36 = vpack.c.bf16 %v2388_v15, %v2252_v61  ;;  %v4260_v62 = vpack.c.bf16 %v2389_v24, %v2253_v55  ;;  %v9603_v61 = vld [vmem:[#allocation19_spill] sm:$0xff]  ;;  %v9604_v15 = vld [vmem:[#allocation22_spill] sm:$0xff] }
 0x516   : > { %7065 = vmatprep.subr.bf16.mxu1 %v9596_v46  ;;  %v9609_v55 = vld [vmem:[#allocation11_spill] sm:$0xff] }
 0x517   : > { %v9611_v24 = vld [vmem:[#allocation15_spill] sm:$0xff] }
 0x51a   : > { %7062 = vmatmul.mubr.msk.bf16.vlgmr.msra.gmra.mrb[48].mxu1 %vm538_vm0, %v4249_v52 }
 0x51b   : > { %7066 = vmatpush3.bf16.msra.mxu1 %v4258_v32  ;;  %7067 = vmatprep.mubr.msk.bf16.mxu1 %vm7468_vm1, %v9596_v46 }
 0x51c   : > { %7071 = vmatprep.subr.bf16.mxu1 %v9596_v46 }
 0x52b   : > { %v4172_v27 = vpop.xlane.xlu0 %4171 }
 0x52c   : > { %7369 = vrcp.f32 %v4172_v27 }
 0x52f   : > { %v4169_v31 = vpop.xlane.xlu1 %4168  ;;  %v4175_v54 = vpop.xlane.xlu0 %4174 }
 0x530   : > { %7371 = vrcp.f32 %v4169_v31 }
 0x531   : > { %7373 = vrcp.f32 %v4175_v54 }
 0x533   : > { %v4178_v22 = vpop.xlane.xlu1 %4177  ;;  %v4181_v57 = vpop.xlane.xlu0 %4180 }
 0x534   : > { %7375 = vrcp.f32 %v4178_v22 }
 0x535   : > { %7377 = vrcp.f32 %v4181_v57 }
 0x536   : > { %v7370_v43 = vpop.eup %7369 }
 0x537   : > { %v4184_v40 = vpop.xlane.xlu1 %4183  ;;  %v4212_v17 = vmul.f32 %v7370_v43, %v8792_v10 }
 0x538   : > { %7379 = vrcp.f32 %v4184_v40  ;;  %v9599_v40 = vld [vmem:[#allocation12_spill] sm:$0xff] }
 0x539   : > { %v4240_v4 = vsel %vm4228_vm8, %v4212_v17, 0.0 }
 0x53a   : > { %v7372_v26 = vpop.eup %7371 }
 0x53b   : > { %v4211_v21 = vmul.f32 %v7372_v26, %v8794_v41  ;;  %v7374_v37 = vpop.eup %7373 }
 0x53c   : > { %v4213_v10 = vmul.f32 %v7374_v37, %v8798_v50 }
 0x53d   : > { %v4239_v39 = vsel %vm4227_vm9, %v4211_v21, 0.0  ;;  %v9602_v21 = vld [vmem:[#allocation17_spill] sm:$0xff] }
 0x53e   : > { %v7376_v29 = vpop.eup %7375  ;;  %v4250_v9 = vpack.c.bf16 %v4240_v4, %v4239_v39 }
 0x53f   : > { %v7378_v28 = vpop.eup %7377  ;;  %v4214_v16 = vmul.f32 %v7376_v29, %v8806_v12  ;;  %v4241_v12 = vsel %vm4227_vm9, %v4213_v10, 0.0  ;;  %v9605_v29 = vld [vmem:[#allocation24_spill] sm:$0xff] }
 0x540   : > { %7068 = vmatmul.mubr.msk.bf16.vlgmr.msra.gmra.mrb[52].mxu1 %vm538_vm0, %v4250_v9  ;;  %v4215_v41 = vmul.f32 %v7378_v28, %v8800_v19  ;;  %v5248_v58 = vshrl.u32 %v4250_v9, 16  ;;  %v8959_v1 = vpack.i.b16 %v4250_v9, %v4249_v52 }
 0x541   : > { %7072 = vmatpush3.bf16.msra.mxu1 %v4259_v36  ;;  %7073 = vmatprep.mubr.msk.bf16.mxu1 %vm7468_vm1, %v9596_v46  ;;  %v4242_v13 = vsel %vm4228_vm8, %v4214_v16, 0.0 }
 0x542   : > { %v7380_v56 = vpop.eup %7379  ;;  %7077 = vmatprep.subr.bf16.mxu1 %v9596_v46  ;;  %v4251_v19 = vpack.c.bf16 %v4242_v13, %v4241_v12  ;;  %v4243_v35 = vsel %vm4227_vm9, %v4215_v41, 0.0  ;;  %v5249_v18 = vpack.i.b16 %v5248_v58, %v5247_v11  ;;  %v5257_v60 = vcombine.low %v8854_v7, %v8959_v1  ;;  %v9606_v41 = vld [vmem:[#allocation25_spill] sm:$0xff]  ;;  %v9608_v12 = vld [vmem:[#allocation28_spill] sm:$0xff] }
 0x543   : > { %v4216_v50 = vmul.f32 %v7380_v56, %v8812_v14  ;;  %v5241_v14 = vshrl.u32 %v8891_v3, 16  ;;  %v5258_v10 = vcombine.high %v8854_v7, %v8959_v1  ;;  %v9607_v56 = vld [vmem:[#allocation26_spill] sm:$0xff] }
 0x544   : > { %v5253_v5 = vshrl.u32 %v4251_v19, 16  ;;  %v5325_v3 = vcombine.low %v8867_v0, %v5249_v18  ;;  %v5326_v38 = vcombine.high %v8867_v0, %v5249_v18  ;;  %v5265_v32 = vrot.slane %v5257_v60, %v7756_v44  ;;  %v9612_v18 = vld [vmem:[#allocation18_spill] sm:$0xff] }
 0x545   : > { %v4244_v47 = vsel %vm4228_vm8, %v4216_v50, 0.0  ;;  %v5243_v53 = vpack.i.b16 %v5242_v34, %v5241_v14  ;;  %v5272_v13 = vrot.slane %v5258_v10, %v7756_v44 }
 0x546   : > { %v4252_v45 = vpack.c.bf16 %v4244_v47, %v4243_v35  ;;  %v5333_v57 = vrot.slane %v5325_v3, %v7756_v44  ;;  %v8985_v48 = vrot.slane %v5326_v38, %v7756_v44 }
 0x548   : > { %7074 = vmatmul.mubr.msk.bf16.vlgmr.msra.gmra.mrb[56].mxu1 %vm538_vm0, %v4251_v19  ;;  %v5251_v63 = vpack.i.b16 %v4252_v45, %v4251_v19  ;;  %v5254_v42 = vshrl.u32 %v4252_v45, 16  ;;  %v9610_v19 = vld [vmem:[#allocation13_spill] sm:$0xff] }
 0x549   : > { %7078 = vmatpush3.bf16.msra.mxu1 %v4260_v62  ;;  %7079 = vmatprep.mubr.msk.bf16.mxu1 %vm7468_vm1, %v9596_v46  ;;  %v9614_v62 = vld [vmem:[#allocation23_spill] sm:$0xff] }
 0x54a   : > { %v5255_v8 = vpack.i.b16 %v5254_v42, %v5253_v5  ;;  %v5273_v52 = vcombine.low %v8969_v20, %v5251_v63  ;;  %7089 = vmatprep.subr.bf16.mxu1 %v9596_v46  ;;  %v5274_v9 = vcombine.high %v8969_v20, %v5251_v63 }
 0x54c   : > { %v5281_v27 = vrot.slane %v5273_v52, %v7756_v44  ;;  %v5341_v31 = vcombine.low %v5243_v53, %v5255_v8  ;;  %v5342_v54 = vcombine.high %v5243_v53, %v5255_v8  ;;  %v5288_v36 = vrot.slane %v5274_v9, %v7756_v44 }
 0x54e   : > { %v5289_v22 = vcombine.low %v5265_v32, %v5281_v27  ;;  %v5349_v30 = vrot.slane %v5341_v31, %v7756_v44  ;;  %v8988_v25 = vrot.slane %v5342_v54, %v7756_v44  ;;  %v5290_v37 = vcombine.high %v5265_v32, %v5281_v27 }
 0x54f   : > { %v5305_v7 = vcombine.low %v5272_v13, %v5288_v36  ;;  %v5306_v35 = vcombine.high %v5272_v13, %v5288_v36 }
 0x550   : > { %7080 = vmatmul.mubr.msk.bf16.vlgmr.msra.gmra.mrb[60].mxu1 %vm538_vm0, %v4252_v45  ;;  %v5297_v0 = vrot.slane %v5289_v22, %v7760_v49  ;;  %v5357_v2 = vcombine.low %v5333_v57, %v5349_v30  ;;  %v5358_v43 = vcombine.high %v5333_v57, %v5349_v30  ;;  %v5373_v23 = vcombine.low %v8985_v48, %v8988_v25  ;;  %v9613_v45 = vld [vmem:[#allocation20_spill] sm:$0xff] }
 0x551   : > { %7090 = vmatpush3.bf16.msra.mxu1 %v9599_v40  ;;  %7091 = vmatprep.mubr.msk.bf16.mxu1 %vm7468_vm1, %v9596_v46  ;;  %v5374_v17 = vcombine.high %v8985_v48, %v8988_v25  ;;  %v5304_v4 = vrot.slane %v5290_v37, %v7760_v49  ;;  %v5313_v50 = vrot.slane %v5305_v7, %v7760_v49 }
 0x552   : > { %7086 = vmatmul.mubr.msk.bf16.vlgmr.msra.gmra.mrb[40].mxu0 %vm538_vm0, %v5297_v0  ;;  %7101 = vmatprep.subr.bf16.mxu1 %v9596_v46  ;;  %v5365_v33 = vrot.slane %v5357_v2, %v7760_v49  ;;  %v5321_v26 = vcombine.high %v5297_v0, %v9601_v51  ;;  %v5372_v28 = vrot.slane %v5358_v43, %v7760_v49 }
 0x553   : > { %7096 = vmatpush3.bf16.msra.mxu0 %v9600_v59  ;;  %7097 = vmatprep.mubr.msk.bf16.mxu0 %vm7468_vm1, %v9596_v46  ;;  %v5322_v16 = vcombine.high %v5304_v4, %v9601_v51  ;;  %v5381_v11 = vrot.slane %v5373_v23, %v7760_v49  ;;  %v5323_v1 = vcombine.high %v5313_v50, %v9601_v51 }
 0x554   : > { %7107 = vmatprep.subr.bf16.mxu0 %v9596_v46  ;;  %v5389_v39 = vcombine.high %v5365_v33, %v9601_v51  ;;  %v5390_v58 = vcombine.high %v5372_v28, %v9601_v51  ;;  %v5320_v34 = vrot.slane %v5306_v35, %v7760_v49  ;;  %v5388_v14 = vrot.slane %v5374_v17, %v7760_v49 }
 0x555   : > { %v5391_v47 = vcombine.high %v5381_v11, %v9601_v51 }
 0x556   : > { %v5324_v20 = vcombine.high %v5320_v34, %v9601_v51  ;;  %v5392_v60 = vcombine.high %v5388_v14, %v9601_v51 }
 0x558   : > { %7092 = vmatmul.mubr.msk.bf16.vlgmr.msra.gmra.mrb[64].mxu1 %vm538_vm0, %v5365_v33 }
 0x559   : > { %7102 = vmatpush3.bf16.msra.mxu1 %v9602_v21  ;;  %7103 = vmatprep.mubr.msk.bf16.mxu1 %vm7468_vm1, %v9596_v46 }
 0x55a   : > { %7098 = vmatmul.mubr.msk.bf16.vlgmr.msra.gmra.mrb[44].mxu0 %vm538_vm0, %v5321_v26  ;;  %7113 = vmatprep.subr.bf16.mxu1 %v9596_v46 }
 0x55b   : > { %7108 = vmatpush3.bf16.msra.mxu0 %v9603_v61  ;;  %7109 = vmatprep.mubr.msk.bf16.mxu0 %vm7468_vm1, %v9596_v46 }
 0x55c   : > { %7119 = vmatprep.subr.bf16.mxu0 %v9596_v46 }
 0x560   : > { %7104 = vmatmul.mubr.msk.bf16.vlgmr.msra.gmra.mrb[68].mxu1 %vm538_vm0, %v5389_v39 }
 0x561   : > { %7114 = vmatpush3.bf16.msra.mxu1 %v9604_v15  ;;  %7115 = vmatprep.mubr.msk.bf16.mxu1 %vm7468_vm1, %v9596_v46 }
 0x562   : > { %7110 = vmatmul.mubr.msk.bf16.vlgmr.msra.gmra.mrb[48].mxu0 %vm538_vm0, %v5304_v4  ;;  %7125 = vmatprep.subr.bf16.mxu1 %v9596_v46 }
 0x563   : > { %7120 = vmatpush3.bf16.msra.mxu0 %v9605_v29  ;;  %7121 = vmatprep.mubr.msk.bf16.mxu0 %vm7468_vm1, %v9596_v46 }
 0x564   : > { %7131 = vmatprep.subr.bf16.mxu0 %v9596_v46 }
 0x568   : > { %7116 = vmatmul.mubr.msk.bf16.vlgmr.msra.gmra.mrb[72].mxu1 %vm538_vm0, %v5372_v28 }
 0x569   : > { %7126 = vmatpush3.bf16.msra.mxu1 %v9606_v41  ;;  %7127 = vmatprep.mubr.msk.bf16.mxu1 %vm7468_vm1, %v9596_v46 }
 0x56a   : > { %7122 = vmatmul.mubr.msk.bf16.vlgmr.msra.gmra.mrb[52].mxu0 %vm538_vm0, %v5322_v16  ;;  %7137 = vmatprep.subr.bf16.mxu1 %v9596_v46 }
 0x56b   : > { %7132 = vmatpush3.bf16.msra.mxu0 %v9607_v56  ;;  %7133 = vmatprep.mubr.msk.bf16.mxu0 %vm7468_vm1, %v9596_v46 }
 0x56c   : > { %7143 = vmatprep.subr.bf16.mxu0 %v9596_v46 }
 0x570   : > { %7128 = vmatmul.mubr.msk.bf16.vlgmr.msra.gmra.mrb[76].mxu1 %vm538_vm0, %v5390_v58 }
 0x571   : > { %7138 = vmatpush3.bf16.msra.mxu1 %v9608_v12  ;;  %7139 = vmatprep.mubr.msk.bf16.mxu1 %vm7468_vm1, %v9596_v46 }
 0x572   : > { %7134 = vmatmul.mubr.msk.bf16.vlgmr.msra.gmra.mrb[56].mxu0 %vm538_vm0, %v5313_v50  ;;  %7149 = vmatprep.subr.bf16.mxu1 %v9596_v46 }
 0x573   : > { %7144 = vmatpush3.bf16.msra.mxu0 %v9609_v55  ;;  %7145 = vmatprep.mubr.msk.bf16.mxu0 %vm7468_vm1, %v9596_v46 }
 0x574   : > { %7155 = vmatprep.subr.bf16.mxu0 %v9596_v46 }
 0x578   : > { %7140 = vmatmul.mubr.msk.bf16.vlgmr.msra.gmra.mrb[80].mxu1 %vm538_vm0, %v5381_v11 }
 0x579   : > { %7150 = vmatpush3.bf16.msra.mxu1 %v9610_v19  ;;  %7151 = vmatprep.mubr.msk.bf16.mxu1 %vm7468_vm1, %v9596_v46 }
 0x57a   : > { %7146 = vmatmul.mubr.msk.bf16.vlgmr.msra.gmra.mrb[60].mxu0 %vm538_vm0, %v5323_v1  ;;  %7161 = vmatprep.subr.bf16.mxu1 %v9596_v46 }
 0x57b   : > { %7156 = vmatpush3.bf16.msra.mxu0 %v9611_v24  ;;  %7157 = vmatprep.mubr.msk.bf16.mxu0 %vm7468_vm1, %v9596_v46 }
 0x57c   : > { %7167 = vmatprep.subr.bf16.mxu0 %v9596_v46 }
 0x580   : > { %7152 = vmatmul.mubr.msk.bf16.vlgmr.msra.gmra.mrb[84].mxu1 %vm538_vm0, %v5391_v47 }
 0x581   : > { %7162 = vmatpush3.bf16.msra.mxu1 %v9612_v18  ;;  %7163 = vmatprep.mubr.msk.bf16.mxu1 %vm7468_vm1, %v9596_v46 }
 0x582   : > { %7158 = vmatmul.mubr.msk.bf16.vlgmr.msra.gmra.mrb[64].mxu0 %vm538_vm0, %v5320_v34  ;;  %7173 = vmatprep.subr.bf16.mxu1 %v9596_v46 }
 0x583   : > { %7168 = vmatpush3.bf16.msra.mxu0 %v9613_v45  ;;  %7169 = vmatprep.mubr.msk.bf16.mxu0 %vm7468_vm1, %v9596_v46 }
 0x584   : > { %6484 = vmatprep.subr.bf16.mxu0 %v9601_v51 }
 0x588   : > { %7164 = vmatmul.mubr.msk.bf16.vlgmr.msra.gmra.mrb[88].mxu1 %vm538_vm0, %v5388_v14 }
 0x589   : > { %7174 = vmatpush3.bf16.msra.mxu1 %v9614_v62  ;;  %7175 = vmatprep.mubr.msk.bf16.mxu1 %vm7468_vm1, %v9596_v46  ;;  %vm6413_vm1 = vcmask 195584  }
 0x58a   : > { %7170 = vmatmul.mubr.msk.bf16.vlgmr.msra.gmra.mrb[68].mxu0 %vm538_vm0, %v5324_v20 }
 0x590   : > { %7176 = vmatmul.mubr.msk.bf16.vlgmr.msra.gmra.mrb[92].mxu1 %vm538_vm0, %v5392_v60 }
 0x5b5   : > { %v4298_v5 = vpop.f32.mrb[32].mxu1 }
 0x5b6   : > { %v7039_v63 = vpop.f32.mrb[33].mxu1 }
 0x5b7   : > { %v4301_v42 = vpop.f32.mrb[34].mxu1 }
 0x5b8   : > { %v7040_v53 = vpop.f32.mrb[35].mxu1 }
 0x5d2   : > { %v4342_v8 = vpop.f32.mrb[36].mxu1 }
 0x5d3   : > { %v7045_v52 = vpop.f32.mrb[37].mxu1 }
 0x5d4   : > { %v4345_v3 = vpop.f32.mrb[38].mxu1 }
 0x5d5   : > { %v7046_v38 = vpop.f32.mrb[39].mxu1 }
 0x5dd   : > { %v4386_v32 = vpop.f32.mrb[40].mxu1 }
 0x5de   : > { %v4613_v27 = vcombine.low %v4298_v5, %v4386_v32  ;;  %v4614_v31 = vcombine.high %v4298_v5, %v4386_v32  ;;  %v7051_v54 = vpop.f32.mrb[41].mxu1 }
 0x5df   : > { %v4389_v22 = vpop.f32.mrb[42].mxu1 }
 0x5e0   : > { %v4749_v46 = vcombine.low %v4301_v42, %v4389_v22  ;;  %v4750_v57 = vcombine.high %v4301_v42, %v4389_v22  ;;  %v7052_v30 = vpop.f32.mrb[43].mxu1  ;;  %v4621_v43 = vrot.slane %v4613_v27, %v7756_v44  ;;  %v4628_v40 = vrot.slane %v4614_v31, %v7756_v44 }
 0x5e2   : > { %v4757_v15 = vrot.slane %v4749_v46, %v7756_v44  ;;  %v4764_v29 = vrot.slane %v4750_v57, %v7756_v44 }
 0x5e5   : > { %v4430_v48 = vpop.f32.mrb[44].mxu1 }
 0x5e6   : > { %v4629_v25 = vcombine.low %v4342_v8, %v4430_v48  ;;  %v4630_v0 = vcombine.high %v4342_v8, %v4430_v48  ;;  %v7057_v2 = vpop.f32.mrb[45].mxu1 }
 0x5e7   : > { %v4433_v23 = vpop.f32.mrb[46].mxu1 }
 0x5e8   : > { %v4637_v59 = vrot.slane %v4629_v25, %v7756_v44  ;;  %v4644_v17 = vrot.slane %v4630_v0, %v7756_v44  ;;  %v4765_v33 = vcombine.low %v4345_v3, %v4433_v23  ;;  %v4766_v26 = vcombine.high %v4345_v3, %v4433_v23  ;;  %v7058_v21 = vpop.f32.mrb[47].mxu1 }
 0x5ea   : > { %v4677_v61 = vcombine.low %v4621_v43, %v4637_v59  ;;  %v4678_v37 = vcombine.high %v4621_v43, %v4637_v59  ;;  %v4693_v39 = vcombine.low %v4628_v40, %v4644_v17  ;;  %v4694_v4 = vcombine.high %v4628_v40, %v4644_v17 }
 0x5eb   : > { %v4773_v9 = vrot.slane %v4765_v33, %v7756_v44  ;;  %v4780_v28 = vrot.slane %v4766_v26, %v7756_v44 }
 0x5ec   : > { %v4685_v10 = vrot.slane %v4677_v61, %v7760_v49  ;;  %v4692_v16 = vrot.slane %v4678_v37, %v7760_v49  ;;  %v4701_v36 = vrot.slane %v4693_v39, %v7760_v49  ;;  %v4708_v41 = vrot.slane %v4694_v4, %v7760_v49 }
 0x5ed   : > { %v4813_v13 = vcombine.low %v4757_v15, %v4773_v9  ;;  %v4814_v56 = vcombine.high %v4757_v15, %v4773_v9  ;;  %v4829_v7 = vcombine.low %v4764_v29, %v4780_v28  ;;  %v4830_v58 = vcombine.high %v4764_v29, %v4780_v28  ;;  %v9106_v50 = vpop.f32.mrb[48].mxu1 }
 0x5ee   : > { %v6818_v12 = vcombine.low %v4685_v10, %v4692_v16  ;;  %v6820_v55 = vcombine.high %v4685_v10, %v4692_v16  ;;  %v6822_v11 = vcombine.low %v4701_v36, %v4708_v41  ;;  %v6824_v1 = vcombine.high %v4701_v36, %v4708_v41  ;;  %v7063_v19 = vpop.f32.mrb[49].mxu1 }
 0x5ef   : > { %v4821_v24 = vrot.slane %v4813_v13, %v7760_v49  ;;  %v4828_v35 = vrot.slane %v4814_v56, %v7760_v49  ;;  %v4837_v47 = vrot.slane %v4829_v7, %v7760_v49  ;;  %v4844_v34 = vrot.slane %v4830_v58, %v7760_v49  ;;  %v9112_v18 = vpop.f32.mrb[50].mxu1 }
 0x5f0   : > { %v4893_v45 = vrot.slane %v6818_v12, %v7756_v44  ;;  %v4909_v14 = vrot.slane %v6820_v55, %v7756_v44  ;;  %v4925_v20 = vrot.slane %v6822_v11, %v7756_v44  ;;  %v4941_v62 = vrot.slane %v6824_v1, %v7756_v44  ;;  %v7064_v60 = vpop.f32.mrb[51].mxu1 }
 0x5f1   : > { %v6826_v5 = vcombine.low %v4821_v24, %v4828_v35  ;;  %v6828_v63 = vcombine.high %v4821_v24, %v4828_v35  ;;  %v6830_v42 = vcombine.low %v4837_v47, %v4844_v34  ;;  %v6832_v53 = vcombine.high %v4837_v47, %v4844_v34 }
 0x5f2   : > { %v4950_v8 = vcombine.high %v4893_v45, %v4909_v14  ;;  %v4982_v52 = vcombine.high %v4925_v20, %v4941_v62  ;;  %v4949_v3 = vcombine.low %v4893_v45, %v4909_v14  ;;  %v4981_v38 = vcombine.low %v4925_v20, %v4941_v62 }
 0x5f3   : > { %v5029_v32 = vrot.slane %v6826_v5, %v7756_v44  ;;  %v5045_v27 = vrot.slane %v6828_v63, %v7756_v44  ;;  %v5061_v31 = vrot.slane %v6830_v42, %v7756_v44  ;;  %v5077_v54 = vrot.slane %v6832_v53, %v7756_v44 }
 0x5f4   : > { %v4964_v22 = vrot.slane %v4950_v8, %v7760_v49  ;;  %v4996_v46 = vrot.slane %v4982_v52, %v7760_v49  ;;  %v9125_v57 = vrot.slane %v4949_v3, %v7760_v49  ;;  %v9128_v30 = vrot.slane %v4981_v38, %v7760_v49 }
 0x5f5   : > { %v5086_v48 = vcombine.high %v5029_v32, %v5045_v27  ;;  %v5118_v25 = vcombine.high %v5061_v31, %v5077_v54  ;;  %v5085_v0 = vcombine.low %v5029_v32, %v5045_v27  ;;  %v5117_v2 = vcombine.low %v5061_v31, %v5077_v54 }
 0x5f6   : > { %v5015_v43 = vcombine.low %v4964_v22, %v4996_v46  ;;  %v5014_v40 = vcombine.high %v9125_v57, %v9128_v30  ;;  %v5016_v23 = vcombine.high %v4964_v22, %v4996_v46  ;;  %v5013_v59 = vcombine.low %v9125_v57, %v9128_v30 }
 0x5f7   : > { %v5100_v17 = vrot.slane %v5086_v48, %v7760_v49  ;;  %v5132_v33 = vrot.slane %v5118_v25, %v7760_v49  ;;  %v9137_v26 = vrot.slane %v5085_v0, %v7760_v49  ;;  %v9140_v21 = vrot.slane %v5117_v2, %v7760_v49 }
 0x5f9   : > { %v5151_v61 = vcombine.low %v5100_v17, %v5132_v33  ;;  %v5150_v37 = vcombine.high %v9137_v26, %v9140_v21  ;;  %v5152_v39 = vcombine.high %v5100_v17, %v5132_v33  ;;  %v5149_v4 = vcombine.low %v9137_v26, %v9140_v21  ;;  %v6461_v26 = vld [vmem:[%s9492_s9 + $0xb8] sm:$0xff] }
 0x5fb   : > { %v7247_v15 = vpack.i.bf16 %v5151_v61, %v5015_v43  ;;  %v7242_v29 = vpack.i.bf16 %v5150_v37, %v5014_v40  ;;  %v7252_v9 = vpack.i.bf16 %v5152_v39, %v5016_v23 }
 0x5fd   : > { %7248 = vrot.lane.b32.xlu1 %v7247_v15, %s9591_s26  ;;  %7243 = vrot.lane.b32.xlu0 %v7242_v29, %s9592_s1 }
 0x601   : > { %7253 = vrot.lane.b32.xlu1 %v7252_v9, %s9589_s21 }
 0x613   : > { %v4518_v28 = vpop.f32.mrb[52].mxu1 }
 0x614   : > { %v7069_v10 = vpop.f32.mrb[53].mxu1 }
 0x615   : > { %v4521_v16 = vpop.f32.mrb[54].mxu1 }
 0x616   : > { %v7070_v36 = vpop.f32.mrb[55].mxu1 }
 0x61b   : > { %v4562_v41 = vpop.f32.mrb[56].mxu1 }
 0x61c   : > { %v4645_v13 = vcombine.low %v9106_v50, %v4562_v41  ;;  %v4646_v56 = vcombine.high %v9106_v50, %v4562_v41  ;;  %v7075_v7 = vpop.f32.mrb[57].mxu1 }
 0x61d   : > { %v4565_v58 = vpop.f32.mrb[58].mxu1 }
 0x61e   : > { %v4781_v12 = vcombine.low %v9112_v18, %v4565_v58  ;;  %v4782_v55 = vcombine.high %v9112_v18, %v4565_v58  ;;  %v7076_v11 = vpop.f32.mrb[59].mxu1  ;;  %v4653_v47 = vrot.slane %v4645_v13, %v7756_v44  ;;  %v4660_v34 = vrot.slane %v4646_v56, %v7756_v44 }
 0x620   : > { %v4789_v38 = vrot.slane %v4781_v12, %v7756_v44  ;;  %v4796_v32 = vrot.slane %v4782_v55, %v7756_v44 }
 0x623   : > { %v4606_v1 = vpop.f32.mrb[60].mxu1 }
 0x624   : > { %v4661_v19 = vcombine.low %v4518_v28, %v4606_v1  ;;  %v4662_v24 = vcombine.high %v4518_v28, %v4606_v1  ;;  %v7081_v35 = vpop.f32.mrb[61].mxu1 }
 0x625   : > { %v4609_v45 = vpop.f32.mrb[62].mxu1  ;;  %v5430_v14 = vpop.f32.mrb[40].mxu0 }
 0x626   : > { %v4669_v20 = vrot.slane %v4661_v19, %v7756_v44  ;;  %v4676_v50 = vrot.slane %v4662_v24, %v7756_v44  ;;  %v4797_v62 = vcombine.low %v4521_v16, %v4609_v45  ;;  %v4798_v60 = vcombine.high %v4521_v16, %v4609_v45  ;;  %v7082_v5 = vpop.f32.mrb[63].mxu1  ;;  %v7087_v63 = vpop.f32.mrb[41].mxu0 }
 0x627   : > { %v5433_v18 = vpop.f32.mrb[42].mxu0 }
 0x628   : > { %v4709_v42 = vcombine.low %v4653_v47, %v4669_v20  ;;  %v4710_v53 = vcombine.high %v4653_v47, %v4669_v20  ;;  %v4725_v8 = vcombine.low %v4660_v34, %v4676_v50  ;;  %v4726_v52 = vcombine.high %v4660_v34, %v4676_v50  ;;  %v7088_v3 = vpop.f32.mrb[43].mxu0 }
 0x629   : > { %v4805_v27 = vrot.slane %v4797_v62, %v7756_v44  ;;  %v4812_v31 = vrot.slane %v4798_v60, %v7756_v44 }
 0x62a   : > { %v4717_v54 = vrot.slane %v4709_v42, %v7760_v49  ;;  %v4724_v22 = vrot.slane %v4710_v53, %v7760_v49  ;;  %v4733_v46 = vrot.slane %v4725_v8, %v7760_v49  ;;  %v4740_v48 = vrot.slane %v4726_v52, %v7760_v49 }
 0x62b   : > { %v4845_v25 = vcombine.low %v4789_v38, %v4805_v27  ;;  %v4846_v0 = vcombine.high %v4789_v38, %v4805_v27  ;;  %v4861_v2 = vcombine.low %v4796_v32, %v4812_v31  ;;  %v4862_v43 = vcombine.high %v4796_v32, %v4812_v31  ;;  %v5473_v40 = vpop.f32.mrb[64].mxu1 }
 0x62c   : > { %v6819_v23 = vcombine.low %v4717_v54, %v4724_v22  ;;  %v6821_v17 = vcombine.high %v4717_v54, %v4724_v22  ;;  %v6823_v33 = vcombine.low %v4733_v46, %v4740_v48  ;;  %v6825_v61 = vcombine.high %v4733_v46, %v4740_v48  ;;  %v7093_v37 = vpop.f32.mrb[65].mxu1 }
 0x62d   : > { %v4853_v39 = vrot.slane %v4845_v25, %v7760_v49  ;;  %v4860_v15 = vrot.slane %v4846_v0, %v7760_v49  ;;  %v4869_v29 = vrot.slane %v4861_v2, %v7760_v49  ;;  %v4876_v9 = vrot.slane %v4862_v43, %v7760_v49  ;;  %v5476_v28 = vpop.f32.mrb[66].mxu1  ;;  %v5516_v10 = vpop.f32.mrb[44].mxu0 }
 0x62e   : > { %v4900_v16 = vrot.slane %v6819_v23, %v7756_v44  ;;  %v4916_v36 = vrot.slane %v6821_v17, %v7756_v44  ;;  %v4932_v41 = vrot.slane %v6823_v33, %v7756_v44  ;;  %v4948_v13 = vrot.slane %v6825_v61, %v7756_v44  ;;  %v7094_v56 = vpop.f32.mrb[67].mxu1  ;;  %v7099_v7 = vpop.f32.mrb[45].mxu0 }
 0x62f   : > { %v6827_v58 = vcombine.low %v4853_v39, %v4860_v15  ;;  %v6829_v12 = vcombine.high %v4853_v39, %v4860_v15  ;;  %v6831_v55 = vcombine.low %v4869_v29, %v4876_v9  ;;  %v6833_v11 = vcombine.high %v4869_v29, %v4876_v9  ;;  %v5519_v1 = vpop.f32.mrb[46].mxu0 }
 0x630   : > { %v6081_v19 = vcombine.low %v5430_v14, %v5516_v10  ;;  %v6082_v24 = vcombine.high %v5430_v14, %v5516_v10  ;;  %v7100_v35 = vpop.f32.mrb[47].mxu0  ;;  %v4965_v47 = vcombine.low %v4900_v16, %v4916_v36  ;;  %v4997_v34 = vcombine.low %v4932_v41, %v4948_v13 }
 0x631   : > { %v5036_v45 = vrot.slane %v6827_v58, %v7756_v44  ;;  %v5052_v20 = vrot.slane %v6829_v12, %v7756_v44  ;;  %v5068_v50 = vrot.slane %v6831_v55, %v7756_v44  ;;  %v5084_v62 = vrot.slane %v6833_v11, %v7756_v44 }
 0x632   : > { %v9178_v60 = vrot.slane %v6081_v19, %v7756_v44  ;;  %v9181_v5 = vrot.slane %v6082_v24, %v7756_v44  ;;  %v4973_v63 = vrot.slane %v4965_v47, %v7760_v49  ;;  %v5005_v14 = vrot.slane %v4997_v34, %v7760_v49 }
 0x633   : > { %v5559_v18 = vpop.f32.mrb[68].mxu1  ;;  %v5101_v42 = vcombine.low %v5036_v45, %v5052_v20  ;;  %v5133_v53 = vcombine.low %v5068_v50, %v5084_v62  ;;  %v4966_v8 = vcombine.high %v4900_v16, %v4916_v36  ;;  %v4998_v52 = vcombine.high %v4932_v41, %v4948_v13 }
 0x634   : > { %v6097_v3 = vcombine.low %v5473_v40, %v5559_v18  ;;  %v6098_v38 = vcombine.high %v5473_v40, %v5559_v18  ;;  %v7105_v32 = vpop.f32.mrb[69].mxu1  ;;  %v5018_v27 = vcombine.high %v4973_v63, %v5005_v14  ;;  %v5017_v31 = vcombine.low %v4973_v63, %v5005_v14 }
 0x635   : > { %v5562_v54 = vpop.f32.mrb[70].mxu1  ;;  %v5602_v22 = vpop.f32.mrb[48].mxu0  ;;  %v5109_v46 = vrot.slane %v5101_v42, %v7760_v49  ;;  %v5141_v48 = vrot.slane %v5133_v53, %v7760_v49  ;;  %v4980_v25 = vrot.slane %v4966_v8, %v7760_v49  ;;  %v5012_v0 = vrot.slane %v4998_v52, %v7760_v49 }
 0x636   : > { %v6105_v2 = vrot.slane %v6097_v3, %v7756_v44  ;;  %v9191_v43 = vrot.slane %v6098_v38, %v7756_v44  ;;  %v7106_v23 = vpop.f32.mrb[71].mxu1  ;;  %v7111_v40 = vpop.f32.mrb[49].mxu0  ;;  %v5102_v17 = vcombine.high %v5036_v45, %v5052_v20  ;;  %v5134_v33 = vcombine.high %v5068_v50, %v5084_v62 }
 0x637   : > { %v5605_v61 = vpop.f32.mrb[50].mxu0  ;;  %v5154_v37 = vcombine.high %v5109_v46, %v5141_v48  ;;  %v5153_v39 = vcombine.low %v5109_v46, %v5141_v48  ;;  %v5020_v15 = vcombine.high %v4980_v25, %v5012_v0  ;;  %v5019_v29 = vcombine.low %v4980_v25, %v5012_v0 }
 0x638   : > { %v6145_v9 = vcombine.low %v9178_v60, %v6105_v2  ;;  %v6146_v28 = vcombine.high %v9178_v60, %v6105_v2  ;;  %v6161_v10 = vcombine.low %v9181_v5, %v9191_v43  ;;  %v6162_v16 = vcombine.high %v9181_v5, %v9191_v43  ;;  %v7112_v36 = vpop.f32.mrb[51].mxu0 }
 0x639   : > { %v7262_v41 = vpack.i.bf16 %v5154_v37, %v5018_v27  ;;  %v7257_v13 = vpack.i.bf16 %v5153_v39, %v5017_v31  ;;  %v5116_v56 = vrot.slane %v5102_v17, %v7760_v49  ;;  %v5148_v7 = vrot.slane %v5134_v33, %v7760_v49 }
 0x63a   : > { %v9210_v25 = vrot.slane %v6145_v9, %v7760_v49  ;;  %v9213_v0 = vrot.slane %v6146_v28, %v7760_v49  ;;  %v9216_v2 = vrot.slane %v6161_v10, %v7760_v49  ;;  %v9231_v33 = vrot.slane %v6162_v16, %v7760_v49 }
 0x63b   : > { %7263 = vrot.lane.b32.xlu1 %v7262_v41, %s9554_s29  ;;  %7258 = vrot.lane.b32.xlu0 %v7257_v13, %s9585_s24  ;;  %v5645_v58 = vpop.f32.mrb[72].mxu1  ;;  %v5156_v12 = vcombine.high %v5116_v56, %v5148_v7  ;;  %v5155_v55 = vcombine.low %v5116_v56, %v5148_v7 }
 0x63c   : > { %v7117_v11 = vpop.f32.mrb[73].mxu1 }
 0x63d   : > { %v5648_v1 = vpop.f32.mrb[74].mxu1  ;;  %v5688_v19 = vpop.f32.mrb[52].mxu0  ;;  %v7272_v24 = vpack.i.bf16 %v5156_v12, %v5020_v15  ;;  %v7267_v35 = vpack.i.bf16 %v5155_v55, %v5019_v29 }
 0x63e   : > { %v6113_v47 = vcombine.low %v5602_v22, %v5688_v19  ;;  %v6114_v34 = vcombine.high %v5602_v22, %v5688_v19  ;;  %v7123_v45 = vpop.f32.mrb[53].mxu0  ;;  %v7118_v20 = vpop.f32.mrb[75].mxu1 }
 0x63f   : > { %7273 = vrot.lane.b32.xlu1 %v7272_v24, %s9551_s19  ;;  %7268 = vrot.lane.b32.xlu0 %v7267_v35, %s9553_s28  ;;  %v5691_v50 = vpop.f32.mrb[54].mxu0  ;;  %s7478_s19 = smov 8  }
 0x640   : > { %v7124_v62 = vpop.f32.mrb[55].mxu0  ;;  %v6121_v53 = vrot.slane %v6113_v47, %v7756_v44  ;;  %v6128_v8 = vrot.slane %v6114_v34, %v7756_v44 }
 0x643   : > { %v5731_v60 = vpop.f32.mrb[76].mxu1 }
 0x644   : > { %v6129_v5 = vcombine.low %v5645_v58, %v5731_v60  ;;  %v6130_v63 = vcombine.high %v5645_v58, %v5731_v60  ;;  %v7129_v14 = vpop.f32.mrb[77].mxu1 }
 0x645   : > { %v5734_v18 = vpop.f32.mrb[78].mxu1  ;;  %v5774_v42 = vpop.f32.mrb[56].mxu0 }
 0x646   : > { %v6137_v52 = vrot.slane %v6129_v5, %v7756_v44  ;;  %v6144_v3 = vrot.slane %v6130_v63, %v7756_v44  ;;  %v7130_v38 = vpop.f32.mrb[79].mxu1  ;;  %v7135_v32 = vpop.f32.mrb[57].mxu0 }
 0x647   : > { %v5777_v27 = vpop.f32.mrb[58].mxu0 }
 0x648   : > { %v6177_v31 = vcombine.low %v6121_v53, %v6137_v52  ;;  %v6178_v54 = vcombine.high %v6121_v53, %v6137_v52  ;;  %v6193_v22 = vcombine.low %v6128_v8, %v6144_v3  ;;  %v6194_v46 = vcombine.high %v6128_v8, %v6144_v3  ;;  %v7136_v48 = vpop.f32.mrb[59].mxu0 }
 0x64a   : > { %v9219_v43 = vrot.slane %v6177_v31, %v7760_v49  ;;  %v9222_v23 = vrot.slane %v6178_v54, %v7760_v49  ;;  %v9225_v40 = vrot.slane %v6193_v22, %v7760_v49  ;;  %v9228_v17 = vrot.slane %v6194_v46, %v7760_v49 }
 0x64b   : > { %v5817_v61 = vpop.f32.mrb[80].mxu1 }
 0x64c   : > { %v6209_v37 = vcombine.low %v9210_v25, %v9219_v43  ;;  %v7141_v39 = vpop.f32.mrb[81].mxu1  ;;  %v6211_v15 = vcombine.low %v9213_v0, %v9222_v23  ;;  %v6210_v29 = vcombine.high %v9210_v25, %v9219_v43  ;;  %v6213_v9 = vcombine.low %v9216_v2, %v9225_v40 }
 0x64d   : > { %v5820_v28 = vpop.f32.mrb[82].mxu1  ;;  %v5860_v10 = vpop.f32.mrb[60].mxu0  ;;  %v6212_v16 = vcombine.high %v9213_v0, %v9222_v23  ;;  %v6215_v36 = vcombine.low %v9231_v33, %v9228_v17  ;;  %v6214_v41 = vcombine.high %v9216_v2, %v9225_v40  ;;  %v6216_v13 = vcombine.high %v9231_v33, %v9228_v17  ;;  %v6438_v0 = vld [vmem:[%s9492_s9] sm:$0xff]  ;;  %v6439_v23 = vld [vmem:[%s9492_s9 + $0x8] sm:$0xff]  ;;  %v6440_v2 = vld [vmem:[%s9492_s9 + $0x10] sm:$0xff] }
 0x64e   : > { %v6217_v56 = vcombine.low %v5774_v42, %v5860_v10  ;;  %v6218_v7 = vcombine.high %v5774_v42, %v5860_v10  ;;  %v7142_v58 = vpop.f32.mrb[83].mxu1  ;;  %v7147_v12 = vpop.f32.mrb[61].mxu0  ;;  %v6441_v40 = vld [vmem:[%s9492_s9 + $0x18] sm:$0xff]  ;;  %v6442_v33 = vld [vmem:[%s9492_s9 + $0x20] sm:$0xff] }
 0x64f   : > { %v5863_v55 = vpop.f32.mrb[62].mxu0  ;;  %v6463_v17 = vpack.c.bf16 %v6441_v40, %v6440_v2 }
 0x650   : > { %v7148_v11 = vpop.f32.mrb[63].mxu0  ;;  %v6225_v45 = vrot.slane %v6217_v56, %v7756_v44  ;;  %v6232_v20 = vrot.slane %v6218_v7, %v7756_v44 }
 0x653   : > { %v5903_v1 = vpop.f32.mrb[84].mxu1 }
 0x654   : > { %v6233_v19 = vcombine.low %v5817_v61, %v5903_v1  ;;  %v6234_v24 = vcombine.high %v5817_v61, %v5903_v1  ;;  %v7153_v35 = vpop.f32.mrb[85].mxu1 }
 0x655   : > { %v5906_v47 = vpop.f32.mrb[86].mxu1  ;;  %v5946_v34 = vpop.f32.mrb[64].mxu0 }
 0x656   : > { %v6241_v50 = vrot.slane %v6233_v19, %v7756_v44  ;;  %v6248_v62 = vrot.slane %v6234_v24, %v7756_v44  ;;  %v7154_v60 = vpop.f32.mrb[87].mxu1  ;;  %v7159_v5 = vpop.f32.mrb[65].mxu0 }
 0x657   : > { %v5949_v63 = vpop.f32.mrb[66].mxu0 }
 0x658   : > { %v6281_v14 = vcombine.low %v6225_v45, %v6241_v50  ;;  %v6282_v18 = vcombine.high %v6225_v45, %v6241_v50  ;;  %v6297_v42 = vcombine.low %v6232_v20, %v6248_v62  ;;  %v6298_v53 = vcombine.high %v6232_v20, %v6248_v62  ;;  %v7160_v8 = vpop.f32.mrb[67].mxu0 }
 0x65a   : > { %v9258_v47 = vrot.slane %v6281_v14, %v7760_v49  ;;  %v6305_v45 = vrot.slane %v6297_v42, %v7760_v49  ;;  %v6312_v60 = vrot.slane %v6298_v53, %v7760_v49 }
 0x65b   : > { %v5989_v52 = vpop.f32.mrb[88].mxu1 }
 0x65c   : > { %v7165_v3 = vpop.f32.mrb[89].mxu1 }
 0x65d   : > { %v5992_v38 = vpop.f32.mrb[90].mxu1  ;;  %v6032_v32 = vpop.f32.mrb[68].mxu0 }
 0x65e   : > { %v6249_v27 = vcombine.low %v5946_v34, %v6032_v32  ;;  %v6250_v31 = vcombine.high %v5946_v34, %v6032_v32  ;;  %v7166_v54 = vpop.f32.mrb[91].mxu1  ;;  %v7171_v22 = vpop.f32.mrb[69].mxu0  ;;  %v6296_v34 = vrot.slane %v6282_v18, %v7760_v49 }
 0x65f   : > { %v6035_v46 = vpop.f32.mrb[70].mxu0  ;;  %v6446_v54 = vld [vmem:[%s9492_s9 + $0x40] sm:$0xff]  ;;  %v6447_v22 = vld [vmem:[%s9492_s9 + $0x48] sm:$0xff] }
 0x660   : > { %v7172_v48 = vpop.f32.mrb[71].mxu0  ;;  %v6257_v7 = vrot.slane %v6249_v27, %v7756_v44  ;;  %v6264_v58 = vrot.slane %v6250_v31, %v7756_v44  ;;  %v6466_v46 = vpack.c.bf16 %v6447_v22, %v6446_v54 }
 0x661   : > { %v6448_v48 = vld [vmem:[%s9492_s9 + $0x50] sm:$0xff] }
 0x663   : > { %v6075_v61 = vpop.f32.mrb[92].mxu1 }
 0x664   : > { %v6265_v39 = vcombine.low %v5989_v52, %v6075_v61  ;;  %v6266_v28 = vcombine.high %v5989_v52, %v6075_v61  ;;  %v7177_v10 = vpop.f32.mrb[93].mxu1  ;;  %v6449_v61 = vld [vmem:[%s9492_s9 + $0x58] sm:$0xff] }
 0x665   : > { %v6078_v56 = vpop.f32.mrb[94].mxu1  ;;  %v6451_v10 = vld [vmem:[%s9492_s9 + $0x68] sm:$0xff] }
 0x666   : > { %v6273_v12 = vrot.slane %v6265_v39, %v7756_v44  ;;  %v6280_v55 = vrot.slane %v6266_v28, %v7756_v44  ;;  %v7178_v11 = vpop.f32.mrb[95].mxu1  ;;  %v6467_v39 = vpack.c.bf16 %v6449_v61, %v6448_v48  ;;  %v6450_v28 = vld [vmem:[%s9492_s9 + $0x60] sm:$0xff] }
 0x667   : > { %v6468_v56 = vpack.c.bf16 %v6451_v10, %v6450_v28  ;;  %v6455_v11 = vld [vmem:[%s9492_s9 + $0x88] sm:$0xff] }
 0x668   : > { %v6313_v1 = vcombine.low %v6257_v7, %v6273_v12  ;;  %v6314_v19 = vcombine.high %v6257_v7, %v6273_v12  ;;  %v6329_v24 = vcombine.low %v6264_v58, %v6280_v55  ;;  %v6330_v35 = vcombine.high %v6264_v58, %v6280_v55  ;;  %v6452_v7 = vld [vmem:[%s9492_s9 + $0x70] sm:$0xff]  ;;  %v6453_v58 = vld [vmem:[%s9492_s9 + $0x78] sm:$0xff]  ;;  %v6454_v55 = vld [vmem:[%s9492_s9 + $0x80] sm:$0xff] }
 0x669   : > { %v6469_v12 = vpack.c.bf16 %v6453_v58, %v6452_v7 }
 0x66a   : > { %v9263_v20 = vrot.slane %v6313_v1, %v7760_v49  ;;  %v6328_v50 = vrot.slane %v6314_v19, %v7760_v49  ;;  %v6337_v62 = vrot.slane %v6329_v24, %v7760_v49  ;;  %v6344_v44 = vrot.slane %v6330_v35, %v7760_v49  ;;  %v6456_v19 = vld [vmem:[%s9492_s9 + $0x90] sm:$0xff]  ;;  %v6457_v24 = vld [vmem:[%s9492_s9 + $0x98] sm:$0xff] }
 0x66b   : > { %v6470_v1 = vpack.c.bf16 %v6455_v11, %v6454_v55  ;;  %v6471_v35 = vpack.c.bf16 %v6457_v24, %v6456_v19 }
 0x66c   : > { %v6345_v5 = vcombine.low %v9258_v47, %v9263_v20  ;;  %v6347_v63 = vcombine.low %v6296_v34, %v6328_v50  ;;  %v6346_v14 = vcombine.high %v9258_v47, %v9263_v20  ;;  %v6349_v18 = vcombine.low %v6305_v45, %v6337_v62 }
 0x66d   : > { %v6348_v42 = vcombine.high %v6296_v34, %v6328_v50  ;;  %v6351_v8 = vcombine.low %v6312_v60, %v6344_v44  ;;  %v6350_v52 = vcombine.high %v6305_v45, %v6337_v62  ;;  %v6352_v3 = vcombine.high %v6312_v60, %v6344_v44  ;;  %v6458_v34 = vld [vmem:[%s9492_s9 + $0xa0] sm:$0xff]  ;;  %v6459_v45 = vld [vmem:[%s9492_s9 + $0xa8] sm:$0xff] }
 0x66e   : > { %v7282_v38 = vpack.i.bf16 %v6347_v63, %v6211_v15  ;;  %v7277_v49 = vpack.i.bf16 %v6346_v14, %v6210_v29  ;;  %v7292_v53 = vpack.i.bf16 %v6349_v18, %v6213_v9  ;;  %v6462_v9 = vpack.c.bf16 %v6439_v23, %v6438_v0 }
 0x66f   : > { %v7287_v32 = vpack.i.bf16 %v6348_v42, %v6212_v16  ;;  %v7302_v27 = vpack.i.bf16 %v6351_v8, %v6215_v36  ;;  %v7297_v15 = vpack.i.bf16 %v6350_v52, %v6214_v41  ;;  %v7307_v29 = vpack.i.bf16 %v6352_v3, %v6216_v13  ;;  %v6443_v16 = vld [vmem:[%s9492_s9 + $0x28] sm:$0xff]  ;;  %v6444_v41 = vld [vmem:[%s9492_s9 + $0x30] sm:$0xff]  ;;  %v6445_v13 = vld [vmem:[%s9492_s9 + $0x38] sm:$0xff]  ;;  %v7249_v62 = vpop.permute.xlu1 %7248  ;;  %v7244_v44 = vpop.permute.xlu0 %7243 }
 0x670   : > { %7283 = vrot.lane.b32.xlu1 %v7282_v38, %s9592_s1  ;;  %7278 = vrot.lane.b32.xlu0 %v7277_v49, %s7478_s19  ;;  %s7479_s1 = smov 24   ;;  %v6464_v36 = vpack.c.bf16 %v6443_v16, %v6442_v33  ;;  %v6465_v31 = vpack.c.bf16 %v6445_v13, %v6444_v41  ;;  %v6472_v50 = vpack.c.bf16 %v6459_v45, %v6458_v34  ;;  %v7245_v60 = vunpack.i.l.bf16 %v7244_v44 }
 0x671   : > { %6485 = vmatpush1.bf16.msra.mxu0 %v6462_v9  ;;  %v7246_v63 = vunpack.i.h.bf16 %v7244_v44  ;;  %v7250_v18 = vunpack.i.l.bf16 %v7249_v62  ;;  %v7251_v42 = vunpack.i.h.bf16 %v7249_v62 }
 0x672   : > { %6486 = vmatprep.subr.bf16.mxu0 %v9601_v51  ;;  %v5213_v8 = vsel %vm538_vm0, %v5013_v59, %v7245_v60 }
 0x673   : > { %v7254_v14 = vpop.permute.xlu1 %7253  ;;  %v5214_v3 = vsel %vm538_vm0, %v5149_v4, %v7246_v63  ;;  %v5216_v38 = vsel %vm5215_vm10, %v5213_v8, %v7250_v18 }
 0x674   : > { %7293 = vrot.lane.b32.xlu1 %v7292_v53, %s9591_s26  ;;  %7288 = vrot.lane.b32.xlu0 %v7287_v32, %s7479_s1  ;;  %s7481_s1 = smov 56   ;;  %v7255_v52 = vunpack.i.l.bf16 %v7254_v14  ;;  %v5217_v32 = vsel %vm5215_vm10, %v5214_v3, %v7251_v42 }
 0x675   : > { %6487 = vmatpush1.bf16.msra.mxu0 %v6463_v17 }
 0x676   : > { %6488 = vmatprep.subr.bf16.mxu0 %v9601_v51  ;;  %v5219_v57 = vsel %vm5218_vm11, %v5216_v38, %v7255_v52 }
 0x678   : > { %7303 = vrot.lane.b32.xlu1 %v7302_v27, %s9589_s21  ;;  %7298 = vrot.lane.b32.xlu0 %v7297_v15, %s7480_s2  ;;  %v6460_v27 = vld [vmem:[%s9492_s9 + $0xb0] sm:$0xff]  ;;  %s6863_s2 = sshll.u32 %s7578_s16, 8  ;;  %s7482_s21 = smov [#allocation4]  }
 0x679   : > { %6489 = vmatpush1.bf16.msra.mxu0 %v6464_v36  ;;  %s7403_s28 = sshll.u32 %s7482_s21, 4  ;;  %s7404_s28 = int_to_ptr.vmem [resolvable:$false] %s7403_s28 }
 0x67a   : > { %6490 = vmatprep.subr.bf16.mxu0 %v9601_v51 }
 0x67c   : > { %7308 = vrot.lane.b32.xlu0 %v7307_v29, %s7481_s1  ;;  %v6473_v29 = vpack.c.bf16 %v6461_v26, %v6460_v27  ;;  %v6850_v27 = vld [vmem:[%s9493_s10] ss:$0 sm:$0xff] }
 0x67d   : > { %6491 = vmatpush1.bf16.msra.mxu0 %v6465_v31 }
 0x67e   : > { %6492 = vmatprep.subr.bf16.mxu0 %v9601_v51 }
 0x681   : > { %6493 = vmatpush1.bf16.msra.mxu0 %v6466_v46 }
 0x682   : > { %6494 = vmatprep.subr.bf16.mxu0 %v9601_v51 }
 0x685   : > { %6495 = vmatpush1.bf16.msra.mxu0 %v6467_v39 }
 0x686   : > { %6496 = vmatprep.subr.bf16.mxu0 %v9601_v51 }
 0x689   : > { %6497 = vmatpush1.bf16.msra.mxu0 %v6468_v56 }
 0x68a   : > { %6498 = vmatprep.subr.bf16.mxu0 %v9601_v51 }
 0x68d   : > { %6499 = vmatpush1.bf16.msra.mxu0 %v6469_v12 }
 0x68e   : > { %6500 = vmatprep.subr.bf16.mxu0 %v9601_v51 }
 0x691   : > { %6501 = vmatpush1.bf16.msra.mxu0 %v6470_v1 }
 0x692   : > { %6502 = vmatprep.subr.bf16.mxu0 %v9601_v51 }
 0x695   : > { %6503 = vmatpush1.bf16.msra.mxu0 %v6471_v35 }
 0x696   : > { %6504 = vmatprep.subr.bf16.mxu0 %v9601_v51 }
 0x699   : > { %6505 = vmatpush1.bf16.msra.mxu0 %v6472_v50 }
 0x69a   : > { %6506 = vmatprep.subr.bf16.mxu0 %v9601_v51  ;;  %v7256_v51 = vunpack.i.h.bf16 %v7254_v14 }
 0x69c   : > { %v5220_v21 = vsel %vm5218_vm11, %v5217_v32, %v7256_v51 }
 0x69d   : > { %6507 = vmatpush1.bf16.msra.mxu0 %v6473_v29  ;;  %v9615_v29 = vld [vmem:[#allocation16_spill] sm:$0xff] }
 0x6ad   : > { %v7264_v49 = vpop.permute.xlu1 %7263  ;;  %v7259_v53 = vpop.permute.xlu0 %7258 }
 0x6ae   : > { %v7261_v30 = vunpack.i.h.bf16 %v7259_v53  ;;  %v7260_v59 = vunpack.i.l.bf16 %v7259_v53  ;;  %v7266_v4 = vunpack.i.h.bf16 %v7264_v49  ;;  %v7265_v15 = vunpack.i.l.bf16 %v7264_v49 }
 0x6b0   : > { %v5222_v0 = vsel %vm5221_vm12, %v5219_v57, %v7260_v59  ;;  %v5223_v23 = vsel %vm5221_vm12, %v5220_v21, %v7261_v30 }
 0x6b1   : > { %v7274_v9 = vpop.permute.xlu1 %7273  ;;  %v7269_v2 = vpop.permute.xlu0 %7268  ;;  %v5225_v36 = vsel %vm5224_vm13, %v5222_v0, %v7265_v15  ;;  %v5226_v41 = vsel %vm5224_vm13, %v5223_v23, %v7266_v4 }
 0x6b2   : > { %v7276_v40 = vunpack.i.h.bf16 %v7274_v9  ;;  %v7275_v17 = vunpack.i.l.bf16 %v7274_v9  ;;  %v7271_v33 = vunpack.i.h.bf16 %v7269_v2  ;;  %v7270_v16 = vunpack.i.l.bf16 %v7269_v2 }
 0x6b4   : > { %v5228_v13 = vsel %vm5227_vm14, %v5225_v36, %v7270_v16  ;;  %v5229_v31 = vsel %vm5227_vm14, %v5226_v41, %v7271_v33  ;;  %v7386_v16 = vld [vmem:[%s7631_s27 + $0x8] sm:$0xff] }
 0x6b5   : > { %v5231_v54 = vsel %vm5230_vm15, %v5228_v13, %v7275_v17  ;;  %v5232_v22 = vsel %vm5230_vm15, %v5229_v31, %v7276_v40  ;;  %v7385_v40 = vld [vmem:[%s7631_s27] sm:$0xff]  ;;  %s467_s27 = sand.u32 1, %s7455_s14  }
 0x6b6   : > { %v7312_v46 = vpack.i.bf16 %v5232_v22, %v5231_v54  ;;  %s6701_s29 = sshll.u32 %s467_s27, 4  ;;  %s9441_s1 = scalar_lea.sflag [#allocation5], %s467_s27 }
 0x6b7   : > { %s469_s26 = scalar_lea.vmem [#allocation4], %s6701_s29  ;;  %s7405_s29 = scalar_lea.vmem %s7404_s28, 512 }
 0x6b8   : > { %7313 = vrot.lane.b32.xlu1 %v7312_v46, %s9585_s24  ;;  %s6590_s17 = sshll.u32 %s469_s26, 4  ;;  %s9436_s24 = scalar_lea.hbm %s9496_s13, %s6863_s2  ;;  %s9438_s17 = int_to_ptr.vmem [resolvable:$true] %s6590_s17 }
 0x6b9   : > { %s7399_s16 = scalar_lea.vmem %s9438_s17, 256  ;;  %p7406_p5 = scmp.lt.s32.totalorder %s9438_s17, %s7404_s28 }
 0x6ba   : > { %p7400_p2 = scmp.ne.s32.totalorder %s9438_s17, %s7399_s16  ;;  %p7407_p6 = scmp.lt.s32.totalorder %s7405_s29, %s7399_s16 }
 0x6bc   : > { %p7401_p3 = pnand %p7400_p2, %p7595_p10  ;;  %p7408_p7 = por %p7407_p6, %p7406_p5 }
 0x6be   : > { %p7402_p4 = pneg %p7401_p3 }
 0x6c0   : > { %p7409_p8 = pnand %p7408_p7, %p7402_p4 }
 0x6e2   : > { %v7279_v48 = vpop.permute.xlu0 %7278  ;;  %v7284_v61 = vpop.permute.xlu1 %7283 }
 0x6e3   : > { %v7281_v28 = vunpack.i.h.bf16 %v7279_v48  ;;  %v7280_v10 = vunpack.i.l.bf16 %v7279_v48  ;;  %v7286_v7 = vunpack.i.h.bf16 %v7284_v61  ;;  %v7285_v58 = vunpack.i.l.bf16 %v7284_v61 }
 0x6e5   : > { %v6410_v55 = vsel %vm2816_vm5, %v6345_v5, %v7281_v28  ;;  %v6409_v11 = vsel %vm2816_vm5, %v6209_v37, %v7280_v10 }
 0x6e6   : > { %v7289_v39 = vpop.permute.xlu0 %7288  ;;  %v7294_v56 = vpop.permute.xlu1 %7293  ;;  %v6411_v34 = vsel %vm538_vm0, %v6409_v11, %v7285_v58  ;;  %v6412_v45 = vsel %vm538_vm0, %v6410_v55, %v7286_v7 }
 0x6e7   : > { %v7291_v1 = vunpack.i.h.bf16 %v7289_v39  ;;  %v7290_v19 = vunpack.i.l.bf16 %v7289_v39  ;;  %v7296_v24 = vunpack.i.h.bf16 %v7294_v56  ;;  %v7295_v35 = vunpack.i.l.bf16 %v7294_v56 }
 0x6e9   : > { %v6414_v50 = vsel %vm6413_vm1, %v6411_v34, %v7290_v19  ;;  %v6415_v62 = vsel %vm6413_vm1, %v6412_v45, %v7291_v1  ;;  %v6852_v1 = vld [vmem:[%s9494_s11] ss:$0 sm:$0xff] }
 0x6ea   : > { %v7299_v12 = vpop.permute.xlu0 %7298  ;;  %v7304_v44 = vpop.permute.xlu1 %7303  ;;  %v6416_v43 = vsel %vm5215_vm10, %v6414_v50, %v7295_v35  ;;  %v6417_v37 = vsel %vm5215_vm10, %v6415_v62, %v7296_v24  ;;  %v6853_v24 = vld [vmem:[%s9495_s12] ss:$0 sm:$0xff] }
 0x6eb   : > { %v7301_v47 = vunpack.i.h.bf16 %v7299_v12  ;;  %v7300_v20 = vunpack.i.l.bf16 %v7299_v12  ;;  %v7306_v60 = vunpack.i.h.bf16 %v7304_v44  ;;  %v7305_v25 = vunpack.i.l.bf16 %v7304_v44 }
 0x6ed   : > { %v6419_v63 = vsel %vm6418_vm2, %v6416_v43, %v7300_v20  ;;  %v6420_v14 = vsel %vm6418_vm2, %v6417_v37, %v7301_v47 }
 0x6ee   : > { %v7309_v5 = vpop.permute.xlu0 %7308  ;;  %v6421_v52 = vsel %vm5218_vm11, %v6419_v63, %v7305_v25  ;;  %v6422_v3 = vsel %vm5218_vm11, %v6420_v14, %v7306_v60 }
 0x6ef   : > { %v7311_v18 = vunpack.i.h.bf16 %v7309_v5  ;;  %v7310_v42 = vunpack.i.l.bf16 %v7309_v5 }
 0x6f1   : > { %v6424_v49 = vsel %vm6423_vm3, %v6421_v52, %v7310_v42  ;;  %v6425_v53 = vsel %vm6423_vm3, %v6422_v3, %v7311_v18 }
 0x72a   : > { %v7314_v8 = vpop.permute.xlu1 %7313 }
 0x72b   : > { %v7316_v51 = vunpack.i.h.bf16 %v7314_v8  ;;  %v7315_v38 = vunpack.i.l.bf16 %v7314_v8 }
 0x72d   : > { %v6435_v32 = vsel %vm5221_vm12, %v6425_v53, %v7316_v51  ;;  %v6434_v57 = vsel %vm5221_vm12, %v6424_v49, %v7315_v38  ;;  %v6437_v30 = vpack.c.bf16 %v7316_v51, %v7315_v38 }
 0x72e   : > { %v6436_v59 = vpack.c.bf16 %v6435_v32, %v6434_v57 }
 0x72f   : > { %6851 = vmatprep.mubr.msk.bf16.mxu0 %vm5221_vm12, %v6437_v30 }
 0x730   : > { %6517 = vmatmul.mubr.bf16.vlgmr.msra.gmra.mrb[72].mxu0 %v6436_v59 }
 0x803   : > { %v6518_v26 = vpop.f32.mrb[72].mxu0 }
 0x804   : > { %v6519_v21 = vadd.f32 %v6850_v27, %v6518_v26  ;;  %v6520_v4 = vpop.f32.mrb[73].mxu0 }
 0x805   : > { %v6521_v15 = vpop.f32.mrb[74].mxu0 }
 0x806   : > { %v6525_v0 = vmul.f32 %v6519_v21, %v9615_v29  ;;  %v6522_v23 = vadd.f32 %v6850_v27, %v6521_v15  ;;  %v6523_v9 = vpop.f32.mrb[75].mxu0 }
 0x808   : > { %v6526_v2 = vmul.f32 %v6522_v23, %v9587_v6  ;;  %v6527_v17 = vadd.f32 %v7385_v40, %v6525_v0 }
 0x80a   : > { %v6529_v33 = vsel %vm538_vm0, %v6527_v17, 0.0  ;;  %v6528_v36 = vadd.f32 %v7386_v16, %v6526_v2 }
 0x80b   : > { %6530 = vadd.xlane.f32.xlu0 %v6529_v33 }
 0x80c   : > { %v6532_v41 = vsel %vm538_vm0, %v6528_v36, 0.0 }
 0x80d   : > { %6533 = vadd.xlane.f32.xlu1 %v6532_v41 }
 0x898   : > { %v6531_v13 = vpop.xlane.xlu0 %6530 }
 0x899   : > { %v6536_v31 = vmul.f32 0.0625, %v6531_v13 }
 0x89a   : > { %v6534_v54 = vpop.xlane.xlu1 %6533 }
 0x89b   : > { %v6538_v22 = vsub.f32 %v6527_v17, %v6536_v31  ;;  %v6537_v46 = vmul.f32 0.0625, %v6534_v54 }
 0x89d   : > { %v6539_v48 = vsub.f32 %v6528_v36, %v6537_v46  ;;  %v6540_v61 = vmul.f32 %v6538_v22, %v6538_v22 }
 0x89f   : > { %v6542_v6 = vsel %vm538_vm0, %v6540_v61, 0.0  ;;  %v6541_v39 = vmul.f32 %v6539_v48, %v6539_v48 }
 0x8a0   : > { %6543 = vadd.xlane.f32.xlu0 %v6542_v6 }
 0x8a1   : > { %v6545_v28 = vsel %vm538_vm0, %v6541_v39, 0.0 }
 0x8a4   : > { %6546 = vadd.xlane.f32.xlu0 %v6545_v28 }
 0x92d   : > { %v6544_v10 = vpop.xlane.xlu0 %6543 }
 0x92e   : > { %v6548_v56 = vmul.f32 0.0625, %v6544_v10 }
 0x930   : > { %v6550_v7 = vadd.f32 1e-05, %v6548_v56 }
 0x931   : > { %v6547_v58 = vpop.xlane.xlu0 %6546 }
 0x932   : > { %7381 = vrsqrt.f32 %v6550_v7  ;;  %v6549_v12 = vmul.f32 0.0625, %v6547_v58 }
 0x934   : > { %v6551_v55 = vadd.f32 1e-05, %v6549_v12 }
 0x936   : > { %7383 = vrsqrt.f32 %v6551_v55 }
 0x93c   : > { %v7382_v11 = vpop.eup %7381 }
 0x93d   : > { %v6554_v19 = vmul.f32 %v7382_v11, %v6538_v22 }
 0x93f   : > { %v6563_v35 = vmul.f32 %v6852_v1, %v6554_v19 }
 0x940   : > { %v7384_v34 = vpop.eup %7383 }
 0x941   : > { %v6555_v45 = vmul.f32 %v7384_v34, %v6539_v48  ;;  %v6572_v50 = vadd.f32 %v6853_v24, %v6563_v35 }
 0x943   : > { %v6564_v62 = vmul.f32 %v6852_v1, %v6555_v45  ;;  %6574 = vst.msk [vmem:[%s469_s26] sm:$0xff] %vm538_vm0, %v6572_v50 }
 0x945   : > { %v6573_v44 = vadd.f32 %v6853_v24, %v6564_v62 }
 0x947   : > { %6575 = vst.msk [vmem:[%s469_s26 + $0x8] sm:$0xff] %vm538_vm0, %v6573_v44 }
 0x948   : > { %7412 = shalt.err (!%p7409_p8)
}
 0x949   : > { %s7413_s27 = scalar_lea.hbm %s9436_s24, 256  ;;  %s7417_s2 = scalar_lea.hbm %s9496_s13, 512 }
 0x94a   : > { %p7414_p9 = scmp.ne.s32.totalorder %s9436_s24, %s7413_s27  ;;  %p7418_p0 = scmp.lt.u32.totalorder %s9436_s24, %s9496_s13 }
 0x94b   : > { %p7419_p1 = scmp.lt.u32.totalorder %s7417_s2, %s7413_s27  ;;  %p7421_p3 = scmp.lt.u32.totalorder %s7413_s27, %s9436_s24 }
 0x94c   : > { %p7415_p12 = pnand %p7414_p9, %p7595_p10 }
 0x94d   : > { %p7420_p2 = por %p7419_p1, %p7418_p0 }
 0x94e   : > { %p7416_p13 = pneg %p7415_p12 }
 0x94f   : > { %p7422_p4 = por %p7421_p3, %p7420_p2 }
 0x951   : > { %p7423_p5 = pnand %p7422_p4, %p7416_p13 }
 0x953   : > { %7426 = shalt.err (!%p7423_p5)
}
 0x954   : > { %s7483_s20 = smov 128  }
 0x955   : > { %7183 = dma.vmem_to_hbm [thread:$0]  (%p7595_p10), %s9438_s17, 256, %s9436_s24, %s9441_s1, %s7483_s20, %s7483_s20, %s7478_s19  }
 0x956 PF: > { %p7189_p6 = scmp.ge.s32.totalorder %s7463_s15, 2  ;;  %s6605_s16 = sand.u32 1, %s7451_s30  }
 0x957   : > { %s6606_s21 = scalar_lea.sflag [#allocation5], %s6605_s16 }
 0x958   : > { %p7186_p7 = pnand %p7189_p6, %p7599_p11 }
 0x95a   : > { %7446 = dma.done.wait (!%p7186_p7), %s6606_s21, 256  }
 0x95b   : > { %7448 = vsyncadd (!%p7186_p7), %s6606_s21, 4294967040  ;;  %s9616_s22 = sld [smem:[#allocation8_spill]]  ;;  %p29_p8 = scmp.ge.s32.totalorder %s7582_s18, 4  }
 0x95c   : > { %s9617_s30 = smov %s7455_s14  ;;  %s9618_s14 = smov %s7459_s0 }
 0x95d   : > { %s9620_s15 = smov %s7582_s18  ;;  %31 = sbr.rel (!%p29_p8) target bundleno = 20 (0x14), region = 115 }
 0x961   : > { %s9619_s0 = smov %s9616_s22 }
 0x964   :  { %6611 = vsyncpa [#allocation5], 1 }
 0x965   :  { %6613 = vsyncpa [#allocation5 + $0x1], 1 }

</bundles_post_ra>
